<compile_context>
chip_gen: v6e
topology: v6e:2x2x1
jax: 0.10.0
libtpu: 0.0.40
codegen_flags: <defaults>
</compile_context>

<pallas_src>
import functools

import jax
import jax.numpy as jnp
from jax.experimental import pallas as pl
from jax.experimental.pallas import tpu as pltpu

# ---------------- config (stand-ins for the missing `args`) -----------------
IN_CH = 3
OUT_CH = 3
NF = 8            # args.num_features
NUM_GROUPS = 3    # args.num_groups
NUM_CFBS = 2      # args.num_cfbs
SCALE = 2         # args.scale  -> ConvTranspose2d kernel=6 / stride=2 / padding=2
DK, DSTRIDE, DPAD = 6, 2, 2
KW = 7            # self.kernel_width
KDIM = KW * KW
PRELU_SLOPE = 0.2  # nn.PReLU(num_parameters=1, init=0.2)  (deterministic init)
LEAKY_SLOPE = 0.1
BN_EPS = 1e-5      # BatchNorm2d folded in inference mode (default running stats)

B = 2
H_LR = W_LR = 8

LANE = 128


def _round_up(x, m):
    return (x + m - 1) // m * m


def _slope_of(act):
    if act in (None, "none"):
        return 1.0                     # slope 1.0 == identity
    if act == "prelu":
        # TODO(synk): a learned per-layer PReLU scalar would have to be passed
        # as data (SMEM scalar) instead of this compile-time init constant.
        return PRELU_SLOPE
    if act == "leaky":
        return LEAKY_SLOPE
    raise NotImplementedError(f"activation {act}")


# ======================= Pallas kernels =====================================
def _bmm_t_kernel(w_ref, x_ref, b_ref, o_ref, *, slopes):
    """(Cout, K) @ (K, M) tile of layer pl.program_id(0); bias + leaky/prelu
    fused in f32.  `slopes` is a per-layer compile-time tuple (1.0 == no act).
    Output store is lane-dense (M is a multiple of 128)."""
    y = jnp.dot(w_ref[...], x_ref[...], preferred_element_type=jnp.float32)
    y = y + b_ref[...]
    uniq = sorted(set(slopes))
    if uniq != [1.0]:
        if len(uniq) == 1:
            s = jnp.float32(slopes[0])
        else:
            layer = pl.program_id(0)
            s = jnp.float32(slopes[0])
            for idx in range(1, len(slopes)):
                s = jnp.where(layer == idx, jnp.float32(slopes[idx]), s)
        y = jnp.where(y >= 0.0, y, s * y)
    o_ref[...] = y


def _bmm_t_sr_kernel(w_ref, x_ref, b_ref, u_ref, o_ref):
    """Output-head 3x3 conv (act=None) with the SR epilogue fused:
       (clip(conv + up, -1, 1) + 1) * 127.5  -- pure VPU filler under the
       matmul's slack; saves a launch and an HBM round trip of res_all."""
    y = jnp.dot(w_ref[...], x_ref[...], preferred_element_type=jnp.float32)
    y = y + b_ref[...]
    y = jnp.clip(y + u_ref[...], -1.0, 1.0)
    o_ref[...] = (y + 1.0) * 127.5


def batched_matmul_t(Wt, X, Bt, slopes=None, ups=None):
    """Wt: (L, Cout, K), X: (L, K, M), Bt: (L, Cout, 1)  ->  (L, Cout, M) f32.

    Transposed (lane-dense) layout.  One grid step per layer: no M split
    (single TC on v5e/v6e does not benefit; the L axis feeds the second TC on
    v7x and every L==1 call here has M==128 which cannot be split lane-
    densely).  Operands bf16 for the MXU; accumulation / bias / epilogue f32.
    When `ups` is given the SR epilogue is fused and `slopes` is ignored."""
    L, Cout, K = Wt.shape
    M = X.shape[2]
    Mp = _round_up(M, LANE)
    if Mp != M:
        X = jnp.pad(X, ((0, 0), (0, 0), (0, Mp - M)))
        if ups is not None:
            ups = jnp.pad(ups, ((0, 0), (0, 0), (0, Mp - M)))
    Wb = Wt.astype(jnp.bfloat16)
    Xb = X.astype(jnp.bfloat16)
    Bf = Bt.astype(jnp.float32).reshape(L, Cout, 1)

    flops = 2 * L * Cout * K * Mp
    bytes_accessed = (Wb.size + Xb.size) * 2 + Bf.size * 4 + L * Cout * Mp * 4

    in_specs = [
        pl.BlockSpec((None, Cout, K), lambda l: (l, 0, 0)),
        pl.BlockSpec((None, K, Mp), lambda l: (l, 0, 0)),
        pl.BlockSpec((None, Cout, 1), lambda l: (l, 0, 0)),
    ]
    operands = [Wb, Xb, Bf]
    if ups is None:
        kern = functools.partial(_bmm_t_kernel,
                                 slopes=tuple(float(s) for s in slopes))
    else:
        kern = _bmm_t_sr_kernel
        in_specs.append(pl.BlockSpec((None, Cout, Mp), lambda l: (l, 0, 0)))
        operands.append(ups.astype(jnp.float32))
        bytes_accessed += L * Cout * Mp * 4

    out = pl.pallas_call(
        kern,
        out_shape=jax.ShapeDtypeStruct((L, Cout, Mp), jnp.float32),
        grid=(L,),
        in_specs=in_specs,
        out_specs=pl.BlockSpec((None, Cout, Mp), lambda l: (l, 0, 0)),
        compiler_params=pltpu.CompilerParams(
            dimension_semantics=("parallel",)),
        cost_estimate=pl.CostEstimate(flops=flops, transcendentals=0,
                                      bytes_accessed=bytes_accessed),
    )(*operands)
    return out[:, :, :M]


def _fac_kernel(a_ref, b_ref, o_ref):
    # (D, 128-lane) bf16 operands -> f32 multiply + sublane reduce -> (1, 128)
    a = a_ref[...].astype(jnp.float32)
    b = b_ref[...].astype(jnp.float32)
    o_ref[...] = jnp.sum(a * b, axis=0, keepdims=True)


def fac_reduce_t(at, bt):
    """sum(a*b) over the D (sublane) axis of (D, M) operands.  M is gridded
    into 128-lane 'parallel' blocks so BlockSpec double-buffers the DMA;
    operands travel as bf16, math is f32, the output store is lane-dense."""
    D, M = at.shape
    Mp = _round_up(M, LANE)
    if Mp != M:
        at = jnp.pad(at, ((0, 0), (0, Mp - M)))
        bt = jnp.pad(bt, ((0, 0), (0, Mp - M)))
    out = pl.pallas_call(
        _fac_kernel,
        out_shape=jax.ShapeDtypeStruct((1, Mp), jnp.float32),
        grid=(Mp // LANE,),
        in_specs=[pl.BlockSpec((D, LANE), lambda i: (0, i)),
                  pl.BlockSpec((D, LANE), lambda i: (0, i))],
        out_specs=pl.BlockSpec((1, LANE), lambda i: (0, i)),
        compiler_params=pltpu.CompilerParams(
            dimension_semantics=("parallel",)),
    )(at.astype(jnp.bfloat16), bt.astype(jnp.bfloat16))
    return out[0, :M]


# ======================= conv / deconv via im2col ===========================
def im2col_t(x, k, stride, padding, dilation=1):
    """x: (C, N, H, W) (CNHW working layout) -> patches (C*k*k, N*Ho*Wo).
    K is (c, kh, kw)-major to match w.reshape(Cout, Cin*k*k); no transposes
    are needed -- pad + strided slices + stack emit the matrix directly."""
    C, N, H, W = x.shape
    if k == 1 and stride == 1 and dilation == 1 and padding == 0:
        return x.reshape(C, N * H * W), N, H, W
    xp = jnp.pad(x, ((0, 0), (0, 0), (padding, padding), (padding, padding)))
    Hp, Wp = H + 2 * padding, W + 2 * padding
    keff = (k - 1) * dilation + 1
    Ho = (Hp - keff) // stride + 1
    Wo = (Wp - keff) // stride + 1
    slices = []
    for i in range(k):
        for j in range(k):
            slices.append(xp[:, :,
                             i * dilation:i * dilation + (Ho - 1) * stride + 1:stride,
                             j * dilation:j * dilation + (Wo - 1) * stride + 1:stride])
    p = jnp.stack(slices, axis=1)            # (C, k*k, N, Ho, Wo)
    return p.reshape(C * k * k, N * Ho * Wo), N, Ho, Wo


def _fold_bn(p):
    w, b = p["w"], p["b"]
    if "bn" in p:                            # fold eval-mode BatchNorm
        s = p["bn"]["gamma"] * jax.lax.rsqrt(p["bn"]["var"] + BN_EPS)
        w = w * s[:, None, None, None]
        b = (b - p["bn"]["mean"]) * s + p["bn"]["beta"]
    return w, b


def apply_conv_many(ps, xs, stride=1, padding=None, dilation=1, act="prelu",
                    acts=None, ups=None):
    """len(ps) same-shape convolutions (CNHW inputs, one each) in a single
    Pallas matmul with a leading layer grid axis.  Returns CNHW outputs, or
    the raw (L, Cout, M) result (+ dims) when the SR epilogue is fused."""
    L = len(ps)
    Cout, Cin, k, _ = ps[0]["w"].shape
    if padding is None:                      # get_valid_padding
        keff = k + (k - 1) * (dilation - 1)
        padding = (keff - 1) // 2
    ws, bs = zip(*[_fold_bn(p) for p in ps])
    pats = []
    n = ho = wo = None
    for x in xs:
        p, n, ho, wo = im2col_t(x.astype(jnp.bfloat16), k, stride, padding,
                                dilation)
        pats.append(p)
    X = jnp.stack(pats, 0)                                          # (L, K, M)
    Wt = jnp.stack([w.reshape(Cout, Cin * k * k) for w in ws], 0)   # (L, Cout, K)
    Bt = jnp.stack([b.reshape(Cout, 1) for b in bs], 0)             # (L, Cout, 1)
    if acts is None:
        acts = [act] * L
    slopes = [_slope_of(a) for a in acts]
    out = batched_matmul_t(Wt, X, Bt, slopes=slopes, ups=ups)       # (L, Cout, M)
    if ups is not None:
        return out, n, ho, wo
    out = out.reshape(L, Cout, n, ho, wo)
    return [out[l] for l in range(L)]


def apply_conv(p, x, stride=1, padding=None, dilation=1, act="prelu"):
    return apply_conv_many([p], [x], stride=stride, padding=padding,
                           dilation=dilation, act=act)[0]


def _deconv_phase_weight(w):
    """ConvTranspose2d(k=6, s=2, p=2) weight (Cin, Cout, 6, 6) -> stacked
    4-phase 3x3 conv weight (4*Cout, Cin*9).  Phase p = ry*2 + rx produces the
    HR pixels (2y+ry, 2x+rx) as a stride-1 / pad-1 3x3 conv over the LR input:
      w_phase[co, ci, jy, jx] = w[ci, co, 4 - 2*jy + ry, 4 - 2*jx + rx]."""
    cin, cout = w.shape[0], w.shape[1]
    phases = []
    for ry in range(2):
        for rx in range(2):
            wp = jnp.flip(w[:, :, ry::2, rx::2], axis=(2, 3))   # (Cin, Cout, 3, 3)
            wp = wp.transpose(1, 0, 2, 3)                       # (Cout, Cin, 3, 3)
            phases.append(wp.reshape(cout, cin * 9))
    return jnp.concatenate(phases, axis=0)                      # (4*Cout, Cin*9)


def apply_deconv_many(ps, xs, act="prelu"):
    """ConvTranspose2d(k=6, s=2, p=2) via the 4-phase sub-pixel decomposition:
    one batched matmul on the LR-resolution patches (K = Cin*9, Cout' = 4*Cout,
    ~4x fewer MACs than the zero-dilated im2col lowering, no scatter), then an
    XLA pixel-shuffle interleave back to CNHW."""
    assert SCALE == 2, "4-phase decomposition written for scale 2"
    L = len(ps)
    Cin, Cout = ps[0]["w"].shape[0], ps[0]["w"].shape[1]
    pats = []
    n = h = w_ = None
    for x in xs:
        p, n, h, w_ = im2col_t(x.astype(jnp.bfloat16), 3, 1, 1)
        pats.append(p)
    X = jnp.stack(pats, 0)                                            # (L, Cin*9, M)
    Wt = jnp.stack([_deconv_phase_weight(p["w"]) for p in ps], 0)     # (L, 4*Cout, Cin*9)
    Bt = jnp.stack([jnp.tile(p["b"], 4).reshape(4 * Cout, 1) for p in ps], 0)
    slopes = [_slope_of(act)] * L
    out = batched_matmul_t(Wt, X, Bt, slopes=slopes)                  # (L, 4*Cout, M)
    out = out.reshape(L, 2, 2, Cout, n, h, w_)
    out = out.transpose(0, 3, 4, 5, 1, 6, 2).reshape(L, Cout, n, 2 * h, 2 * w_)
    return [out[l] for l in range(L)]


# ======================= parameters =========================================
_KEY = [jax.random.PRNGKey(0)]


def _nk():
    _KEY[0], sub = jax.random.split(_KEY[0])
    return sub


def conv_params(cin, cout, k, bn=False):
    p = {"w": 0.05 * jax.random.normal(_nk(), (cout, cin, k, k), jnp.float32),
         "b": 0.01 * jax.random.normal(_nk(), (cout,), jnp.float32)}
    if bn:
        p["bn"] = {"gamma": jnp.ones((cout,), jnp.float32),
                   "beta": jnp.zeros((cout,), jnp.float32),
                   "mean": jnp.zeros((cout,), jnp.float32),
                   "var": jnp.ones((cout,), jnp.float32)}
    return p


def deconv_params(cin, cout, k):
    return {"w": 0.05 * jax.random.normal(_nk(), (cin, cout, k, k), jnp.float32),
            "b": 0.01 * jax.random.normal(_nk(), (cout,), jnp.float32)}


def make_srb():
    return {
        "compress_in": conv_params(NF, NF, 1),
        "up": [deconv_params(NF, NF, DK) for _ in range(NUM_GROUPS)],
        "down": [conv_params(NF, NF, DK) for _ in range(NUM_GROUPS)],
        "uptran": [conv_params(NF * (i + 1), NF, 1) for i in range(1, NUM_GROUPS)],
        "downtran": [conv_params(NF * (i + 1), NF, 1) for i in range(1, NUM_GROUPS)],
        "compress_out": conv_params(NUM_GROUPS * NF, NF, 1),
    }


def make_cfb():
    p = make_srb()
    p["compress_in"] = conv_params(3 * NF, NF, 1)
    p["re_guide"] = conv_params(2 * NF, NF, 1)
    return p


def make_params():
    return {
        "conv_in_over": conv_params(IN_CH, 4 * NF, 3),
        "feat_in_over": conv_params(4 * NF, NF, 1),
        "conv_in_under": conv_params(IN_CH, 4 * NF, 3),
        "feat_in_under": conv_params(4 * NF, NF, 1),
        "srb_1": make_srb(),
        "srb_2": make_srb(),
        "out_over": deconv_params(NF, NF, DK),
        "conv_out_over": conv_params(NF, OUT_CH, 3),
        "out_under": deconv_params(NF, NF, DK),
        "conv_out_under": conv_params(NF, OUT_CH, 3),
        "cfbs_1": [make_cfb() for _ in range(NUM_CFBS)],
        "cfbs_2": [make_cfb() for _ in range(NUM_CFBS)],
        "out_1": [deconv_params(NF, NF, DK) for _ in range(NUM_CFBS)],
        "conv_out_1": [conv_params(NF, OUT_CH, 3) for _ in range(NUM_CFBS)],
        "out_2": [deconv_params(NF, NF, DK) for _ in range(NUM_CFBS)],
        "conv_out_2": [conv_params(NF, OUT_CH, 3) for _ in range(NUM_CFBS)],
        "feature0": [conv_params(IN_CH, NF, 3, bn=True),
                     conv_params(NF, NF, 3, bn=True),
                     conv_params(NF, NF, 3, bn=True)],
        "kernel": [conv_params(NF * 3, NF, 3),
                   conv_params(NF, NF, 3),
                   conv_params(NF, KDIM * 4, 1)],
        "res": [conv_params(NF * 3, NF, 3, bn=True),
                conv_params(NF, NF, 3, bn=True),
                conv_params(NF, OUT_CH, 1)],
    }


# ======================= sub-module forwards =================================
def srb_pair_forward(ps, f_ins):
    """SRB_1 and SRB_2 in lockstep: every layer of the pair is one batched
    Pallas matmul (L=2).  All features are CNHW; channel concat is axis 0."""
    n = len(ps)
    fs = apply_conv_many([p["compress_in"] for p in ps], f_ins, act="prelu")
    lr = [[f] for f in fs]
    hr = [[] for _ in fs]
    for idx in range(NUM_GROUPS):
        LD_L = [jnp.concatenate(l, axis=0) for l in lr]
        if idx > 0:
            LD_L = apply_conv_many([p["uptran"][idx - 1] for p in ps], LD_L,
                                   act="prelu")
        LD_H = apply_deconv_many([p["up"][idx] for p in ps], LD_L, act="prelu")
        for m in range(n):
            hr[m].append(LD_H[m])
        LD_Hc = [jnp.concatenate(h, axis=0) for h in hr]
        if idx > 0:
            LD_Hc = apply_conv_many([p["downtran"][idx - 1] for p in ps], LD_Hc,
                                    act="prelu")
        LD_L = apply_conv_many([p["down"][idx] for p in ps], LD_Hc,
                               stride=DSTRIDE, padding=DPAD, act="prelu")
        for m in range(n):
            lr[m].append(LD_L[m])
    return apply_conv_many([p["compress_out"] for p in ps],
                           [jnp.concatenate(l[1:], axis=0) for l in lr],
                           act="prelu")


def cfb_pair_forward(ps, f_ins, g1s, g2s):
    """CFB_1[i] and CFB_2[i] are mutually independent -> run them in lockstep."""
    n = len(ps)
    xs = [jnp.concatenate([f_ins[m], g1s[m], g2s[m]], axis=0) for m in range(n)]
    xs = apply_conv_many([p["compress_in"] for p in ps], xs, act="prelu")
    lr = [[x] for x in xs]
    hr = [[] for _ in xs]
    for idx in range(NUM_GROUPS):
        LD_L = [jnp.concatenate(l, axis=0) for l in lr]
        if idx > 0:
            LD_L = apply_conv_many([p["uptran"][idx - 1] for p in ps], LD_L,
                                   act="prelu")
        LD_H = apply_deconv_many([p["up"][idx] for p in ps], LD_L, act="prelu")
        for m in range(n):
            hr[m].append(LD_H[m])
        LD_Hc = [jnp.concatenate(h, axis=0) for h in hr]
        if idx > 0:
            LD_Hc = apply_conv_many([p["downtran"][idx - 1] for p in ps], LD_Hc,
                                    act="prelu")
        LD_L = apply_conv_many([p["down"][idx] for p in ps], LD_Hc,
                               stride=DSTRIDE, padding=DPAD, act="prelu")
        if idx == 2:
            x_mid = [jnp.concatenate([LD_L[m], g2s[m]], axis=0) for m in range(n)]
            LD_L = apply_conv_many([p["re_guide"] for p in ps], x_mid, act="prelu")
        for m in range(n):
            lr[m].append(LD_L[m])
    return apply_conv_many([p["compress_out"] for p in ps],
                           [jnp.concatenate(l[1:], axis=0) for l in lr],
                           act="prelu")


def feature0_forward(p, x):
    x = apply_conv(p[0], x, stride=2, padding=1, act="prelu")
    x = apply_conv(p[1], x, stride=1, padding=1, act="prelu")
    x = apply_conv(p[2], x, stride=1, padding=1, act="prelu")
    return x


def kernel_res_forward(pk, pr, x):
    """`kernel` and `res` branches share layer shapes -> batch layers 0 and 1."""
    k1, r1 = apply_conv_many([pk[0], pr[0]], [x, x], padding=1,
                             acts=["leaky", "prelu"])
    k2, r2 = apply_conv_many([pk[1], pr[1]], [k1, r1], padding=1,
                             acts=["leaky", "prelu"])
    kern = apply_conv(pk[2], k2, padding=0, act=None)        # (196, N, 8, 8)
    res = apply_conv(pr[2], r2, padding=0, act="leaky")      # (3,   N, 8, 8)
    return kern, res


def fac_apply(feat_in, kernel, ksize):
    """Torch FAC (channels==3, kernels==4*ksize^2 branch), NCHW operands.
    The raw row-major regrouping (N,16,16,C,7,7)->(N,8,8,C,196) matches
    torch's .contiguous().reshape exactly (both regroup the permuted logical
    layout row-major)."""
    N, C, Hf, Wf = feat_in.shape
    _, Kc, H, W = kernel.shape
    pad = (ksize - 1) // 2
    fi = jnp.pad(feat_in, ((0, 0), (0, 0), (pad, pad), (pad, pad)), mode="edge")
    rows = []
    for a in range(ksize):
        cols = [fi[:, :, a:a + Hf, b:b + Wf] for b in range(ksize)]
        rows.append(jnp.stack(cols, axis=-1))          # (N,C,Hf,Wf,kw)
    unf = jnp.stack(rows, axis=-2)                     # (N,C,Hf,Wf,kh,kw)
    unf = unf.transpose(0, 2, 3, 1, 5, 4)              # (N,Hf,Wf,C,kw,kh)
    feat = unf.reshape(N, H, W, C, ksize * ksize * 4)  # raw regroup (as torch)
    kr = kernel.transpose(0, 2, 3, 1).reshape(N, H, W, 1, 2 * ksize, 2 * ksize)
    kr = jnp.concatenate([kr, kr, kr], axis=3)
    kr = kr.transpose(0, 1, 2, 3, 5, 4).reshape(N, H, W, C, -1)
    D = ksize * ksize * 4
    at = feat.transpose(4, 0, 1, 2, 3).reshape(D, -1)  # (D, M) lane-dense
    bt = kr.transpose(4, 0, 1, 2, 3).reshape(D, -1)
    out = fac_reduce_t(at, bt)                         # (M,)
    return out.reshape(N, H, W, C).transpose(0, 3, 1, 2)


def bilinear_up(x, scale):
    N, C, H, W = x.shape
    return jax.image.resize(x, (N, C, H * scale, W * scale), method="bilinear")


def area_up2(x):
    # F.interpolate(scale_factor=2, mode='area') for 2x upsample == replication
    return jnp.repeat(jnp.repeat(x, 2, axis=2), 2, axis=3)


# ======================= full forward ========================================
def cfnet_forward(params, lr_over, lr_under):
    up_over = bilinear_up(lr_over, SCALE)      # NCHW images stay NCHW
    up_under = bilinear_up(lr_under, SCALE)

    lo_c = lr_over.transpose(1, 0, 2, 3)       # CNHW working layout for features
    lu_c = lr_under.transpose(1, 0, 2, 3)

    # input feature extraction: over || under batched per layer
    c_over, c_under = apply_conv_many(
        [params["conv_in_over"], params["conv_in_under"]],
        [lo_c, lu_c], acts=["prelu", None])
    f_in_over, f_in_under = apply_conv_many(
        [params["feat_in_over"], params["feat_in_under"]],
        [c_over, c_under], act="prelu")

    g_over, g_under = srb_pair_forward(
        [params["srb_1"], params["srb_2"]], [f_in_over, f_in_under])

    g_1, g_2 = [g_over], [g_under]
    for i in range(NUM_CFBS):
        o1, o2 = cfb_pair_forward(
            [params["cfbs_1"][i], params["cfbs_2"][i]],
            [f_in_over, f_in_under],
            [g_1[i], g_2[i]], [g_2[i], g_1[i]])
        g_1.append(o1)
        g_2.append(o2)

    def fusion_stage(feat_img, cat_a, cat_b):
        # feat_img: NCHW HR image; cat_a/cat_b: CNHW LR features
        f0 = feature0_forward(params["feature0"], feat_img.transpose(1, 0, 2, 3))
        img_cat = jnp.concatenate([f0, cat_a, cat_b], axis=0)
        kern_c, res_c = kernel_res_forward(params["kernel"], params["res"],
                                           img_cat)
        kern = kern_c.transpose(1, 0, 2, 3)           # NCHW (N,196,8,8)
        res = res_c.transpose(1, 0, 2, 3)             # NCHW (N,3,8,8)
        fac = fac_apply(feat_img, kern, KW)
        return feat_img + area_up2(fac) + area_up2(res)

    drb = []
    img_average = bilinear_up((lr_over + lr_under) / 2.0, SCALE)
    drb.append(fusion_stage(img_average, g_2[0], g_1[0]))
    drb.append(fusion_stage(drb[0], g_2[1], g_1[1]))
    drb.append(fusion_stage(drb[1], g_1[2], g_2[2]))

    # output heads: 6 identical-shape deconvs (one batched matmul), then the
    # 6 identical-shape 3x3 out-convs with the SR clamp/scale epilogue fused
    # into the same matmul (lane-dense `up` operand per layer).
    dec_ps = ([params["out_over"], params["out_under"]]
              + [params["out_1"][j] for j in range(NUM_CFBS)]
              + [params["out_2"][j] for j in range(NUM_CFBS)])
    dec_xs = ([g_over, g_under]
              + [g_1[j + 1] for j in range(NUM_CFBS)]
              + [g_2[j + 1] for j in range(NUM_CFBS)])
    dec_out = apply_deconv_many(dec_ps, dec_xs, act="prelu")

    cout_ps = ([params["conv_out_over"], params["conv_out_under"]]
               + [params["conv_out_1"][j] for j in range(NUM_CFBS)]
               + [params["conv_out_2"][j] for j in range(NUM_CFBS)])
    up_o_t = up_over.transpose(1, 0, 2, 3).reshape(OUT_CH, -1)
    up_u_t = up_under.transpose(1, 0, 2, 3).reshape(OUT_CH, -1)
    ups = jnp.stack([up_o_t, up_u_t]
                    + [up_o_t] * NUM_CFBS + [up_u_t] * NUM_CFBS, 0)
    sr_t, n, ho, wo = apply_conv_many(cout_ps, dec_out, act=None, ups=ups)
    sr = sr_t.reshape(len(cout_ps), OUT_CH, n, ho, wo).transpose(0, 2, 1, 3, 4)
    sr_over = [sr[0]] + [sr[2 + j] for j in range(NUM_CFBS)]
    sr_under = [sr[1]] + [sr[2 + NUM_CFBS + j] for j in range(NUM_CFBS)]

    # NOTE: matches torch exactly -- drb[2] is clamped and the clamp result is
    # discarded, so only the affine scale is applied (plain jnp; XLA fuses it).
    fusion = (drb[2] + 1.0) * 127.5
    return sr_over, sr_under, fusion


# ======================= main ================================================
if __name__ == "__main__":
    params = make_params()

    key = jax.random.PRNGKey(0)
    k1, k2 = jax.random.split(key)
    lr_over = jax.random.uniform(k1, (B, IN_CH, H_LR, W_LR), jnp.float32,
                                 minval=-1.0, maxval=1.0)
    lr_under = jax.random.uniform(k2, (B, IN_CH, H_LR, W_LR), jnp.float32,
                                  minval=-1.0, maxval=1.0)

    fwd = jax.jit(cfnet_forward)
    sr_over, sr_under, fusion = jax.block_until_ready(
        fwd(params, lr_over, lr_under))

    assert len(sr_over) == NUM_CFBS + 1 and len(sr_under) == NUM_CFBS + 1
    assert sr_over[0].shape == (B, OUT_CH, H_LR * SCALE, W_LR * SCALE)
    assert sr_under[-1].shape == (B, OUT_CH, H_LR * SCALE, W_LR * SCALE)
    assert fusion.shape == (B, OUT_CH, H_LR * SCALE, W_LR * SCALE)
    assert all(bool(jnp.isfinite(x).all())
               for x in list(sr_over) + list(sr_under) + [fusion])
    print("KERNEL_OK")
</pallas_src>

<mosaic_0001>
module attributes {stable_mosaic.version = 11 : i64} {
  func.func @_bmm_t_kernel(%arg0: i32, %arg1: memref<1x32x27xbf16, #tpu.memory_space<vmem>>, %arg2: memref<1x27x128xbf16, #tpu.memory_space<vmem>>, %arg3: memref<1x32x1xf32, #tpu.memory_space<vmem>>, %arg4: memref<1x32x128xf32, #tpu.memory_space<vmem>>) attributes {dimension_semantics = [#tpu.dimension_semantics<parallel>], iteration_bounds = array<i64: 2>, scalar_prefetch = 0 : i64, scratch_operands = 0 : i64, tpu.core_type = #tpu.core_type<tc>, window_params = [{transform_indices = @transform_0, window_bounds = array<i64: 1, 32, 27>}, {transform_indices = @transform_1, window_bounds = array<i64: 1, 27, 128>}, {transform_indices = @transform_2, window_bounds = array<i64: 1, 32, 1>}, {transform_indices = @transform_3, window_bounds = array<i64: 1, 32, 128>}]} {
    %c0 = arith.constant 0 : index
    %c0_0 = arith.constant 0 : index
    %c0_1 = arith.constant 0 : index
    %0 = vector.load %arg1[%c0, %c0_0, %c0_1] : memref<1x32x27xbf16, #tpu.memory_space<vmem>>, vector<1x32x27xbf16>
    %1 = vector.shape_cast %0 : vector<1x32x27xbf16> to vector<32x27xbf16>
    %c0_2 = arith.constant 0 : index
    %c0_3 = arith.constant 0 : index
    %c0_4 = arith.constant 0 : index
    %2 = vector.load %arg2[%c0_2, %c0_3, %c0_4] : memref<1x27x128xbf16, #tpu.memory_space<vmem>>, vector<1x27x128xbf16>
    %3 = vector.shape_cast %2 : vector<1x27x128xbf16> to vector<27x128xbf16>
    %cst = arith.constant dense<0.000000e+00> : vector<32x128xf32>
    %4 = tpu.matmul %1, %3, %cst {dimension_numbers = #tpu.dot_dimension_numbers<[1], [0], [0], [1], [0, 0, 1, 1], [], []>} : vector<32x27xbf16>, vector<27x128xbf16>, vector<32x128xf32> -> vector<32x128xf32>
    %c0_5 = arith.constant 0 : index
    %c0_6 = arith.constant 0 : index
    %c0_7 = arith.constant 0 : index
    %5 = vector.load %arg3[%c0_5, %c0_6, %c0_7] : memref<1x32x1xf32, #tpu.memory_space<vmem>>, vector<1x32x1xf32>
    %6 = vector.shape_cast %5 : vector<1x32x1xf32> to vector<32x1xf32>
    %7 = vector.broadcast %6 : vector<32x1xf32> to vector<32x128xf32>
    %8 = arith.addf %4, %7 : vector<32x128xf32>
    %c1_i32 = arith.constant 1 : i32
    %9 = arith.cmpi eq, %arg0, %c1_i32 : i32
    %cst_8 = arith.constant 1.000000e+00 : f32
    %cst_9 = arith.constant 2.000000e-01 : f32
    %10 = arith.select %9, %cst_8, %cst_9 : f32
    %cst_10 = arith.constant 0.000000e+00 : f32
    %11 = vector.broadcast %cst_10 : f32 to vector<32x128xf32>
    %12 = arith.cmpf oge, %8, %11 : vector<32x128xf32>
    %13 = vector.broadcast %10 : f32 to vector<32x128xf32>
    %14 = arith.mulf %13, %8 : vector<32x128xf32>
    %15 = arith.select %12, %8, %14 : vector<32x128xi1>, vector<32x128xf32>
    %c0_11 = arith.constant 0 : index
    %c0_12 = arith.constant 0 : index
    %c0_13 = arith.constant 0 : index
    %16 = vector.load %arg4[%c0_11, %c0_12, %c0_13] : memref<1x32x128xf32, #tpu.memory_space<vmem>>, vector<1x32x128xf32>
    %17 = vector.shape_cast %16 : vector<1x32x128xf32> to vector<32x128xf32>
    %18 = vector.shape_cast %15 : vector<32x128xf32> to vector<1x32x128xf32>
    tpu.vector_store %arg4[%c0_11, %c0_12, %c0_13], %18 {strides = array<i32>} : memref<1x32x128xf32, #tpu.memory_space<vmem>>, vector<1x32x128xf32>,
    return
  }
  func.func @transform_0(%arg0: i32) -> (i32, i32, i32) {
    %c0_i32 = arith.constant 0 : i32
    %c0_i32_0 = arith.constant 0 : i32
    %c0_i32_1 = arith.constant 0 : i32
    return %arg0, %c0_i32, %c0_i32_0 : i32, i32, i32
  }
  func.func @transform_1(%arg0: i32) -> (i32, i32, i32) {
    %c0_i32 = arith.constant 0 : i32
    %c0_i32_0 = arith.constant 0 : i32
    %c0_i32_1 = arith.constant 0 : i32
    return %arg0, %c0_i32, %c0_i32_0 : i32, i32, i32
  }
  func.func @transform_2(%arg0: i32) -> (i32, i32, i32) {
    %c0_i32 = arith.constant 0 : i32
    %c0_i32_0 = arith.constant 0 : i32
    %c0_i32_1 = arith.constant 0 : i32
    return %arg0, %c0_i32, %c0_i32_0 : i32, i32, i32
  }
  func.func @transform_3(%arg0: i32) -> (i32, i32, i32) {
    %c0_i32 = arith.constant 0 : i32
    %c0_i32_0 = arith.constant 0 : i32
    %c0_i32_1 = arith.constant 0 : i32
    return %arg0, %c0_i32, %c0_i32_0 : i32, i32, i32
  }
}

module attributes {stable_mosaic.version = 11 : i64} {
  func.func @_bmm_t_kernel(%arg0: i32, %arg1: memref<1x8x32xbf16, #tpu.memory_space<vmem>>, %arg2: memref<1x32x128xbf16, #tpu.memory_space<vmem>>, %arg3: memref<1x8x1xf32, #tpu.memory_space<vmem>>, %arg4: memref<1x8x128xf32, #tpu.memory_space<vmem>>) attributes {dimension_semantics = [#tpu.dimension_semantics<parallel>], iteration_bounds = array<i64: 2>, scalar_prefetch = 0 : i64, scratch_operands = 0 : i64, tpu.core_type = #tpu.core_type<tc>, window_params = [{transform_indices = @transform_0, window_bounds = array<i64: 1, 8, 32>}, {transform_indices = @transform_1, window_bounds = array<i64: 1, 32, 128>}, {transform_indices = @transform_2, window_bounds = array<i64: 1, 8, 1>}, {transform_indices = @transform_3, window_bounds = array<i64: 1, 8, 128>}]} {
    %c0 = arith.constant 0 : index
    %c0_0 = arith.constant 0 : index
    %c0_1 = arith.constant 0 : index
    %0 = vector.load %arg1[%c0, %c0_0, %c0_1] : memref<1x8x32xbf16, #tpu.memory_space<vmem>>, vector<1x8x32xbf16>
    %1 = vector.shape_cast %0 : vector<1x8x32xbf16> to vector<8x32xbf16>
    %c0_2 = arith.constant 0 : index
    %c0_3 = arith.constant 0 : index
    %c0_4 = arith.constant 0 : index
    %2 = vector.load %arg2[%c0_2, %c0_3, %c0_4] : memref<1x32x128xbf16, #tpu.memory_space<vmem>>, vector<1x32x128xbf16>
    %3 = vector.shape_cast %2 : vector<1x32x128xbf16> to vector<32x128xbf16>
    %cst = arith.constant dense<0.000000e+00> : vector<8x128xf32>
    %4 = tpu.matmul %1, %3, %cst {dimension_numbers = #tpu.dot_dimension_numbers<[1], [0], [0], [1], [0, 0, 1, 1], [], []>} : vector<8x32xbf16>, vector<32x128xbf16>, vector<8x128xf32> -> vector<8x128xf32>
    %c0_5 = arith.constant 0 : index
    %c0_6 = arith.constant 0 : index
    %c0_7 = arith.constant 0 : index
    %5 = vector.load %arg3[%c0_5, %c0_6, %c0_7] : memref<1x8x1xf32, #tpu.memory_space<vmem>>, vector<1x8x1xf32>
    %6 = vector.shape_cast %5 : vector<1x8x1xf32> to vector<8x1xf32>
    %7 = vector.broadcast %6 : vector<8x1xf32> to vector<8x128xf32>
    %8 = arith.addf %4, %7 : vector<8x128xf32>
    %cst_8 = arith.constant 0.000000e+00 : f32
    %9 = vector.broadcast %cst_8 : f32 to vector<8x128xf32>
    %10 = arith.cmpf oge, %8, %9 : vector<8x128xf32>
    %cst_9 = arith.constant 2.000000e-01 : f32
    %11 = vector.broadcast %cst_9 : f32 to vector<8x128xf32>
    %12 = arith.mulf %11, %8 : vector<8x128xf32>
    %13 = arith.select %10, %8, %12 : vector<8x128xi1>, vector<8x128xf32>
    %c0_10 = arith.constant 0 : index
    %c0_11 = arith.constant 0 : index
    %c0_12 = arith.constant 0 : index
    %14 = vector.load %arg4[%c0_10, %c0_11, %c0_12] : memref<1x8x128xf32, #tpu.memory_space<vmem>>, vector<1x8x128xf32>
    %15 = vector.shape_cast %14 : vector<1x8x128xf32> to vector<8x128xf32>
    %16 = vector.shape_cast %13 : vector<8x128xf32> to vector<1x8x128xf32>
    tpu.vector_store %arg4[%c0_10, %c0_11, %c0_12], %16 {strides = array<i32>} : memref<1x8x128xf32, #tpu.memory_space<vmem>>, vector<1x8x128xf32>,
    return
  }
  func.func @transform_0(%arg0: i32) -> (i32, i32, i32) {
    %c0_i32 = arith.constant 0 : i32
    %c0_i32_0 = arith.constant 0 : i32
    %c0_i32_1 = arith.constant 0 : i32
    return %arg0, %c0_i32, %c0_i32_0 : i32, i32, i32
  }
  func.func @transform_1(%arg0: i32) -> (i32, i32, i32) {
    %c0_i32 = arith.constant 0 : i32
    %c0_i32_0 = arith.constant 0 : i32
    %c0_i32_1 = arith.constant 0 : i32
    return %arg0, %c0_i32, %c0_i32_0 : i32, i32, i32
  }
  func.func @transform_2(%arg0: i32) -> (i32, i32, i32) {
    %c0_i32 = arith.constant 0 : i32
    %c0_i32_0 = arith.constant 0 : i32
    %c0_i32_1 = arith.constant 0 : i32
    return %arg0, %c0_i32, %c0_i32_0 : i32, i32, i32
  }
  func.func @transform_3(%arg0: i32) -> (i32, i32, i32) {
    %c0_i32 = arith.constant 0 : i32
    %c0_i32_0 = arith.constant 0 : i32
    %c0_i32_1 = arith.constant 0 : i32
    return %arg0, %c0_i32, %c0_i32_0 : i32, i32, i32
  }
}

module attributes {stable_mosaic.version = 11 : i64} {
  func.func @_bmm_t_kernel(%arg0: i32, %arg1: memref<1x8x8xbf16, #tpu.memory_space<vmem>>, %arg2: memref<1x8x128xbf16, #tpu.memory_space<vmem>>, %arg3: memref<1x8x1xf32, #tpu.memory_space<vmem>>, %arg4: memref<1x8x128xf32, #tpu.memory_space<vmem>>) attributes {dimension_semantics = [#tpu.dimension_semantics<parallel>], iteration_bounds = array<i64: 2>, scalar_prefetch = 0 : i64, scratch_operands = 0 : i64, tpu.core_type = #tpu.core_type<tc>, window_params = [{transform_indices = @transform_0, window_bounds = array<i64: 1, 8, 8>}, {transform_indices = @transform_1, window_bounds = array<i64: 1, 8, 128>}, {transform_indices = @transform_2, window_bounds = array<i64: 1, 8, 1>}, {transform_indices = @transform_3, window_bounds = array<i64: 1, 8, 128>}]} {
    %c0 = arith.constant 0 : index
    %c0_0 = arith.constant 0 : index
    %c0_1 = arith.constant 0 : index
    %0 = vector.load %arg1[%c0, %c0_0, %c0_1] : memref<1x8x8xbf16, #tpu.memory_space<vmem>>, vector<1x8x8xbf16>
    %1 = vector.shape_cast %0 : vector<1x8x8xbf16> to vector<8x8xbf16>
    %c0_2 = arith.constant 0 : index
    %c0_3 = arith.constant 0 : index
    %c0_4 = arith.constant 0 : index
    %2 = vector.load %arg2[%c0_2, %c0_3, %c0_4] : memref<1x8x128xbf16, #tpu.memory_space<vmem>>, vector<1x8x128xbf16>
    %3 = vector.shape_cast %2 : vector<1x8x128xbf16> to vector<8x128xbf16>
    %cst = arith.constant dense<0.000000e+00> : vector<8x128xf32>
    %4 = tpu.matmul %1, %3, %cst {dimension_numbers = #tpu.dot_dimension_numbers<[1], [0], [0], [1], [0, 0, 1, 1], [], []>} : vector<8x8xbf16>, vector<8x128xbf16>, vector<8x128xf32> -> vector<8x128xf32>
    %c0_5 = arith.constant 0 : index
    %c0_6 = arith.constant 0 : index
    %c0_7 = arith.constant 0 : index
    %5 = vector.load %arg3[%c0_5, %c0_6, %c0_7] : memref<1x8x1xf32, #tpu.memory_space<vmem>>, vector<1x8x1xf32>
    %6 = vector.shape_cast %5 : vector<1x8x1xf32> to vector<8x1xf32>
    %7 = vector.broadcast %6 : vector<8x1xf32> to vector<8x128xf32>
    %8 = arith.addf %4, %7 : vector<8x128xf32>
    %cst_8 = arith.constant 0.000000e+00 : f32
    %9 = vector.broadcast %cst_8 : f32 to vector<8x128xf32>
    %10 = arith.cmpf oge, %8, %9 : vector<8x128xf32>
    %cst_9 = arith.constant 2.000000e-01 : f32
    %11 = vector.broadcast %cst_9 : f32 to vector<8x128xf32>
    %12 = arith.mulf %11, %8 : vector<8x128xf32>
    %13 = arith.select %10, %8, %12 : vector<8x128xi1>, vector<8x128xf32>
    %c0_10 = arith.constant 0 : index
    %c0_11 = arith.constant 0 : index
    %c0_12 = arith.constant 0 : index
    %14 = vector.load %arg4[%c0_10, %c0_11, %c0_12] : memref<1x8x128xf32, #tpu.memory_space<vmem>>, vector<1x8x128xf32>
    %15 = vector.shape_cast %14 : vector<1x8x128xf32> to vector<8x128xf32>
    %16 = vector.shape_cast %13 : vector<8x128xf32> to vector<1x8x128xf32>
    tpu.vector_store %arg4[%c0_10, %c0_11, %c0_12], %16 {strides = array<i32>} : memref<1x8x128xf32, #tpu.memory_space<vmem>>, vector<1x8x128xf32>,
    return
  }
  func.func @transform_0(%arg0: i32) -> (i32, i32, i32) {
    %c0_i32 = arith.constant 0 : i32
    %c0_i32_0 = arith.constant 0 : i32
    %c0_i32_1 = arith.constant 0 : i32
    return %arg0, %c0_i32, %c0_i32_0 : i32, i32, i32
  }
  func.func @transform_1(%arg0: i32) -> (i32, i32, i32) {
    %c0_i32 = arith.constant 0 : i32
    %c0_i32_0 = arith.constant 0 : i32
    %c0_i32_1 = arith.constant 0 : i32
    return %arg0, %c0_i32, %c0_i32_0 : i32, i32, i32
  }
  func.func @transform_2(%arg0: i32) -> (i32, i32, i32) {
    %c0_i32 = arith.constant 0 : i32
    %c0_i32_0 = arith.constant 0 : i32
    %c0_i32_1 = arith.constant 0 : i32
    return %arg0, %c0_i32, %c0_i32_0 : i32, i32, i32
  }
  func.func @transform_3(%arg0: i32) -> (i32, i32, i32) {
    %c0_i32 = arith.constant 0 : i32
    %c0_i32_0 = arith.constant 0 : i32
    %c0_i32_1 = arith.constant 0 : i32
    return %arg0, %c0_i32, %c0_i32_0 : i32, i32, i32
  }
}

module attributes {stable_mosaic.version = 11 : i64} {
  func.func @_bmm_t_kernel(%arg0: i32, %arg1: memref<1x32x72xbf16, #tpu.memory_space<vmem>>, %arg2: memref<1x72x128xbf16, #tpu.memory_space<vmem>>, %arg3: memref<1x32x1xf32, #tpu.memory_space<vmem>>, %arg4: memref<1x32x128xf32, #tpu.memory_space<vmem>>) attributes {dimension_semantics = [#tpu.dimension_semantics<parallel>], iteration_bounds = array<i64: 2>, scalar_prefetch = 0 : i64, scratch_operands = 0 : i64, tpu.core_type = #tpu.core_type<tc>, window_params = [{transform_indices = @transform_0, window_bounds = array<i64: 1, 32, 72>}, {transform_indices = @transform_1, window_bounds = array<i64: 1, 72, 128>}, {transform_indices = @transform_2, window_bounds = array<i64: 1, 32, 1>}, {transform_indices = @transform_3, window_bounds = array<i64: 1, 32, 128>}]} {
    %c0 = arith.constant 0 : index
    %c0_0 = arith.constant 0 : index
    %c0_1 = arith.constant 0 : index
    %0 = vector.load %arg1[%c0, %c0_0, %c0_1] : memref<1x32x72xbf16, #tpu.memory_space<vmem>>, vector<1x32x72xbf16>
    %1 = vector.shape_cast %0 : vector<1x32x72xbf16> to vector<32x72xbf16>
    %c0_2 = arith.constant 0 : index
    %c0_3 = arith.constant 0 : index
    %c0_4 = arith.constant 0 : index
    %2 = vector.load %arg2[%c0_2, %c0_3, %c0_4] : memref<1x72x128xbf16, #tpu.memory_space<vmem>>, vector<1x72x128xbf16>
    %3 = vector.shape_cast %2 : vector<1x72x128xbf16> to vector<72x128xbf16>
    %cst = arith.constant dense<0.000000e+00> : vector<32x128xf32>
    %4 = tpu.matmul %1, %3, %cst {dimension_numbers = #tpu.dot_dimension_numbers<[1], [0], [0], [1], [0, 0, 1, 1], [], []>} : vector<32x72xbf16>, vector<72x128xbf16>, vector<32x128xf32> -> vector<32x128xf32>
    %c0_5 = arith.constant 0 : index
    %c0_6 = arith.constant 0 : index
    %c0_7 = arith.constant 0 : index
    %5 = vector.load %arg3[%c0_5, %c0_6, %c0_7] : memref<1x32x1xf32, #tpu.memory_space<vmem>>, vector<1x32x1xf32>
    %6 = vector.shape_cast %5 : vector<1x32x1xf32> to vector<32x1xf32>
    %7 = vector.broadcast %6 : vector<32x1xf32> to vector<32x128xf32>
    %8 = arith.addf %4, %7 : vector<32x128xf32>
    %cst_8 = arith.constant 0.000000e+00 : f32
    %9 = vector.broadcast %cst_8 : f32 to vector<32x128xf32>
    %10 = arith.cmpf oge, %8, %9 : vector<32x128xf32>
    %cst_9 = arith.constant 2.000000e-01 : f32
    %11 = vector.broadcast %cst_9 : f32 to vector<32x128xf32>
    %12 = arith.mulf %11, %8 : vector<32x128xf32>
    %13 = arith.select %10, %8, %12 : vector<32x128xi1>, vector<32x128xf32>
    %c0_10 = arith.constant 0 : index
    %c0_11 = arith.constant 0 : index
    %c0_12 = arith.constant 0 : index
    %14 = vector.load %arg4[%c0_10, %c0_11, %c0_12] : memref<1x32x128xf32, #tpu.memory_space<vmem>>, vector<1x32x128xf32>
    %15 = vector.shape_cast %14 : vector<1x32x128xf32> to vector<32x128xf32>
    %16 = vector.shape_cast %13 : vector<32x128xf32> to vector<1x32x128xf32>
    tpu.vector_store %arg4[%c0_10, %c0_11, %c0_12], %16 {strides = array<i32>} : memref<1x32x128xf32, #tpu.memory_space<vmem>>, vector<1x32x128xf32>,
    return
  }
  func.func @transform_0(%arg0: i32) -> (i32, i32, i32) {
    %c0_i32 = arith.constant 0 : i32
    %c0_i32_0 = arith.constant 0 : i32
    %c0_i32_1 = arith.constant 0 : i32
    return %arg0, %c0_i32, %c0_i32_0 : i32, i32, i32
  }
  func.func @transform_1(%arg0: i32) -> (i32, i32, i32) {
    %c0_i32 = arith.constant 0 : i32
    %c0_i32_0 = arith.constant 0 : i32
    %c0_i32_1 = arith.constant 0 : i32
    return %arg0, %c0_i32, %c0_i32_0 : i32, i32, i32
  }
  func.func @transform_2(%arg0: i32) -> (i32, i32, i32) {
    %c0_i32 = arith.constant 0 : i32
    %c0_i32_0 = arith.constant 0 : i32
    %c0_i32_1 = arith.constant 0 : i32
    return %arg0, %c0_i32, %c0_i32_0 : i32, i32, i32
  }
  func.func @transform_3(%arg0: i32) -> (i32, i32, i32) {
    %c0_i32 = arith.constant 0 : i32
    %c0_i32_0 = arith.constant 0 : i32
    %c0_i32_1 = arith.constant 0 : i32
    return %arg0, %c0_i32, %c0_i32_0 : i32, i32, i32
  }
}

module attributes {stable_mosaic.version = 11 : i64} {
  func.func @_bmm_t_kernel(%arg0: i32, %arg1: memref<1x8x288xbf16, #tpu.memory_space<vmem>>, %arg2: memref<1x288x128xbf16, #tpu.memory_space<vmem>>, %arg3: memref<1x8x1xf32, #tpu.memory_space<vmem>>, %arg4: memref<1x8x128xf32, #tpu.memory_space<vmem>>) attributes {dimension_semantics = [#tpu.dimension_semantics<parallel>], iteration_bounds = array<i64: 2>, scalar_prefetch = 0 : i64, scratch_operands = 0 : i64, tpu.core_type = #tpu.core_type<tc>, window_params = [{transform_indices = @transform_0, window_bounds = array<i64: 1, 8, 288>}, {transform_indices = @transform_1, window_bounds = array<i64: 1, 288, 128>}, {transform_indices = @transform_2, window_bounds = array<i64: 1, 8, 1>}, {transform_indices = @transform_3, window_bounds = array<i64: 1, 8, 128>}]} {
    %c0 = arith.constant 0 : index
    %c0_0 = arith.constant 0 : index
    %c0_1 = arith.constant 0 : index
    %0 = vector.load %arg1[%c0, %c0_0, %c0_1] : memref<1x8x288xbf16, #tpu.memory_space<vmem>>, vector<1x8x288xbf16>
    %1 = vector.shape_cast %0 : vector<1x8x288xbf16> to vector<8x288xbf16>
    %c0_2 = arith.constant 0 : index
    %c0_3 = arith.constant 0 : index
    %c0_4 = arith.constant 0 : index
    %2 = vector.load %arg2[%c0_2, %c0_3, %c0_4] : memref<1x288x128xbf16, #tpu.memory_space<vmem>>, vector<1x288x128xbf16>
    %3 = vector.shape_cast %2 : vector<1x288x128xbf16> to vector<288x128xbf16>
    %cst = arith.constant dense<0.000000e+00> : vector<8x128xf32>
    %4 = tpu.matmul %1, %3, %cst {dimension_numbers = #tpu.dot_dimension_numbers<[1], [0], [0], [1], [0, 0, 1, 1], [], []>} : vector<8x288xbf16>, vector<288x128xbf16>, vector<8x128xf32> -> vector<8x128xf32>
    %c0_5 = arith.constant 0 : index
    %c0_6 = arith.constant 0 : index
    %c0_7 = arith.constant 0 : index
    %5 = vector.load %arg3[%c0_5, %c0_6, %c0_7] : memref<1x8x1xf32, #tpu.memory_space<vmem>>, vector<1x8x1xf32>
    %6 = vector.shape_cast %5 : vector<1x8x1xf32> to vector<8x1xf32>
    %7 = vector.broadcast %6 : vector<8x1xf32> to vector<8x128xf32>
    %8 = arith.addf %4, %7 : vector<8x128xf32>
    %cst_8 = arith.constant 0.000000e+00 : f32
    %9 = vector.broadcast %cst_8 : f32 to vector<8x128xf32>
    %10 = arith.cmpf oge, %8, %9 : vector<8x128xf32>
    %cst_9 = arith.constant 2.000000e-01 : f32
    %11 = vector.broadcast %cst_9 : f32 to vector<8x128xf32>
    %12 = arith.mulf %11, %8 : vector<8x128xf32>
    %13 = arith.select %10, %8, %12 : vector<8x128xi1>, vector<8x128xf32>
    %c0_10 = arith.constant 0 : index
    %c0_11 = arith.constant 0 : index
    %c0_12 = arith.constant 0 : index
    %14 = vector.load %arg4[%c0_10, %c0_11, %c0_12] : memref<1x8x128xf32, #tpu.memory_space<vmem>>, vector<1x8x128xf32>
    %15 = vector.shape_cast %14 : vector<1x8x128xf32> to vector<8x128xf32>
    %16 = vector.shape_cast %13 : vector<8x128xf32> to vector<1x8x128xf32>
    tpu.vector_store %arg4[%c0_10, %c0_11, %c0_12], %16 {strides = array<i32>} : memref<1x8x128xf32, #tpu.memory_space<vmem>>, vector<1x8x128xf32>,
    return
  }
  func.func @transform_0(%arg0: i32) -> (i32, i32, i32) {
    %c0_i32 = arith.constant 0 : i32
    %c0_i32_0 = arith.constant 0 : i32
    %c0_i32_1 = arith.constant 0 : i32
    return %arg0, %c0_i32, %c0_i32_0 : i32, i32, i32
  }
  func.func @transform_1(%arg0: i32) -> (i32, i32, i32) {
    %c0_i32 = arith.constant 0 : i32
    %c0_i32_0 = arith.constant 0 : i32
    %c0_i32_1 = arith.constant 0 : i32
    return %arg0, %c0_i32, %c0_i32_0 : i32, i32, i32
  }
  func.func @transform_2(%arg0: i32) -> (i32, i32, i32) {
    %c0_i32 = arith.constant 0 : i32
    %c0_i32_0 = arith.constant 0 : i32
    %c0_i32_1 = arith.constant 0 : i32
    return %arg0, %c0_i32, %c0_i32_0 : i32, i32, i32
  }
  func.func @transform_3(%arg0: i32) -> (i32, i32, i32) {
    %c0_i32 = arith.constant 0 : i32
    %c0_i32_0 = arith.constant 0 : i32
    %c0_i32_1 = arith.constant 0 : i32
    return %arg0, %c0_i32, %c0_i32_0 : i32, i32, i32
  }
}

module attributes {stable_mosaic.version = 11 : i64} {
  func.func @_bmm_t_kernel(%arg0: i32, %arg1: memref<1x8x16xbf16, #tpu.memory_space<vmem>>, %arg2: memref<1x16x128xbf16, #tpu.memory_space<vmem>>, %arg3: memref<1x8x1xf32, #tpu.memory_space<vmem>>, %arg4: memref<1x8x128xf32, #tpu.memory_space<vmem>>) attributes {dimension_semantics = [#tpu.dimension_semantics<parallel>], iteration_bounds = array<i64: 2>, scalar_prefetch = 0 : i64, scratch_operands = 0 : i64, tpu.core_type = #tpu.core_type<tc>, window_params = [{transform_indices = @transform_0, window_bounds = array<i64: 1, 8, 16>}, {transform_indices = @transform_1, window_bounds = array<i64: 1, 16, 128>}, {transform_indices = @transform_2, window_bounds = array<i64: 1, 8, 1>}, {transform_indices = @transform_3, window_bounds = array<i64: 1, 8, 128>}]} {
    %c0 = arith.constant 0 : index
    %c0_0 = arith.constant 0 : index
    %c0_1 = arith.constant 0 : index
    %0 = vector.load %arg1[%c0, %c0_0, %c0_1] : memref<1x8x16xbf16, #tpu.memory_space<vmem>>, vector<1x8x16xbf16>
    %1 = vector.shape_cast %0 : vector<1x8x16xbf16> to vector<8x16xbf16>
    %c0_2 = arith.constant 0 : index
    %c0_3 = arith.constant 0 : index
    %c0_4 = arith.constant 0 : index
    %2 = vector.load %arg2[%c0_2, %c0_3, %c0_4] : memref<1x16x128xbf16, #tpu.memory_space<vmem>>, vector<1x16x128xbf16>
    %3 = vector.shape_cast %2 : vector<1x16x128xbf16> to vector<16x128xbf16>
    %cst = arith.constant dense<0.000000e+00> : vector<8x128xf32>
    %4 = tpu.matmul %1, %3, %cst {dimension_numbers = #tpu.dot_dimension_numbers<[1], [0], [0], [1], [0, 0, 1, 1], [], []>} : vector<8x16xbf16>, vector<16x128xbf16>, vector<8x128xf32> -> vector<8x128xf32>
    %c0_5 = arith.constant 0 : index
    %c0_6 = arith.constant 0 : index
    %c0_7 = arith.constant 0 : index
    %5 = vector.load %arg3[%c0_5, %c0_6, %c0_7] : memref<1x8x1xf32, #tpu.memory_space<vmem>>, vector<1x8x1xf32>
    %6 = vector.shape_cast %5 : vector<1x8x1xf32> to vector<8x1xf32>
    %7 = vector.broadcast %6 : vector<8x1xf32> to vector<8x128xf32>
    %8 = arith.addf %4, %7 : vector<8x128xf32>
    %cst_8 = arith.constant 0.000000e+00 : f32
    %9 = vector.broadcast %cst_8 : f32 to vector<8x128xf32>
    %10 = arith.cmpf oge, %8, %9 : vector<8x128xf32>
    %cst_9 = arith.constant 2.000000e-01 : f32
    %11 = vector.broadcast %cst_9 : f32 to vector<8x128xf32>
    %12 = arith.mulf %11, %8 : vector<8x128xf32>
    %13 = arith.select %10, %8, %12 : vector<8x128xi1>, vector<8x128xf32>
    %c0_10 = arith.constant 0 : index
    %c0_11 = arith.constant 0 : index
    %c0_12 = arith.constant 0 : index
    %14 = vector.load %arg4[%c0_10, %c0_11, %c0_12] : memref<1x8x128xf32, #tpu.memory_space<vmem>>, vector<1x8x128xf32>
    %15 = vector.shape_cast %14 : vector<1x8x128xf32> to vector<8x128xf32>
    %16 = vector.shape_cast %13 : vector<8x128xf32> to vector<1x8x128xf32>
    tpu.vector_store %arg4[%c0_10, %c0_11, %c0_12], %16 {strides = array<i32>} : memref<1x8x128xf32, #tpu.memory_space<vmem>>, vector<1x8x128xf32>,
    return
  }
  func.func @transform_0(%arg0: i32) -> (i32, i32, i32) {
    %c0_i32 = arith.constant 0 : i32
    %c0_i32_0 = arith.constant 0 : i32
    %c0_i32_1 = arith.constant 0 : i32
    return %arg0, %c0_i32, %c0_i32_0 : i32, i32, i32
  }
  func.func @transform_1(%arg0: i32) -> (i32, i32, i32) {
    %c0_i32 = arith.constant 0 : i32
    %c0_i32_0 = arith.constant 0 : i32
    %c0_i32_1 = arith.constant 0 : i32
    return %arg0, %c0_i32, %c0_i32_0 : i32, i32, i32
  }
  func.func @transform_2(%arg0: i32) -> (i32, i32, i32) {
    %c0_i32 = arith.constant 0 : i32
    %c0_i32_0 = arith.constant 0 : i32
    %c0_i32_1 = arith.constant 0 : i32
    return %arg0, %c0_i32, %c0_i32_0 : i32, i32, i32
  }
  func.func @transform_3(%arg0: i32) -> (i32, i32, i32) {
    %c0_i32 = arith.constant 0 : i32
    %c0_i32_0 = arith.constant 0 : i32
    %c0_i32_1 = arith.constant 0 : i32
    return %arg0, %c0_i32, %c0_i32_0 : i32, i32, i32
  }
}

module attributes {stable_mosaic.version = 11 : i64} {
  func.func @_bmm_t_kernel(%arg0: i32, %arg1: memref<1x8x16xbf16, #tpu.memory_space<vmem>>, %arg2: memref<1x16x512xbf16, #tpu.memory_space<vmem>>, %arg3: memref<1x8x1xf32, #tpu.memory_space<vmem>>, %arg4: memref<1x8x512xf32, #tpu.memory_space<vmem>>) attributes {dimension_semantics = [#tpu.dimension_semantics<parallel>], iteration_bounds = array<i64: 2>, scalar_prefetch = 0 : i64, scratch_operands = 0 : i64, tpu.core_type = #tpu.core_type<tc>, window_params = [{transform_indices = @transform_0, window_bounds = array<i64: 1, 8, 16>}, {transform_indices = @transform_1, window_bounds = array<i64: 1, 16, 512>}, {transform_indices = @transform_2, window_bounds = array<i64: 1, 8, 1>}, {transform_indices = @transform_3, window_bounds = array<i64: 1, 8, 512>}]} {
    %c0 = arith.constant 0 : index
    %c0_0 = arith.constant 0 : index
    %c0_1 = arith.constant 0 : index
    %0 = vector.load %arg1[%c0, %c0_0, %c0_1] : memref<1x8x16xbf16, #tpu.memory_space<vmem>>, vector<1x8x16xbf16>
    %1 = vector.shape_cast %0 : vector<1x8x16xbf16> to vector<8x16xbf16>
    %c0_2 = arith.constant 0 : index
    %c0_3 = arith.constant 0 : index
    %c0_4 = arith.constant 0 : index
    %2 = vector.load %arg2[%c0_2, %c0_3, %c0_4] : memref<1x16x512xbf16, #tpu.memory_space<vmem>>, vector<1x16x512xbf16>
    %3 = vector.shape_cast %2 : vector<1x16x512xbf16> to vector<16x512xbf16>
    %cst = arith.constant dense<0.000000e+00> : vector<8x512xf32>
    %4 = tpu.matmul %1, %3, %cst {dimension_numbers = #tpu.dot_dimension_numbers<[1], [0], [0], [1], [0, 0, 1, 1], [], []>} : vector<8x16xbf16>, vector<16x512xbf16>, vector<8x512xf32> -> vector<8x512xf32>
    %c0_5 = arith.constant 0 : index
    %c0_6 = arith.constant 0 : index
    %c0_7 = arith.constant 0 : index
    %5 = vector.load %arg3[%c0_5, %c0_6, %c0_7] : memref<1x8x1xf32, #tpu.memory_space<vmem>>, vector<1x8x1xf32>
    %6 = vector.shape_cast %5 : vector<1x8x1xf32> to vector<8x1xf32>
    %7 = vector.broadcast %6 : vector<8x1xf32> to vector<8x512xf32>
    %8 = arith.addf %4, %7 : vector<8x512xf32>
    %cst_8 = arith.constant 0.000000e+00 : f32
    %9 = vector.broadcast %cst_8 : f32 to vector<8x512xf32>
    %10 = arith.cmpf oge, %8, %9 : vector<8x512xf32>
    %cst_9 = arith.constant 2.000000e-01 : f32
    %11 = vector.broadcast %cst_9 : f32 to vector<8x512xf32>
    %12 = arith.mulf %11, %8 : vector<8x512xf32>
    %13 = arith.select %10, %8, %12 : vector<8x512xi1>, vector<8x512xf32>
    %c0_10 = arith.constant 0 : index
    %c0_11 = arith.constant 0 : index
    %c0_12 = arith.constant 0 : index
    %14 = vector.load %arg4[%c0_10, %c0_11, %c0_12] : memref<1x8x512xf32, #tpu.memory_space<vmem>>, vector<1x8x512xf32>
    %15 = vector.shape_cast %14 : vector<1x8x512xf32> to vector<8x512xf32>
    %16 = vector.shape_cast %13 : vector<8x512xf32> to vector<1x8x512xf32>
    tpu.vector_store %arg4[%c0_10, %c0_11, %c0_12], %16 {strides = array<i32>} : memref<1x8x512xf32, #tpu.memory_space<vmem>>, vector<1x8x512xf32>,
    return
  }
  func.func @transform_0(%arg0: i32) -> (i32, i32, i32) {
    %c0_i32 = arith.constant 0 : i32
    %c0_i32_0 = arith.constant 0 : i32
    %c0_i32_1 = arith.constant 0 : i32
    return %arg0, %c0_i32, %c0_i32_0 : i32, i32, i32
  }
  func.func @transform_1(%arg0: i32) -> (i32, i32, i32) {
    %c0_i32 = arith.constant 0 : i32
    %c0_i32_0 = arith.constant 0 : i32
    %c0_i32_1 = arith.constant 0 : i32
    return %arg0, %c0_i32, %c0_i32_0 : i32, i32, i32
  }
  func.func @transform_2(%arg0: i32) -> (i32, i32, i32) {
    %c0_i32 = arith.constant 0 : i32
    %c0_i32_0 = arith.constant 0 : i32
    %c0_i32_1 = arith.constant 0 : i32
    return %arg0, %c0_i32, %c0_i32_0 : i32, i32, i32
  }
  func.func @transform_3(%arg0: i32) -> (i32, i32, i32) {
    %c0_i32 = arith.constant 0 : i32
    %c0_i32_0 = arith.constant 0 : i32
    %c0_i32_1 = arith.constant 0 : i32
    return %arg0, %c0_i32, %c0_i32_0 : i32, i32, i32
  }
}

module attributes {stable_mosaic.version = 11 : i64} {
  func.func @_bmm_t_kernel(%arg0: i32, %arg1: memref<1x8x24xbf16, #tpu.memory_space<vmem>>, %arg2: memref<1x24x128xbf16, #tpu.memory_space<vmem>>, %arg3: memref<1x8x1xf32, #tpu.memory_space<vmem>>, %arg4: memref<1x8x128xf32, #tpu.memory_space<vmem>>) attributes {dimension_semantics = [#tpu.dimension_semantics<parallel>], iteration_bounds = array<i64: 2>, scalar_prefetch = 0 : i64, scratch_operands = 0 : i64, tpu.core_type = #tpu.core_type<tc>, window_params = [{transform_indices = @transform_0, window_bounds = array<i64: 1, 8, 24>}, {transform_indices = @transform_1, window_bounds = array<i64: 1, 24, 128>}, {transform_indices = @transform_2, window_bounds = array<i64: 1, 8, 1>}, {transform_indices = @transform_3, window_bounds = array<i64: 1, 8, 128>}]} {
    %c0 = arith.constant 0 : index
    %c0_0 = arith.constant 0 : index
    %c0_1 = arith.constant 0 : index
    %0 = vector.load %arg1[%c0, %c0_0, %c0_1] : memref<1x8x24xbf16, #tpu.memory_space<vmem>>, vector<1x8x24xbf16>
    %1 = vector.shape_cast %0 : vector<1x8x24xbf16> to vector<8x24xbf16>
    %c0_2 = arith.constant 0 : index
    %c0_3 = arith.constant 0 : index
    %c0_4 = arith.constant 0 : index
    %2 = vector.load %arg2[%c0_2, %c0_3, %c0_4] : memref<1x24x128xbf16, #tpu.memory_space<vmem>>, vector<1x24x128xbf16>
    %3 = vector.shape_cast %2 : vector<1x24x128xbf16> to vector<24x128xbf16>
    %cst = arith.constant dense<0.000000e+00> : vector<8x128xf32>
    %4 = tpu.matmul %1, %3, %cst {dimension_numbers = #tpu.dot_dimension_numbers<[1], [0], [0], [1], [0, 0, 1, 1], [], []>} : vector<8x24xbf16>, vector<24x128xbf16>, vector<8x128xf32> -> vector<8x128xf32>
    %c0_5 = arith.constant 0 : index
    %c0_6 = arith.constant 0 : index
    %c0_7 = arith.constant 0 : index
    %5 = vector.load %arg3[%c0_5, %c0_6, %c0_7] : memref<1x8x1xf32, #tpu.memory_space<vmem>>, vector<1x8x1xf32>
    %6 = vector.shape_cast %5 : vector<1x8x1xf32> to vector<8x1xf32>
    %7 = vector.broadcast %6 : vector<8x1xf32> to vector<8x128xf32>
    %8 = arith.addf %4, %7 : vector<8x128xf32>
    %cst_8 = arith.constant 0.000000e+00 : f32
    %9 = vector.broadcast %cst_8 : f32 to vector<8x128xf32>
    %10 = arith.cmpf oge, %8, %9 : vector<8x128xf32>
    %cst_9 = arith.constant 2.000000e-01 : f32
    %11 = vector.broadcast %cst_9 : f32 to vector<8x128xf32>
    %12 = arith.mulf %11, %8 : vector<8x128xf32>
    %13 = arith.select %10, %8, %12 : vector<8x128xi1>, vector<8x128xf32>
    %c0_10 = arith.constant 0 : index
    %c0_11 = arith.constant 0 : index
    %c0_12 = arith.constant 0 : index
    %14 = vector.load %arg4[%c0_10, %c0_11, %c0_12] : memref<1x8x128xf32, #tpu.memory_space<vmem>>, vector<1x8x128xf32>
    %15 = vector.shape_cast %14 : vector<1x8x128xf32> to vector<8x128xf32>
    %16 = vector.shape_cast %13 : vector<8x128xf32> to vector<1x8x128xf32>
    tpu.vector_store %arg4[%c0_10, %c0_11, %c0_12], %16 {strides = array<i32>} : memref<1x8x128xf32, #tpu.memory_space<vmem>>, vector<1x8x128xf32>,
    return
  }
  func.func @transform_0(%arg0: i32) -> (i32, i32, i32) {
    %c0_i32 = arith.constant 0 : i32
    %c0_i32_0 = arith.constant 0 : i32
    %c0_i32_1 = arith.constant 0 : i32
    return %arg0, %c0_i32, %c0_i32_0 : i32, i32, i32
  }
  func.func @transform_1(%arg0: i32) -> (i32, i32, i32) {
    %c0_i32 = arith.constant 0 : i32
    %c0_i32_0 = arith.constant 0 : i32
    %c0_i32_1 = arith.constant 0 : i32
    return %arg0, %c0_i32, %c0_i32_0 : i32, i32, i32
  }
  func.func @transform_2(%arg0: i32) -> (i32, i32, i32) {
    %c0_i32 = arith.constant 0 : i32
    %c0_i32_0 = arith.constant 0 : i32
    %c0_i32_1 = arith.constant 0 : i32
    return %arg0, %c0_i32, %c0_i32_0 : i32, i32, i32
  }
  func.func @transform_3(%arg0: i32) -> (i32, i32, i32) {
    %c0_i32 = arith.constant 0 : i32
    %c0_i32_0 = arith.constant 0 : i32
    %c0_i32_1 = arith.constant 0 : i32
    return %arg0, %c0_i32, %c0_i32_0 : i32, i32, i32
  }
}

module attributes {stable_mosaic.version = 11 : i64} {
  func.func @_bmm_t_kernel(%arg0: i32, %arg1: memref<1x8x24xbf16, #tpu.memory_space<vmem>>, %arg2: memref<1x24x512xbf16, #tpu.memory_space<vmem>>, %arg3: memref<1x8x1xf32, #tpu.memory_space<vmem>>, %arg4: memref<1x8x512xf32, #tpu.memory_space<vmem>>) attributes {dimension_semantics = [#tpu.dimension_semantics<parallel>], iteration_bounds = array<i64: 2>, scalar_prefetch = 0 : i64, scratch_operands = 0 : i64, tpu.core_type = #tpu.core_type<tc>, window_params = [{transform_indices = @transform_0, window_bounds = array<i64: 1, 8, 24>}, {transform_indices = @transform_1, window_bounds = array<i64: 1, 24, 512>}, {transform_indices = @transform_2, window_bounds = array<i64: 1, 8, 1>}, {transform_indices = @transform_3, window_bounds = array<i64: 1, 8, 512>}]} {
    %c0 = arith.constant 0 : index
    %c0_0 = arith.constant 0 : index
    %c0_1 = arith.constant 0 : index
    %0 = vector.load %arg1[%c0, %c0_0, %c0_1] : memref<1x8x24xbf16, #tpu.memory_space<vmem>>, vector<1x8x24xbf16>
    %1 = vector.shape_cast %0 : vector<1x8x24xbf16> to vector<8x24xbf16>
    %c0_2 = arith.constant 0 : index
    %c0_3 = arith.constant 0 : index
    %c0_4 = arith.constant 0 : index
    %2 = vector.load %arg2[%c0_2, %c0_3, %c0_4] : memref<1x24x512xbf16, #tpu.memory_space<vmem>>, vector<1x24x512xbf16>
    %3 = vector.shape_cast %2 : vector<1x24x512xbf16> to vector<24x512xbf16>
    %cst = arith.constant dense<0.000000e+00> : vector<8x512xf32>
    %4 = tpu.matmul %1, %3, %cst {dimension_numbers = #tpu.dot_dimension_numbers<[1], [0], [0], [1], [0, 0, 1, 1], [], []>} : vector<8x24xbf16>, vector<24x512xbf16>, vector<8x512xf32> -> vector<8x512xf32>
    %c0_5 = arith.constant 0 : index
    %c0_6 = arith.constant 0 : index
    %c0_7 = arith.constant 0 : index
    %5 = vector.load %arg3[%c0_5, %c0_6, %c0_7] : memref<1x8x1xf32, #tpu.memory_space<vmem>>, vector<1x8x1xf32>
    %6 = vector.shape_cast %5 : vector<1x8x1xf32> to vector<8x1xf32>
    %7 = vector.broadcast %6 : vector<8x1xf32> to vector<8x512xf32>
    %8 = arith.addf %4, %7 : vector<8x512xf32>
    %cst_8 = arith.constant 0.000000e+00 : f32
    %9 = vector.broadcast %cst_8 : f32 to vector<8x512xf32>
    %10 = arith.cmpf oge, %8, %9 : vector<8x512xf32>
    %cst_9 = arith.constant 2.000000e-01 : f32
    %11 = vector.broadcast %cst_9 : f32 to vector<8x512xf32>
    %12 = arith.mulf %11, %8 : vector<8x512xf32>
    %13 = arith.select %10, %8, %12 : vector<8x512xi1>, vector<8x512xf32>
    %c0_10 = arith.constant 0 : index
    %c0_11 = arith.constant 0 : index
    %c0_12 = arith.constant 0 : index
    %14 = vector.load %arg4[%c0_10, %c0_11, %c0_12] : memref<1x8x512xf32, #tpu.memory_space<vmem>>, vector<1x8x512xf32>
    %15 = vector.shape_cast %14 : vector<1x8x512xf32> to vector<8x512xf32>
    %16 = vector.shape_cast %13 : vector<8x512xf32> to vector<1x8x512xf32>
    tpu.vector_store %arg4[%c0_10, %c0_11, %c0_12], %16 {strides = array<i32>} : memref<1x8x512xf32, #tpu.memory_space<vmem>>, vector<1x8x512xf32>,
    return
  }
  func.func @transform_0(%arg0: i32) -> (i32, i32, i32) {
    %c0_i32 = arith.constant 0 : i32
    %c0_i32_0 = arith.constant 0 : i32
    %c0_i32_1 = arith.constant 0 : i32
    return %arg0, %c0_i32, %c0_i32_0 : i32, i32, i32
  }
  func.func @transform_1(%arg0: i32) -> (i32, i32, i32) {
    %c0_i32 = arith.constant 0 : i32
    %c0_i32_0 = arith.constant 0 : i32
    %c0_i32_1 = arith.constant 0 : i32
    return %arg0, %c0_i32, %c0_i32_0 : i32, i32, i32
  }
  func.func @transform_2(%arg0: i32) -> (i32, i32, i32) {
    %c0_i32 = arith.constant 0 : i32
    %c0_i32_0 = arith.constant 0 : i32
    %c0_i32_1 = arith.constant 0 : i32
    return %arg0, %c0_i32, %c0_i32_0 : i32, i32, i32
  }
  func.func @transform_3(%arg0: i32) -> (i32, i32, i32) {
    %c0_i32 = arith.constant 0 : i32
    %c0_i32_0 = arith.constant 0 : i32
    %c0_i32_1 = arith.constant 0 : i32
    return %arg0, %c0_i32, %c0_i32_0 : i32, i32, i32
  }
}

module attributes {stable_mosaic.version = 11 : i64} {
  func.func @_bmm_t_kernel(%arg0: i32, %arg1: memref<1x8x27xbf16, #tpu.memory_space<vmem>>, %arg2: memref<1x27x128xbf16, #tpu.memory_space<vmem>>, %arg3: memref<1x8x1xf32, #tpu.memory_space<vmem>>, %arg4: memref<1x8x128xf32, #tpu.memory_space<vmem>>) attributes {dimension_semantics = [#tpu.dimension_semantics<parallel>], iteration_bounds = array<i64: 1>, scalar_prefetch = 0 : i64, scratch_operands = 0 : i64, tpu.core_type = #tpu.core_type<tc>, window_params = [{transform_indices = @transform_0, window_bounds = array<i64: 1, 8, 27>}, {transform_indices = @transform_1, window_bounds = array<i64: 1, 27, 128>}, {transform_indices = @transform_2, window_bounds = array<i64: 1, 8, 1>}, {transform_indices = @transform_3, window_bounds = array<i64: 1, 8, 128>}]} {
    %c0 = arith.constant 0 : index
    %c0_0 = arith.constant 0 : index
    %c0_1 = arith.constant 0 : index
    %0 = vector.load %arg1[%c0, %c0_0, %c0_1] : memref<1x8x27xbf16, #tpu.memory_space<vmem>>, vector<1x8x27xbf16>
    %1 = vector.shape_cast %0 : vector<1x8x27xbf16> to vector<8x27xbf16>
    %c0_2 = arith.constant 0 : index
    %c0_3 = arith.constant 0 : index
    %c0_4 = arith.constant 0 : index
    %2 = vector.load %arg2[%c0_2, %c0_3, %c0_4] : memref<1x27x128xbf16, #tpu.memory_space<vmem>>, vector<1x27x128xbf16>
    %3 = vector.shape_cast %2 : vector<1x27x128xbf16> to vector<27x128xbf16>
    %cst = arith.constant dense<0.000000e+00> : vector<8x128xf32>
    %4 = tpu.matmul %1, %3, %cst {dimension_numbers = #tpu.dot_dimension_numbers<[1], [0], [0], [1], [0, 0, 1, 1], [], []>} : vector<8x27xbf16>, vector<27x128xbf16>, vector<8x128xf32> -> vector<8x128xf32>
    %c0_5 = arith.constant 0 : index
    %c0_6 = arith.constant 0 : index
    %c0_7 = arith.constant 0 : index
    %5 = vector.load %arg3[%c0_5, %c0_6, %c0_7] : memref<1x8x1xf32, #tpu.memory_space<vmem>>, vector<1x8x1xf32>
    %6 = vector.shape_cast %5 : vector<1x8x1xf32> to vector<8x1xf32>
    %7 = vector.broadcast %6 : vector<8x1xf32> to vector<8x128xf32>
    %8 = arith.addf %4, %7 : vector<8x128xf32>
    %cst_8 = arith.constant 0.000000e+00 : f32
    %9 = vector.broadcast %cst_8 : f32 to vector<8x128xf32>
    %10 = arith.cmpf oge, %8, %9 : vector<8x128xf32>
    %cst_9 = arith.constant 2.000000e-01 : f32
    %11 = vector.broadcast %cst_9 : f32 to vector<8x128xf32>
    %12 = arith.mulf %11, %8 : vector<8x128xf32>
    %13 = arith.select %10, %8, %12 : vector<8x128xi1>, vector<8x128xf32>
    %c0_10 = arith.constant 0 : index
    %c0_11 = arith.constant 0 : index
    %c0_12 = arith.constant 0 : index
    %14 = vector.load %arg4[%c0_10, %c0_11, %c0_12] : memref<1x8x128xf32, #tpu.memory_space<vmem>>, vector<1x8x128xf32>
    %15 = vector.shape_cast %14 : vector<1x8x128xf32> to vector<8x128xf32>
    %16 = vector.shape_cast %13 : vector<8x128xf32> to vector<1x8x128xf32>
    tpu.vector_store %arg4[%c0_10, %c0_11, %c0_12], %16 {strides = array<i32>} : memref<1x8x128xf32, #tpu.memory_space<vmem>>, vector<1x8x128xf32>,
    return
  }
  func.func @transform_0(%arg0: i32) -> (i32, i32, i32) {
    %c0_i32 = arith.constant 0 : i32
    %c0_i32_0 = arith.constant 0 : i32
    %c0_i32_1 = arith.constant 0 : i32
    return %arg0, %c0_i32, %c0_i32_0 : i32, i32, i32
  }
  func.func @transform_1(%arg0: i32) -> (i32, i32, i32) {
    %c0_i32 = arith.constant 0 : i32
    %c0_i32_0 = arith.constant 0 : i32
    %c0_i32_1 = arith.constant 0 : i32
    return %arg0, %c0_i32, %c0_i32_0 : i32, i32, i32
  }
  func.func @transform_2(%arg0: i32) -> (i32, i32, i32) {
    %c0_i32 = arith.constant 0 : i32
    %c0_i32_0 = arith.constant 0 : i32
    %c0_i32_1 = arith.constant 0 : i32
    return %arg0, %c0_i32, %c0_i32_0 : i32, i32, i32
  }
  func.func @transform_3(%arg0: i32) -> (i32, i32, i32) {
    %c0_i32 = arith.constant 0 : i32
    %c0_i32_0 = arith.constant 0 : i32
    %c0_i32_1 = arith.constant 0 : i32
    return %arg0, %c0_i32, %c0_i32_0 : i32, i32, i32
  }
}

module attributes {stable_mosaic.version = 11 : i64} {
  func.func @_bmm_t_kernel(%arg0: i32, %arg1: memref<1x8x72xbf16, #tpu.memory_space<vmem>>, %arg2: memref<1x72x128xbf16, #tpu.memory_space<vmem>>, %arg3: memref<1x8x1xf32, #tpu.memory_space<vmem>>, %arg4: memref<1x8x128xf32, #tpu.memory_space<vmem>>) attributes {dimension_semantics = [#tpu.dimension_semantics<parallel>], iteration_bounds = array<i64: 1>, scalar_prefetch = 0 : i64, scratch_operands = 0 : i64, tpu.core_type = #tpu.core_type<tc>, window_params = [{transform_indices = @transform_0, window_bounds = array<i64: 1, 8, 72>}, {transform_indices = @transform_1, window_bounds = array<i64: 1, 72, 128>}, {transform_indices = @transform_2, window_bounds = array<i64: 1, 8, 1>}, {transform_indices = @transform_3, window_bounds = array<i64: 1, 8, 128>}]} {
    %c0 = arith.constant 0 : index
    %c0_0 = arith.constant 0 : index
    %c0_1 = arith.constant 0 : index
    %0 = vector.load %arg1[%c0, %c0_0, %c0_1] : memref<1x8x72xbf16, #tpu.memory_space<vmem>>, vector<1x8x72xbf16>
    %1 = vector.shape_cast %0 : vector<1x8x72xbf16> to vector<8x72xbf16>
    %c0_2 = arith.constant 0 : index
    %c0_3 = arith.constant 0 : index
    %c0_4 = arith.constant 0 : index
    %2 = vector.load %arg2[%c0_2, %c0_3, %c0_4] : memref<1x72x128xbf16, #tpu.memory_space<vmem>>, vector<1x72x128xbf16>
    %3 = vector.shape_cast %2 : vector<1x72x128xbf16> to vector<72x128xbf16>
    %cst = arith.constant dense<0.000000e+00> : vector<8x128xf32>
    %4 = tpu.matmul %1, %3, %cst {dimension_numbers = #tpu.dot_dimension_numbers<[1], [0], [0], [1], [0, 0, 1, 1], [], []>} : vector<8x72xbf16>, vector<72x128xbf16>, vector<8x128xf32> -> vector<8x128xf32>
    %c0_5 = arith.constant 0 : index
    %c0_6 = arith.constant 0 : index
    %c0_7 = arith.constant 0 : index
    %5 = vector.load %arg3[%c0_5, %c0_6, %c0_7] : memref<1x8x1xf32, #tpu.memory_space<vmem>>, vector<1x8x1xf32>
    %6 = vector.shape_cast %5 : vector<1x8x1xf32> to vector<8x1xf32>
    %7 = vector.broadcast %6 : vector<8x1xf32> to vector<8x128xf32>
    %8 = arith.addf %4, %7 : vector<8x128xf32>
    %cst_8 = arith.constant 0.000000e+00 : f32
    %9 = vector.broadcast %cst_8 : f32 to vector<8x128xf32>
    %10 = arith.cmpf oge, %8, %9 : vector<8x128xf32>
    %cst_9 = arith.constant 2.000000e-01 : f32
    %11 = vector.broadcast %cst_9 : f32 to vector<8x128xf32>
    %12 = arith.mulf %11, %8 : vector<8x128xf32>
    %13 = arith.select %10, %8, %12 : vector<8x128xi1>, vector<8x128xf32>
    %c0_10 = arith.constant 0 : index
    %c0_11 = arith.constant 0 : index
    %c0_12 = arith.constant 0 : index
    %14 = vector.load %arg4[%c0_10, %c0_11, %c0_12] : memref<1x8x128xf32, #tpu.memory_space<vmem>>, vector<1x8x128xf32>
    %15 = vector.shape_cast %14 : vector<1x8x128xf32> to vector<8x128xf32>
    %16 = vector.shape_cast %13 : vector<8x128xf32> to vector<1x8x128xf32>
    tpu.vector_store %arg4[%c0_10, %c0_11, %c0_12], %16 {strides = array<i32>} : memref<1x8x128xf32, #tpu.memory_space<vmem>>, vector<1x8x128xf32>,
    return
  }
  func.func @transform_0(%arg0: i32) -> (i32, i32, i32) {
    %c0_i32 = arith.constant 0 : i32
    %c0_i32_0 = arith.constant 0 : i32
    %c0_i32_1 = arith.constant 0 : i32
    return %arg0, %c0_i32, %c0_i32_0 : i32, i32, i32
  }
  func.func @transform_1(%arg0: i32) -> (i32, i32, i32) {
    %c0_i32 = arith.constant 0 : i32
    %c0_i32_0 = arith.constant 0 : i32
    %c0_i32_1 = arith.constant 0 : i32
    return %arg0, %c0_i32, %c0_i32_0 : i32, i32, i32
  }
  func.func @transform_2(%arg0: i32) -> (i32, i32, i32) {
    %c0_i32 = arith.constant 0 : i32
    %c0_i32_0 = arith.constant 0 : i32
    %c0_i32_1 = arith.constant 0 : i32
    return %arg0, %c0_i32, %c0_i32_0 : i32, i32, i32
  }
  func.func @transform_3(%arg0: i32) -> (i32, i32, i32) {
    %c0_i32 = arith.constant 0 : i32
    %c0_i32_0 = arith.constant 0 : i32
    %c0_i32_1 = arith.constant 0 : i32
    return %arg0, %c0_i32, %c0_i32_0 : i32, i32, i32
  }
}

module attributes {stable_mosaic.version = 11 : i64} {
  func.func @_bmm_t_kernel(%arg0: i32, %arg1: memref<1x8x216xbf16, #tpu.memory_space<vmem>>, %arg2: memref<1x216x128xbf16, #tpu.memory_space<vmem>>, %arg3: memref<1x8x1xf32, #tpu.memory_space<vmem>>, %arg4: memref<1x8x128xf32, #tpu.memory_space<vmem>>) attributes {dimension_semantics = [#tpu.dimension_semantics<parallel>], iteration_bounds = array<i64: 2>, scalar_prefetch = 0 : i64, scratch_operands = 0 : i64, tpu.core_type = #tpu.core_type<tc>, window_params = [{transform_indices = @transform_0, window_bounds = array<i64: 1, 8, 216>}, {transform_indices = @transform_1, window_bounds = array<i64: 1, 216, 128>}, {transform_indices = @transform_2, window_bounds = array<i64: 1, 8, 1>}, {transform_indices = @transform_3, window_bounds = array<i64: 1, 8, 128>}]} {
    %c0 = arith.constant 0 : index
    %c0_0 = arith.constant 0 : index
    %c0_1 = arith.constant 0 : index
    %0 = vector.load %arg1[%c0, %c0_0, %c0_1] : memref<1x8x216xbf16, #tpu.memory_space<vmem>>, vector<1x8x216xbf16>
    %1 = vector.shape_cast %0 : vector<1x8x216xbf16> to vector<8x216xbf16>
    %c0_2 = arith.constant 0 : index
    %c0_3 = arith.constant 0 : index
    %c0_4 = arith.constant 0 : index
    %2 = vector.load %arg2[%c0_2, %c0_3, %c0_4] : memref<1x216x128xbf16, #tpu.memory_space<vmem>>, vector<1x216x128xbf16>
    %3 = vector.shape_cast %2 : vector<1x216x128xbf16> to vector<216x128xbf16>
    %cst = arith.constant dense<0.000000e+00> : vector<8x128xf32>
    %4 = tpu.matmul %1, %3, %cst {dimension_numbers = #tpu.dot_dimension_numbers<[1], [0], [0], [1], [0, 0, 1, 1], [], []>} : vector<8x216xbf16>, vector<216x128xbf16>, vector<8x128xf32> -> vector<8x128xf32>
    %c0_5 = arith.constant 0 : index
    %c0_6 = arith.constant 0 : index
    %c0_7 = arith.constant 0 : index
    %5 = vector.load %arg3[%c0_5, %c0_6, %c0_7] : memref<1x8x1xf32, #tpu.memory_space<vmem>>, vector<1x8x1xf32>
    %6 = vector.shape_cast %5 : vector<1x8x1xf32> to vector<8x1xf32>
    %7 = vector.broadcast %6 : vector<8x1xf32> to vector<8x128xf32>
    %8 = arith.addf %4, %7 : vector<8x128xf32>
    %c1_i32 = arith.constant 1 : i32
    %9 = arith.cmpi eq, %arg0, %c1_i32 : i32
    %cst_8 = arith.constant 2.000000e-01 : f32
    %cst_9 = arith.constant 1.000000e-01 : f32
    %10 = arith.select %9, %cst_8, %cst_9 : f32
    %cst_10 = arith.constant 0.000000e+00 : f32
    %11 = vector.broadcast %cst_10 : f32 to vector<8x128xf32>
    %12 = arith.cmpf oge, %8, %11 : vector<8x128xf32>
    %13 = vector.broadcast %10 : f32 to vector<8x128xf32>
    %14 = arith.mulf %13, %8 : vector<8x128xf32>
    %15 = arith.select %12, %8, %14 : vector<8x128xi1>, vector<8x128xf32>
    %c0_11 = arith.constant 0 : index
    %c0_12 = arith.constant 0 : index
    %c0_13 = arith.constant 0 : index
    %16 = vector.load %arg4[%c0_11, %c0_12, %c0_13] : memref<1x8x128xf32, #tpu.memory_space<vmem>>, vector<1x8x128xf32>
    %17 = vector.shape_cast %16 : vector<1x8x128xf32> to vector<8x128xf32>
    %18 = vector.shape_cast %15 : vector<8x128xf32> to vector<1x8x128xf32>
    tpu.vector_store %arg4[%c0_11, %c0_12, %c0_13], %18 {strides = array<i32>} : memref<1x8x128xf32, #tpu.memory_space<vmem>>, vector<1x8x128xf32>,
    return
  }
  func.func @transform_0(%arg0: i32) -> (i32, i32, i32) {
    %c0_i32 = arith.constant 0 : i32
    %c0_i32_0 = arith.constant 0 : i32
    %c0_i32_1 = arith.constant 0 : i32
    return %arg0, %c0_i32, %c0_i32_0 : i32, i32, i32
  }
  func.func @transform_1(%arg0: i32) -> (i32, i32, i32) {
    %c0_i32 = arith.constant 0 : i32
    %c0_i32_0 = arith.constant 0 : i32
    %c0_i32_1 = arith.constant 0 : i32
    return %arg0, %c0_i32, %c0_i32_0 : i32, i32, i32
  }
  func.func @transform_2(%arg0: i32) -> (i32, i32, i32) {
    %c0_i32 = arith.constant 0 : i32
    %c0_i32_0 = arith.constant 0 : i32
    %c0_i32_1 = arith.constant 0 : i32
    return %arg0, %c0_i32, %c0_i32_0 : i32, i32, i32
  }
  func.func @transform_3(%arg0: i32) -> (i32, i32, i32) {
    %c0_i32 = arith.constant 0 : i32
    %c0_i32_0 = arith.constant 0 : i32
    %c0_i32_1 = arith.constant 0 : i32
    return %arg0, %c0_i32, %c0_i32_0 : i32, i32, i32
  }
}

module attributes {stable_mosaic.version = 11 : i64} {
  func.func @_bmm_t_kernel(%arg0: i32, %arg1: memref<1x8x72xbf16, #tpu.memory_space<vmem>>, %arg2: memref<1x72x128xbf16, #tpu.memory_space<vmem>>, %arg3: memref<1x8x1xf32, #tpu.memory_space<vmem>>, %arg4: memref<1x8x128xf32, #tpu.memory_space<vmem>>) attributes {dimension_semantics = [#tpu.dimension_semantics<parallel>], iteration_bounds = array<i64: 2>, scalar_prefetch = 0 : i64, scratch_operands = 0 : i64, tpu.core_type = #tpu.core_type<tc>, window_params = [{transform_indices = @transform_0, window_bounds = array<i64: 1, 8, 72>}, {transform_indices = @transform_1, window_bounds = array<i64: 1, 72, 128>}, {transform_indices = @transform_2, window_bounds = array<i64: 1, 8, 1>}, {transform_indices = @transform_3, window_bounds = array<i64: 1, 8, 128>}]} {
    %c0 = arith.constant 0 : index
    %c0_0 = arith.constant 0 : index
    %c0_1 = arith.constant 0 : index
    %0 = vector.load %arg1[%c0, %c0_0, %c0_1] : memref<1x8x72xbf16, #tpu.memory_space<vmem>>, vector<1x8x72xbf16>
    %1 = vector.shape_cast %0 : vector<1x8x72xbf16> to vector<8x72xbf16>
    %c0_2 = arith.constant 0 : index
    %c0_3 = arith.constant 0 : index
    %c0_4 = arith.constant 0 : index
    %2 = vector.load %arg2[%c0_2, %c0_3, %c0_4] : memref<1x72x128xbf16, #tpu.memory_space<vmem>>, vector<1x72x128xbf16>
    %3 = vector.shape_cast %2 : vector<1x72x128xbf16> to vector<72x128xbf16>
    %cst = arith.constant dense<0.000000e+00> : vector<8x128xf32>
    %4 = tpu.matmul %1, %3, %cst {dimension_numbers = #tpu.dot_dimension_numbers<[1], [0], [0], [1], [0, 0, 1, 1], [], []>} : vector<8x72xbf16>, vector<72x128xbf16>, vector<8x128xf32> -> vector<8x128xf32>
    %c0_5 = arith.constant 0 : index
    %c0_6 = arith.constant 0 : index
    %c0_7 = arith.constant 0 : index
    %5 = vector.load %arg3[%c0_5, %c0_6, %c0_7] : memref<1x8x1xf32, #tpu.memory_space<vmem>>, vector<1x8x1xf32>
    %6 = vector.shape_cast %5 : vector<1x8x1xf32> to vector<8x1xf32>
    %7 = vector.broadcast %6 : vector<8x1xf32> to vector<8x128xf32>
    %8 = arith.addf %4, %7 : vector<8x128xf32>
    %c1_i32 = arith.constant 1 : i32
    %9 = arith.cmpi eq, %arg0, %c1_i32 : i32
    %cst_8 = arith.constant 2.000000e-01 : f32
    %cst_9 = arith.constant 1.000000e-01 : f32
    %10 = arith.select %9, %cst_8, %cst_9 : f32
    %cst_10 = arith.constant 0.000000e+00 : f32
    %11 = vector.broadcast %cst_10 : f32 to vector<8x128xf32>
    %12 = arith.cmpf oge, %8, %11 : vector<8x128xf32>
    %13 = vector.broadcast %10 : f32 to vector<8x128xf32>
    %14 = arith.mulf %13, %8 : vector<8x128xf32>
    %15 = arith.select %12, %8, %14 : vector<8x128xi1>, vector<8x128xf32>
    %c0_11 = arith.constant 0 : index
    %c0_12 = arith.constant 0 : index
    %c0_13 = arith.constant 0 : index
    %16 = vector.load %arg4[%c0_11, %c0_12, %c0_13] : memref<1x8x128xf32, #tpu.memory_space<vmem>>, vector<1x8x128xf32>
    %17 = vector.shape_cast %16 : vector<1x8x128xf32> to vector<8x128xf32>
    %18 = vector.shape_cast %15 : vector<8x128xf32> to vector<1x8x128xf32>
    tpu.vector_store %arg4[%c0_11, %c0_12, %c0_13], %18 {strides = array<i32>} : memref<1x8x128xf32, #tpu.memory_space<vmem>>, vector<1x8x128xf32>,
    return
  }
  func.func @transform_0(%arg0: i32) -> (i32, i32, i32) {
    %c0_i32 = arith.constant 0 : i32
    %c0_i32_0 = arith.constant 0 : i32
    %c0_i32_1 = arith.constant 0 : i32
    return %arg0, %c0_i32, %c0_i32_0 : i32, i32, i32
  }
  func.func @transform_1(%arg0: i32) -> (i32, i32, i32) {
    %c0_i32 = arith.constant 0 : i32
    %c0_i32_0 = arith.constant 0 : i32
    %c0_i32_1 = arith.constant 0 : i32
    return %arg0, %c0_i32, %c0_i32_0 : i32, i32, i32
  }
  func.func @transform_2(%arg0: i32) -> (i32, i32, i32) {
    %c0_i32 = arith.constant 0 : i32
    %c0_i32_0 = arith.constant 0 : i32
    %c0_i32_1 = arith.constant 0 : i32
    return %arg0, %c0_i32, %c0_i32_0 : i32, i32, i32
  }
  func.func @transform_3(%arg0: i32) -> (i32, i32, i32) {
    %c0_i32 = arith.constant 0 : i32
    %c0_i32_0 = arith.constant 0 : i32
    %c0_i32_1 = arith.constant 0 : i32
    return %arg0, %c0_i32, %c0_i32_0 : i32, i32, i32
  }
}

module attributes {stable_mosaic.version = 11 : i64} {
  func.func @_bmm_t_kernel(%arg0: i32, %arg1: memref<1x196x8xbf16, #tpu.memory_space<vmem>>, %arg2: memref<1x8x128xbf16, #tpu.memory_space<vmem>>, %arg3: memref<1x196x1xf32, #tpu.memory_space<vmem>>, %arg4: memref<1x196x128xf32, #tpu.memory_space<vmem>>) attributes {dimension_semantics = [#tpu.dimension_semantics<parallel>], iteration_bounds = array<i64: 1>, scalar_prefetch = 0 : i64, scratch_operands = 0 : i64, tpu.core_type = #tpu.core_type<tc>, window_params = [{transform_indices = @transform_0, window_bounds = array<i64: 1, 196, 8>}, {transform_indices = @transform_1, window_bounds = array<i64: 1, 8, 128>}, {transform_indices = @transform_2, window_bounds = array<i64: 1, 196, 1>}, {transform_indices = @transform_3, window_bounds = array<i64: 1, 196, 128>}]} {
    %c0 = arith.constant 0 : index
    %c0_0 = arith.constant 0 : index
    %c0_1 = arith.constant 0 : index
    %0 = vector.load %arg1[%c0, %c0_0, %c0_1] : memref<1x196x8xbf16, #tpu.memory_space<vmem>>, vector<1x196x8xbf16>
    %1 = vector.shape_cast %0 : vector<1x196x8xbf16> to vector<196x8xbf16>
    %c0_2 = arith.constant 0 : index
    %c0_3 = arith.constant 0 : index
    %c0_4 = arith.constant 0 : index
    %2 = vector.load %arg2[%c0_2, %c0_3, %c0_4] : memref<1x8x128xbf16, #tpu.memory_space<vmem>>, vector<1x8x128xbf16>
    %3 = vector.shape_cast %2 : vector<1x8x128xbf16> to vector<8x128xbf16>
    %cst = arith.constant dense<0.000000e+00> : vector<196x128xf32>
    %4 = tpu.matmul %1, %3, %cst {dimension_numbers = #tpu.dot_dimension_numbers<[1], [0], [0], [1], [0, 0, 1, 1], [], []>} : vector<196x8xbf16>, vector<8x128xbf16>, vector<196x128xf32> -> vector<196x128xf32>
    %c0_5 = arith.constant 0 : index
    %c0_6 = arith.constant 0 : index
    %c0_7 = arith.constant 0 : index
    %5 = vector.load %arg3[%c0_5, %c0_6, %c0_7] : memref<1x196x1xf32, #tpu.memory_space<vmem>>, vector<1x196x1xf32>
    %6 = vector.shape_cast %5 : vector<1x196x1xf32> to vector<196x1xf32>
    %7 = vector.broadcast %6 : vector<196x1xf32> to vector<196x128xf32>
    %8 = arith.addf %4, %7 : vector<196x128xf32>
    %c0_8 = arith.constant 0 : index
    %c0_9 = arith.constant 0 : index
    %c0_10 = arith.constant 0 : index
    %9 = vector.load %arg4[%c0_8, %c0_9, %c0_10] : memref<1x196x128xf32, #tpu.memory_space<vmem>>, vector<1x196x128xf32>
    %10 = vector.shape_cast %9 : vector<1x196x128xf32> to vector<196x128xf32>
    %11 = vector.shape_cast %8 : vector<196x128xf32> to vector<1x196x128xf32>
    tpu.vector_store %arg4[%c0_8, %c0_9, %c0_10], %11 {strides = array<i32>} : memref<1x196x128xf32, #tpu.memory_space<vmem>>, vector<1x196x128xf32>,
    return
  }
  func.func @transform_0(%arg0: i32) -> (i32, i32, i32) {
    %c0_i32 = arith.constant 0 : i32
    %c0_i32_0 = arith.constant 0 : i32
    %c0_i32_1 = arith.constant 0 : i32
    return %arg0, %c0_i32, %c0_i32_0 : i32, i32, i32
  }
  func.func @transform_1(%arg0: i32) -> (i32, i32, i32) {
    %c0_i32 = arith.constant 0 : i32
    %c0_i32_0 = arith.constant 0 : i32
    %c0_i32_1 = arith.constant 0 : i32
    return %arg0, %c0_i32, %c0_i32_0 : i32, i32, i32
  }
  func.func @transform_2(%arg0: i32) -> (i32, i32, i32) {
    %c0_i32 = arith.constant 0 : i32
    %c0_i32_0 = arith.constant 0 : i32
    %c0_i32_1 = arith.constant 0 : i32
    return %arg0, %c0_i32, %c0_i32_0 : i32, i32, i32
  }
  func.func @transform_3(%arg0: i32) -> (i32, i32, i32) {
    %c0_i32 = arith.constant 0 : i32
    %c0_i32_0 = arith.constant 0 : i32
    %c0_i32_1 = arith.constant 0 : i32
    return %arg0, %c0_i32, %c0_i32_0 : i32, i32, i32
  }
}

module attributes {stable_mosaic.version = 11 : i64} {
  func.func @_fac_kernel(%arg0: i32, %arg1: memref<196x128xbf16, #tpu.memory_space<vmem>>, %arg2: memref<196x128xbf16, #tpu.memory_space<vmem>>, %arg3: memref<1x128xf32, #tpu.memory_space<vmem>>) attributes {dimension_semantics = [#tpu.dimension_semantics<parallel>], iteration_bounds = array<i64: 3>, scalar_prefetch = 0 : i64, scratch_operands = 0 : i64, tpu.core_type = #tpu.core_type<tc>, window_params = [{transform_indices = @transform_0, window_bounds = array<i64: 196, 128>}, {transform_indices = @transform_1, window_bounds = array<i64: 196, 128>}, {transform_indices = @transform_2, window_bounds = array<i64: 1, 128>}]} {
    %c0 = arith.constant 0 : index
    %c0_0 = arith.constant 0 : index
    %0 = vector.load %arg1[%c0, %c0_0] : memref<196x128xbf16, #tpu.memory_space<vmem>>, vector<196x128xbf16>
    %1 = arith.extf %0 : vector<196x128xbf16> to vector<196x128xf32>
    %c0_1 = arith.constant 0 : index
    %c0_2 = arith.constant 0 : index
    %2 = vector.load %arg2[%c0_1, %c0_2] : memref<196x128xbf16, #tpu.memory_space<vmem>>, vector<196x128xbf16>
    %3 = arith.extf %2 : vector<196x128xbf16> to vector<196x128xf32>
    %4 = arith.mulf %1, %3 : vector<196x128xf32>
    %cst = arith.constant dense<0.000000e+00> : vector<128xf32>
    %5 = vector.multi_reduction <add>, %4, %cst [0] : vector<196x128xf32> to vector<128xf32>
    %6 = vector.shape_cast %5 : vector<128xf32> to vector<1x128xf32>
    %c0_3 = arith.constant 0 : index
    %c0_4 = arith.constant 0 : index
    %7 = vector.load %arg3[%c0_3, %c0_4] : memref<1x128xf32, #tpu.memory_space<vmem>>, vector<1x128xf32>
    tpu.vector_store %arg3[%c0_3, %c0_4], %6 {strides = array<i32>} : memref<1x128xf32, #tpu.memory_space<vmem>>, vector<1x128xf32>,
    return
  }
  func.func @transform_0(%arg0: i32) -> (i32, i32) {
    %c0_i32 = arith.constant 0 : i32
    %c0_i32_0 = arith.constant 0 : i32
    return %c0_i32, %arg0 : i32, i32
  }
  func.func @transform_1(%arg0: i32) -> (i32, i32) {
    %c0_i32 = arith.constant 0 : i32
    %c0_i32_0 = arith.constant 0 : i32
    return %c0_i32, %arg0 : i32, i32
  }
  func.func @transform_2(%arg0: i32) -> (i32, i32) {
    %c0_i32 = arith.constant 0 : i32
    %c0_i32_0 = arith.constant 0 : i32
    return %c0_i32, %arg0 : i32, i32
  }
}

module attributes {stable_mosaic.version = 11 : i64} {
  func.func @_bmm_t_kernel(%arg0: i32, %arg1: memref<1x3x8xbf16, #tpu.memory_space<vmem>>, %arg2: memref<1x8x128xbf16, #tpu.memory_space<vmem>>, %arg3: memref<1x3x1xf32, #tpu.memory_space<vmem>>, %arg4: memref<1x3x128xf32, #tpu.memory_space<vmem>>) attributes {dimension_semantics = [#tpu.dimension_semantics<parallel>], iteration_bounds = array<i64: 1>, scalar_prefetch = 0 : i64, scratch_operands = 0 : i64, tpu.core_type = #tpu.core_type<tc>, window_params = [{transform_indices = @transform_0, window_bounds = array<i64: 1, 3, 8>}, {transform_indices = @transform_1, window_bounds = array<i64: 1, 8, 128>}, {transform_indices = @transform_2, window_bounds = array<i64: 1, 3, 1>}, {transform_indices = @transform_3, window_bounds = array<i64: 1, 3, 128>}]} {
    %c0 = arith.constant 0 : index
    %c0_0 = arith.constant 0 : index
    %c0_1 = arith.constant 0 : index
    %0 = vector.load %arg1[%c0, %c0_0, %c0_1] : memref<1x3x8xbf16, #tpu.memory_space<vmem>>, vector<1x3x8xbf16>
    %1 = vector.shape_cast %0 : vector<1x3x8xbf16> to vector<3x8xbf16>
    %c0_2 = arith.constant 0 : index
    %c0_3 = arith.constant 0 : index
    %c0_4 = arith.constant 0 : index
    %2 = vector.load %arg2[%c0_2, %c0_3, %c0_4] : memref<1x8x128xbf16, #tpu.memory_space<vmem>>, vector<1x8x128xbf16>
    %3 = vector.shape_cast %2 : vector<1x8x128xbf16> to vector<8x128xbf16>
    %cst = arith.constant dense<0.000000e+00> : vector<3x128xf32>
    %4 = tpu.matmul %1, %3, %cst {dimension_numbers = #tpu.dot_dimension_numbers<[1], [0], [0], [1], [0, 0, 1, 1], [], []>} : vector<3x8xbf16>, vector<8x128xbf16>, vector<3x128xf32> -> vector<3x128xf32>
    %c0_5 = arith.constant 0 : index
    %c0_6 = arith.constant 0 : index
    %c0_7 = arith.constant 0 : index
    %5 = vector.load %arg3[%c0_5, %c0_6, %c0_7] : memref<1x3x1xf32, #tpu.memory_space<vmem>>, vector<1x3x1xf32>
    %6 = vector.shape_cast %5 : vector<1x3x1xf32> to vector<3x1xf32>
    %7 = vector.broadcast %6 : vector<3x1xf32> to vector<3x128xf32>
    %8 = arith.addf %4, %7 : vector<3x128xf32>
    %cst_8 = arith.constant 0.000000e+00 : f32
    %9 = vector.broadcast %cst_8 : f32 to vector<3x128xf32>
    %10 = arith.cmpf oge, %8, %9 : vector<3x128xf32>
    %cst_9 = arith.constant 1.000000e-01 : f32
    %11 = vector.broadcast %cst_9 : f32 to vector<3x128xf32>
    %12 = arith.mulf %11, %8 : vector<3x128xf32>
    %13 = arith.select %10, %8, %12 : vector<3x128xi1>, vector<3x128xf32>
    %c0_10 = arith.constant 0 : index
    %c0_11 = arith.constant 0 : index
    %c0_12 = arith.constant 0 : index
    %14 = vector.load %arg4[%c0_10, %c0_11, %c0_12] : memref<1x3x128xf32, #tpu.memory_space<vmem>>, vector<1x3x128xf32>
    %15 = vector.shape_cast %14 : vector<1x3x128xf32> to vector<3x128xf32>
    %16 = vector.shape_cast %13 : vector<3x128xf32> to vector<1x3x128xf32>
    tpu.vector_store %arg4[%c0_10, %c0_11, %c0_12], %16 {strides = array<i32>} : memref<1x3x128xf32, #tpu.memory_space<vmem>>, vector<1x3x128xf32>,
    return
  }
  func.func @transform_0(%arg0: i32) -> (i32, i32, i32) {
    %c0_i32 = arith.constant 0 : i32
    %c0_i32_0 = arith.constant 0 : i32
    %c0_i32_1 = arith.constant 0 : i32
    return %arg0, %c0_i32, %c0_i32_0 : i32, i32, i32
  }
  func.func @transform_1(%arg0: i32) -> (i32, i32, i32) {
    %c0_i32 = arith.constant 0 : i32
    %c0_i32_0 = arith.constant 0 : i32
    %c0_i32_1 = arith.constant 0 : i32
    return %arg0, %c0_i32, %c0_i32_0 : i32, i32, i32
  }
  func.func @transform_2(%arg0: i32) -> (i32, i32, i32) {
    %c0_i32 = arith.constant 0 : i32
    %c0_i32_0 = arith.constant 0 : i32
    %c0_i32_1 = arith.constant 0 : i32
    return %arg0, %c0_i32, %c0_i32_0 : i32, i32, i32
  }
  func.func @transform_3(%arg0: i32) -> (i32, i32, i32) {
    %c0_i32 = arith.constant 0 : i32
    %c0_i32_0 = arith.constant 0 : i32
    %c0_i32_1 = arith.constant 0 : i32
    return %arg0, %c0_i32, %c0_i32_0 : i32, i32, i32
  }
}

module attributes {stable_mosaic.version = 11 : i64} {
  func.func @_bmm_t_kernel(%arg0: i32, %arg1: memref<1x32x72xbf16, #tpu.memory_space<vmem>>, %arg2: memref<1x72x128xbf16, #tpu.memory_space<vmem>>, %arg3: memref<1x32x1xf32, #tpu.memory_space<vmem>>, %arg4: memref<1x32x128xf32, #tpu.memory_space<vmem>>) attributes {dimension_semantics = [#tpu.dimension_semantics<parallel>], iteration_bounds = array<i64: 6>, scalar_prefetch = 0 : i64, scratch_operands = 0 : i64, tpu.core_type = #tpu.core_type<tc>, window_params = [{transform_indices = @transform_0, window_bounds = array<i64: 1, 32, 72>}, {transform_indices = @transform_1, window_bounds = array<i64: 1, 72, 128>}, {transform_indices = @transform_2, window_bounds = array<i64: 1, 32, 1>}, {transform_indices = @transform_3, window_bounds = array<i64: 1, 32, 128>}]} {
    %c0 = arith.constant 0 : index
    %c0_0 = arith.constant 0 : index
    %c0_1 = arith.constant 0 : index
    %0 = vector.load %arg1[%c0, %c0_0, %c0_1] : memref<1x32x72xbf16, #tpu.memory_space<vmem>>, vector<1x32x72xbf16>
    %1 = vector.shape_cast %0 : vector<1x32x72xbf16> to vector<32x72xbf16>
    %c0_2 = arith.constant 0 : index
    %c0_3 = arith.constant 0 : index
    %c0_4 = arith.constant 0 : index
    %2 = vector.load %arg2[%c0_2, %c0_3, %c0_4] : memref<1x72x128xbf16, #tpu.memory_space<vmem>>, vector<1x72x128xbf16>
    %3 = vector.shape_cast %2 : vector<1x72x128xbf16> to vector<72x128xbf16>
    %cst = arith.constant dense<0.000000e+00> : vector<32x128xf32>
    %4 = tpu.matmul %1, %3, %cst {dimension_numbers = #tpu.dot_dimension_numbers<[1], [0], [0], [1], [0, 0, 1, 1], [], []>} : vector<32x72xbf16>, vector<72x128xbf16>, vector<32x128xf32> -> vector<32x128xf32>
    %c0_5 = arith.constant 0 : index
    %c0_6 = arith.constant 0 : index
    %c0_7 = arith.constant 0 : index
    %5 = vector.load %arg3[%c0_5, %c0_6, %c0_7] : memref<1x32x1xf32, #tpu.memory_space<vmem>>, vector<1x32x1xf32>
    %6 = vector.shape_cast %5 : vector<1x32x1xf32> to vector<32x1xf32>
    %7 = vector.broadcast %6 : vector<32x1xf32> to vector<32x128xf32>
    %8 = arith.addf %4, %7 : vector<32x128xf32>
    %cst_8 = arith.constant 0.000000e+00 : f32
    %9 = vector.broadcast %cst_8 : f32 to vector<32x128xf32>
    %10 = arith.cmpf oge, %8, %9 : vector<32x128xf32>
    %cst_9 = arith.constant 2.000000e-01 : f32
    %11 = vector.broadcast %cst_9 : f32 to vector<32x128xf32>
    %12 = arith.mulf %11, %8 : vector<32x128xf32>
    %13 = arith.select %10, %8, %12 : vector<32x128xi1>, vector<32x128xf32>
    %c0_10 = arith.constant 0 : index
    %c0_11 = arith.constant 0 : index
    %c0_12 = arith.constant 0 : index
    %14 = vector.load %arg4[%c0_10, %c0_11, %c0_12] : memref<1x32x128xf32, #tpu.memory_space<vmem>>, vector<1x32x128xf32>
    %15 = vector.shape_cast %14 : vector<1x32x128xf32> to vector<32x128xf32>
    %16 = vector.shape_cast %13 : vector<32x128xf32> to vector<1x32x128xf32>
    tpu.vector_store %arg4[%c0_10, %c0_11, %c0_12], %16 {strides = array<i32>} : memref<1x32x128xf32, #tpu.memory_space<vmem>>, vector<1x32x128xf32>,
    return
  }
  func.func @transform_0(%arg0: i32) -> (i32, i32, i32) {
    %c0_i32 = arith.constant 0 : i32
    %c0_i32_0 = arith.constant 0 : i32
    %c0_i32_1 = arith.constant 0 : i32
    return %arg0, %c0_i32, %c0_i32_0 : i32, i32, i32
  }
  func.func @transform_1(%arg0: i32) -> (i32, i32, i32) {
    %c0_i32 = arith.constant 0 : i32
    %c0_i32_0 = arith.constant 0 : i32
    %c0_i32_1 = arith.constant 0 : i32
    return %arg0, %c0_i32, %c0_i32_0 : i32, i32, i32
  }
  func.func @transform_2(%arg0: i32) -> (i32, i32, i32) {
    %c0_i32 = arith.constant 0 : i32
    %c0_i32_0 = arith.constant 0 : i32
    %c0_i32_1 = arith.constant 0 : i32
    return %arg0, %c0_i32, %c0_i32_0 : i32, i32, i32
  }
  func.func @transform_3(%arg0: i32) -> (i32, i32, i32) {
    %c0_i32 = arith.constant 0 : i32
    %c0_i32_0 = arith.constant 0 : i32
    %c0_i32_1 = arith.constant 0 : i32
    return %arg0, %c0_i32, %c0_i32_0 : i32, i32, i32
  }
}

module attributes {stable_mosaic.version = 11 : i64} {
  func.func @_bmm_t_sr_kernel(%arg0: i32, %arg1: memref<1x3x72xbf16, #tpu.memory_space<vmem>>, %arg2: memref<1x72x512xbf16, #tpu.memory_space<vmem>>, %arg3: memref<1x3x1xf32, #tpu.memory_space<vmem>>, %arg4: memref<1x3x512xf32, #tpu.memory_space<vmem>>, %arg5: memref<1x3x512xf32, #tpu.memory_space<vmem>>) attributes {dimension_semantics = [#tpu.dimension_semantics<parallel>], iteration_bounds = array<i64: 6>, scalar_prefetch = 0 : i64, scratch_operands = 0 : i64, tpu.core_type = #tpu.core_type<tc>, window_params = [{transform_indices = @transform_0, window_bounds = array<i64: 1, 3, 72>}, {transform_indices = @transform_1, window_bounds = array<i64: 1, 72, 512>}, {transform_indices = @transform_2, window_bounds = array<i64: 1, 3, 1>}, {transform_indices = @transform_3, window_bounds = array<i64: 1, 3, 512>}, {transform_indices = @transform_4, window_bounds = array<i64: 1, 3, 512>}]} {
    %c0 = arith.constant 0 : index
    %c0_0 = arith.constant 0 : index
    %c0_1 = arith.constant 0 : index
    %0 = vector.load %arg1[%c0, %c0_0, %c0_1] : memref<1x3x72xbf16, #tpu.memory_space<vmem>>, vector<1x3x72xbf16>
    %1 = vector.shape_cast %0 : vector<1x3x72xbf16> to vector<3x72xbf16>
    %c0_2 = arith.constant 0 : index
    %c0_3 = arith.constant 0 : index
    %c0_4 = arith.constant 0 : index
    %2 = vector.load %arg2[%c0_2, %c0_3, %c0_4] : memref<1x72x512xbf16, #tpu.memory_space<vmem>>, vector<1x72x512xbf16>
    %3 = vector.shape_cast %2 : vector<1x72x512xbf16> to vector<72x512xbf16>
    %cst = arith.constant dense<0.000000e+00> : vector<3x512xf32>
    %4 = tpu.matmul %1, %3, %cst {dimension_numbers = #tpu.dot_dimension_numbers<[1], [0], [0], [1], [0, 0, 1, 1], [], []>} : vector<3x72xbf16>, vector<72x512xbf16>, vector<3x512xf32> -> vector<3x512xf32>
    %c0_5 = arith.constant 0 : index
    %c0_6 = arith.constant 0 : index
    %c0_7 = arith.constant 0 : index
    %5 = vector.load %arg3[%c0_5, %c0_6, %c0_7] : memref<1x3x1xf32, #tpu.memory_space<vmem>>, vector<1x3x1xf32>
    %6 = vector.shape_cast %5 : vector<1x3x1xf32> to vector<3x1xf32>
    %7 = vector.broadcast %6 : vector<3x1xf32> to vector<3x512xf32>
    %8 = arith.addf %4, %7 : vector<3x512xf32>
    %c0_8 = arith.constant 0 : index
    %c0_9 = arith.constant 0 : index
    %c0_10 = arith.constant 0 : index
    %9 = vector.load %arg4[%c0_8, %c0_9, %c0_10] : memref<1x3x512xf32, #tpu.memory_space<vmem>>, vector<1x3x512xf32>
    %10 = vector.shape_cast %9 : vector<1x3x512xf32> to vector<3x512xf32>
    %11 = arith.addf %8, %10 : vector<3x512xf32>
    %cst_11 = arith.constant -1.000000e+00 : f32
    %cst_12 = arith.constant 1.000000e+00 : f32
    %12 = vector.broadcast %cst_11 : f32 to vector<3x512xf32>
    %13 = arith.maximumf %12, %11 : vector<3x512xf32>
    %14 = vector.broadcast %cst_12 : f32 to vector<3x512xf32>
    %15 = arith.minimumf %14, %13 : vector<3x512xf32>
    %cst_13 = arith.constant 1.000000e+00 : f32
    %16 = vector.broadcast %cst_13 : f32 to vector<3x512xf32>
    %17 = arith.addf %15, %16 : vector<3x512xf32>
    %cst_14 = arith.constant 1.275000e+02 : f32
    %18 = vector.broadcast %cst_14 : f32 to vector<3x512xf32>
    %19 = arith.mulf %17, %18 : vector<3x512xf32>
    %c0_15 = arith.constant 0 : index
    %c0_16 = arith.constant 0 : index
    %c0_17 = arith.constant 0 : index
    %20 = vector.load %arg5[%c0_15, %c0_16, %c0_17] : memref<1x3x512xf32, #tpu.memory_space<vmem>>, vector<1x3x512xf32>
    %21 = vector.shape_cast %20 : vector<1x3x512xf32> to vector<3x512xf32>
    %22 = vector.shape_cast %19 : vector<3x512xf32> to vector<1x3x512xf32>
    tpu.vector_store %arg5[%c0_15, %c0_16, %c0_17], %22 {strides = array<i32>} : memref<1x3x512xf32, #tpu.memory_space<vmem>>, vector<1x3x512xf32>,
    return
  }
  func.func @transform_0(%arg0: i32) -> (i32, i32, i32) {
    %c0_i32 = arith.constant 0 : i32
    %c0_i32_0 = arith.constant 0 : i32
    %c0_i32_1 = arith.constant 0 : i32
    return %arg0, %c0_i32, %c0_i32_0 : i32, i32, i32
  }
  func.func @transform_1(%arg0: i32) -> (i32, i32, i32) {
    %c0_i32 = arith.constant 0 : i32
    %c0_i32_0 = arith.constant 0 : i32
    %c0_i32_1 = arith.constant 0 : i32
    return %arg0, %c0_i32, %c0_i32_0 : i32, i32, i32
  }
  func.func @transform_2(%arg0: i32) -> (i32, i32, i32) {
    %c0_i32 = arith.constant 0 : i32
    %c0_i32_0 = arith.constant 0 : i32
    %c0_i32_1 = arith.constant 0 : i32
    return %arg0, %c0_i32, %c0_i32_0 : i32, i32, i32
  }
  func.func @transform_3(%arg0: i32) -> (i32, i32, i32) {
    %c0_i32 = arith.constant 0 : i32
    %c0_i32_0 = arith.constant 0 : i32
    %c0_i32_1 = arith.constant 0 : i32
    return %arg0, %c0_i32, %c0_i32_0 : i32, i32, i32
  }
  func.func @transform_4(%arg0: i32) -> (i32, i32, i32) {
    %c0_i32 = arith.constant 0 : i32
    %c0_i32_0 = arith.constant 0 : i32
    %c0_i32_1 = arith.constant 0 : i32
    return %arg0, %c0_i32, %c0_i32_0 : i32, i32, i32
  }
}

</mosaic_0001>

<bundles_post_ra>
// kernel: cfnet_forward.66
= control target key start
LH: loop header
LB: loop body
LE: loop exit
PB: predicated region body
PF: predicated region fallthrough
CT: control target
= control target key end

     0   :  { %s509_s12 = smov 0   ;;  %s547_s0 = inlined_call_operand.vmem [shape: bf16[2,32,27], index: 0, kind: input, shape index: {}]   ;;  %s548_s1 = inlined_call_operand.vmem [shape: bf16[2,27,128], index: 1, kind: input, shape index: {}]   ;;  %s549_s2 = inlined_call_operand.vmem [shape: f32[2,32,1], index: 2, kind: input, shape index: {}]   ;;  %s550_s3 = inlined_call_operand.vmem [shape: f32[2,32,128], index: 3, kind: output, shape index: {}]  }
   0x1 LB: > { %s515_s13 = sadd.s32 4294967295, %s485_s12   ;;  %p430_p0 = scmp.ge.s32.totalorder %s485_s12, 1  ;;  %s485_s12 = sphi %s509_s12, %s13_s12  }
   0x2   : > { %p157_p1 = scmp.lt.s32.totalorder %s485_s12, 3 }
   0x4   : > { %p158_p2 = pnand %p430_p0, %p157_p1 }
   0x5   : > { %p191_p3 = scmp.lt.s32.totalorder (!%p158_p2), %s515_s13, 1  ;;  %p328_p4 = scmp.eq.s32.totalorder (!%p158_p2), %s515_s13, 1 }
   0x6   : > { %161 = sbr.rel (%p158_p2) target bundleno = 231 (0xe7), region = 32 }
   0xb   : > { %vm272_vm0 = vcmask 1044480   ;;  %s521_s14 = scalar_select %p191_p3, %s515_s13, 1  ;;  %vm273_vm1 = vcmask 1045504   ;;  %v487_v0 = vmov 65535   ;;  %v488_v2 = vmov 0  }
   0xc   : > { %v274_v1 = vsel %vm272_vm0, 4294967295, %v487_v0  ;;  %474 = vset.pattern.permute.xlu1 %v488_v2  ;;  %473 = vset.pattern.permute.xlu0 %v488_v2  ;;  %vm265_vm2 = vcmask 220160   ;;  %s329_s26 = scalar_select %p328_p4, 1.0, 0.2 }
   0xd   : > { %s447_s15 = sshll.u32 %s521_s14, 4  ;;  %s449_s16 = sshll.u32 %s521_s14, 5  ;;  %v275_v3 = vsel %vm273_vm1, %v274_v1, 0 }
   0xe   : > { %s200_s19 = scalar_lea.vmem %s548_s1, %s447_s15  ;;  %s195_s22 = scalar_lea.vmem %s547_s0, %s447_s15  ;;  %v334_v16 = vstv %s329_s26 }
   0xf   : > { %v475_v4 = vld [vmem:[%s200_s19 + $0x8] sm:$0x3f]   ;;  %v476_v5 = vld [vmem:[%s200_s19] sm:$0xff]   ;;  %s205_s25 = scalar_lea.vmem %s549_s2, %s449_s16  ;;  %s210_s29 = scalar_lea.vmem %s550_s3, %s449_s16 }
  0x10   : > { %v277_v6 = vand.u32 %v475_v4, %v275_v3  ;;  %v477_v7 = vld [vmem:[%s195_s22] sm:$0xff]   ;;  %v222_v8 = vld [vmem:[%s205_s25 + $0x10] sm:$0xff]  ;;  %v223_v10 = vld [vmem:[%s205_s25 + $0x18] sm:$0xff] }
  0x11   : > { %459 = vmatprep.mubr.msk.bf16.mxu0 %vm265_vm2, %v477_v7  ;;  %v220_v9 = vld [vmem:[%s205_s25] sm:$0xff]  ;;  %236 = vperm.xlu1 %474, %v222_v8   ;;  %v221_v11 = vld [vmem:[%s205_s25 + $0x8] sm:$0xff] }
  0x12   : > { %455 = vmatprep.subr.bf16.mxu0 %v277_v6  ;;  %226 = vperm.xlu0 %473, %v220_v9   ;;  %v478_v12 = vld [vmem:[%s195_s22 + $0x8] sm:$0xff]  }
  0x13   : > { %456 = vmatpush3.bf16.msra.mxu0 %v277_v6 }
  0x14   : > { %457 = vmatprep.subr.bf16.mxu0 %v476_v5 }
  0x15   : > { %241 = vperm.xlu1 %474, %v223_v10  }
  0x16   : > { %231 = vperm.xlu0 %473, %v221_v11  }
  0x17   : > { %458 = vmatpush3.bf16.msra.mxu0 %v476_v5 }
  0x1a   : > { %460 = vmatmul.mubr.msk.bf16.vlgmr.msra.gmra.mxu0 %vm265_vm2, %v478_v12 }
  0x8c   : > { %v237_v13 = vpop.permute.xlu1 %236 }
  0x8d   : > { %v227_v14 = vpop.permute.xlu0 %226 }
  0x90   : > { %v242_v21 = vpop.permute.xlu1 %241 }
  0x91   : > { %v232_v26 = vpop.permute.xlu0 %231 }
  0xda   : > { %v461_v15 = vpop.f32.mrf.mxu0 }
  0xdb   : > { %v322_v17 = vadd.f32 %v461_v15, %v237_v13 }
  0xdc   : > { %v313_v18 = vpop.f32.mrf.mxu0 }
  0xdd   : > { %vm332_vm3 = vcmp.ge.f32.partialorder %v322_v17, 0.0  ;;  %v337_v19 = vmul.f32 %v334_v16, %v322_v17  ;;  %v314_v20 = vadd.f32 %v313_v18, %v227_v14 }
  0xde   : > { %v462_v22 = vpop.f32.mrf.mxu0 }
  0xdf   : > { %v341_v23 = vsel %vm332_vm3, %v322_v17, %v337_v19  ;;  %vm330_vm4 = vcmp.ge.f32.partialorder %v314_v20, 0.0  ;;  %v335_v24 = vmul.f32 %v334_v16, %v314_v20  ;;  %v325_v25 = vadd.f32 %v462_v22, %v242_v21 }
  0xe0   : > { %345 = vst [vmem:[%s210_s29 + $0x10] sm:$0xff] %v341_v23  ;;  %v316_v27 = vpop.f32.mrf.mxu0 }
  0xe1   : > { %v339_v28 = vsel %vm330_vm4, %v314_v20, %v335_v24  ;;  %vm333_vm5 = vcmp.ge.f32.partialorder %v325_v25, 0.0  ;;  %v338_v29 = vmul.f32 %v334_v16, %v325_v25  ;;  %v317_v30 = vadd.f32 %v316_v27, %v232_v26 }
  0xe2   : > { %343 = vst [vmem:[%s210_s29] sm:$0xff] %v339_v28 }
  0xe3   : > { %v342_v31 = vsel %vm333_vm5, %v325_v25, %v338_v29  ;;  %vm331_vm6 = vcmp.ge.f32.partialorder %v317_v30, 0.0  ;;  %v336_v32 = vmul.f32 %v334_v16, %v317_v30 }
  0xe4   : > { %346 = vst [vmem:[%s210_s29 + $0x18] sm:$0xff] %v342_v31 }
  0xe5   : > { %v340_v33 = vsel %vm331_vm6, %v317_v30, %v336_v32 }
  0xe6   : > { %344 = vst [vmem:[%s210_s29 + $0x8] sm:$0xff] %v340_v33 }
  0xe7 PF: > { %s13_s12 = sadd.s32 1, %s485_s12  }
  0xe8   : > { %p10_p5 = scmp.ge.s32.totalorder %s13_s12, 4  }
  0xea   :  { %12 = sbr.rel (!%p10_p5) target bundleno = 1 (0x1), region = 68 }

// kernel: cfnet_forward.67
= control target key start
LH: loop header
LB: loop body
LE: loop exit
PB: predicated region body
PF: predicated region fallthrough
CT: control target
= control target key end

     0   :  { %s424_s12 = smov 0   ;;  %s447_s0 = inlined_call_operand.vmem [shape: bf16[2,8,32], index: 0, kind: input, shape index: {}]   ;;  %s448_s1 = inlined_call_operand.vmem [shape: bf16[2,32,128], index: 1, kind: input, shape index: {}]   ;;  %s449_s2 = inlined_call_operand.vmem [shape: f32[2,8,1], index: 2, kind: input, shape index: {}]   ;;  %s450_s3 = inlined_call_operand.vmem [shape: f32[2,8,128], index: 3, kind: output, shape index: {}]  }
   0x1 LB: > { %s352_s13 = sadd.s32 4294967295, %s399_s12   ;;  %p356_p0 = scmp.ge.s32.totalorder %s399_s12, 1  ;;  %s399_s12 = sphi %s424_s12, %s13_s12  }
   0x2   : > { %p155_p1 = scmp.lt.s32.totalorder %s399_s12, 3 }
   0x4   : > { %p156_p2 = pnand %p356_p0, %p155_p1 }
   0x5   : > { %p186_p3 = scmp.lt.s32.totalorder (!%p156_p2), %s352_s13, 1 }
   0x6   : > { %159 = sbr.rel (%p156_p2) target bundleno = 221 (0xdd), region = 32 }
   0xb   : > { %v401_v0 = vmov 0.0   ;;  %vm402_vm0 = vmmov 0   ;;  %s452_s13 = smov (!%p186_p3, %s352_s13), 1  ;;  %v403_v1 = vmov 0   ;;  %vm227_vm1 = vcmask 261120  }
   0xc   : > { %371 = vmatprep.subr.bf16.mxu0 %v401_v0  ;;  %375 = vmatprep.mubr.msk.bf16.mxu0 %vm402_vm0, %v401_v0  ;;  %s367_s14 = sshll.u32 %s452_s13, 4  ;;  %s357_s18 = sshll.u32 %s452_s13, 2 }
   0xd   : > { %390 = vset.pattern.permute.xlu0 %v403_v1  ;;  %s194_s17 = scalar_lea.vmem %s448_s1, %s367_s14  ;;  %s360_s19 = sshll.u32 %s452_s13, 3 }
   0xe   : > { %v391_v2 = vld [vmem:[%s194_s17 + $0x8] sm:$0xff]   ;;  %s198_s22 = scalar_lea.vmem %s449_s2, %s360_s19  ;;  %v392_v3 = vld [vmem:[%s194_s17] sm:$0xff]   ;;  %s189_s25 = scalar_lea.vmem %s447_s0, %s357_s18 }
   0xf   : > { %372 = vmatpush3.bf16.msra.mxu0 %v391_v2  ;;  %v209_v4 = vld [vmem:[%s198_s22] sm:$0xff]  ;;  %s202_s28 = scalar_lea.vmem %s450_s3, %s360_s19 }
  0x10   : > { %373 = vmatprep.subr.bf16.mxu0 %v401_v0  ;;  %212 = vperm.xlu0 %390, %v209_v4   ;;  %v204_v5 = vld [vmem:[%s189_s25] sm:$0xf] }
  0x13   : > { %374 = vmatpush3.bf16.msra.mxu0 %v392_v3 }
  0x16   : > { %376 = vmatmul.mubr.msk.bf16.vlgmr.msra.gmra.mxu0 %vm227_vm1, %v204_v5 }
  0x8b   : > { %v213_v6 = vpop.permute.xlu0 %212 }
  0xd6   : > { %v265_v7 = vpop.f32.mrf.mxu0 }
  0xd7   : > { %v266_v8 = vadd.f32 %v265_v7, %v213_v6 }
  0xd8   : > { %v377_v9 = vpop.f32.mrf.mxu0 }
  0xd9   : > { %vm271_vm2 = vcmp.ge.f32.partialorder %v266_v8, 0.0  ;;  %v272_v10 = vmul.f32 0.2, %v266_v8 }
  0xda   : > { %v268_v11 = vpop.f32.mrf.mxu0 }
  0xdb   : > { %v273_v12 = vsel %vm271_vm2, %v266_v8, %v272_v10 }
  0xdc   : > { %274 = vst [vmem:[%s202_s28] sm:$0xff] %v273_v12  ;;  %v378_v13 = vpop.f32.mrf.mxu0 }
  0xdd PF: > { %s13_s12 = sadd.s32 1, %s399_s12  }
  0xde   : > { %p10_p4 = scmp.ge.s32.totalorder %s13_s12, 4  }
  0xe0   :  { %12 = sbr.rel (!%p10_p4) target bundleno = 1 (0x1), region = 68 }

// kernel: cfnet_forward.68
= control target key start
LH: loop header
LB: loop body
LE: loop exit
PB: predicated region body
PF: predicated region fallthrough
CT: control target
= control target key end

     0   :  { %s401_s12 = smov 0   ;;  %s424_s0 = inlined_call_operand.vmem [shape: bf16[2,8,8], index: 0, kind: input, shape index: {}]   ;;  %s425_s1 = inlined_call_operand.vmem [shape: bf16[2,8,128], index: 1, kind: input, shape index: {}]   ;;  %s426_s2 = inlined_call_operand.vmem [shape: f32[2,8,1], index: 2, kind: input, shape index: {}]   ;;  %s427_s3 = inlined_call_operand.vmem [shape: f32[2,8,128], index: 3, kind: output, shape index: {}]  }
   0x1 LB: > { %s338_s13 = sadd.s32 4294967295, %s376_s12   ;;  %p342_p0 = scmp.ge.s32.totalorder %s376_s12, 1  ;;  %s376_s12 = sphi %s401_s12, %s13_s12  }
   0x2   : > { %p154_p1 = scmp.lt.s32.totalorder %s376_s12, 3 }
   0x4   : > { %p155_p2 = pnand %p342_p0, %p154_p1 }
   0x5   : > { %p184_p3 = scmp.lt.s32.totalorder (!%p155_p2), %s338_s13, 1 }
   0x6   : > { %158 = sbr.rel (%p155_p2) target bundleno = 218 (0xda), region = 32 }
   0xb   : > { %v378_v0 = vmov 0.0   ;;  %vm379_vm0 = vmmov 0   ;;  %s429_s13 = smov (!%p184_p3, %s338_s13), 1  ;;  %v380_v1 = vmov 0   ;;  %vm213_vm1 = vcmask 1043456  }
   0xc   : > { %352 = vmatprep.subr.bf16.mxu0 %v378_v0  ;;  %354 = vmatprep.mubr.msk.bf16.mxu0 %vm379_vm0, %v378_v0  ;;  %s343_s14 = sshll.u32 %s429_s13, 2  ;;  %s345_s15 = sshll.u32 %s429_s13, 3  ;;  %vm209_vm2 = vcmask 64512  }
   0xd   : > { %369 = vset.pattern.permute.xlu0 %v380_v1  ;;  %s191_s18 = scalar_lea.vmem %s425_s1, %s343_s14  ;;  %s187_s21 = scalar_lea.vmem %s424_s0, %s343_s14 }
   0xe   : > { %v202_v2 = vld [vmem:[%s191_s18] sm:$0xf]  ;;  %s195_s24 = scalar_lea.vmem %s426_s2, %s345_s15  ;;  %s199_s27 = scalar_lea.vmem %s427_s3, %s345_s15 }
   0xf   : > { %v215_v3 = vsel %vm213_vm1, %v202_v2, 0  ;;  %v203_v4 = vld [vmem:[%s195_s24] sm:$0xff] }
  0x10   : > { %353 = vmatpush3.bf16.msra.mxu0 %v215_v3  ;;  %v201_v5 = vld [vmem:[%s187_s21] sm:$0xf]  ;;  %206 = vperm.xlu0 %369, %v203_v4  }
  0x13   : > { %355 = vmatmul.mubr.msk.bf16.vlgmr.msra.gmra.mxu0 %vm209_vm2, %v201_v5 }
  0x8b   : > { %v207_v6 = vpop.permute.xlu0 %206 }
  0xd3   : > { %v251_v7 = vpop.f32.mrf.mxu0 }
  0xd4   : > { %v252_v8 = vadd.f32 %v251_v7, %v207_v6 }
  0xd5   : > { %v356_v9 = vpop.f32.mrf.mxu0 }
  0xd6   : > { %vm257_vm3 = vcmp.ge.f32.partialorder %v252_v8, 0.0  ;;  %v258_v10 = vmul.f32 0.2, %v252_v8 }
  0xd7   : > { %v254_v11 = vpop.f32.mrf.mxu0 }
  0xd8   : > { %v259_v12 = vsel %vm257_vm3, %v252_v8, %v258_v10 }
  0xd9   : > { %260 = vst [vmem:[%s199_s27] sm:$0xff] %v259_v12  ;;  %v357_v13 = vpop.f32.mrf.mxu0 }
  0xda PF: > { %s13_s12 = sadd.s32 1, %s376_s12  }
  0xdb   : > { %p10_p4 = scmp.ge.s32.totalorder %s13_s12, 4  }
  0xdd   :  { %12 = sbr.rel (!%p10_p4) target bundleno = 1 (0x1), region = 68 }

// kernel: tile.123
= control target key start
LH: loop header
LB: loop body
LE: loop exit
PB: predicated region body
PF: predicated region fallthrough
CT: control target
= control target key end

     0   :  { %s22_s0 = inlined_call_operand.vmem [shape: f32[8], index: 0, kind: input, shape index: {}]   ;;  %s23_s1 = inlined_call_operand.vmem [shape: f32[4,8], index: 1, kind: output, shape index: {}]  }
   0x1   :  { %v4_v0 = vld [vmem:[%s22_s0] ss:$0 sm:$0xff] }
   0x2   :  { %5 = vst [vmem:[%s23_s1] sm:$0xf] %v4_v0 }

// kernel: tile.0
= control target key start
LH: loop header
LB: loop body
LE: loop exit
PB: predicated region body
PF: predicated region fallthrough
CT: control target
= control target key end

     0   :  { %s67_s8 = smov 125   ;;  %vm8_vm0 = vcmask 7168   ;;  %s68_s11 = smov 126   ;;  %s118_s0 = inlined_call_operand.vmem [shape: f32[4,8], index: 0, kind: input, shape index: {}]   ;;  %s119_s1 = inlined_call_operand.vmem [shape: f32[1,32,1], index: 1, kind: output, shape index: {}]  }
   0x1   :  { %v5_v0 = vld [vmem:[%s118_s0] sm:$0xf]  ;;  %s66_s0 = smov 127   ;;  %s69_s12 = smov 124  }
   0x2   :  { %6 = vst [vmem:[#allocation0] sm:$0xf] %v5_v0  ;;  %s70_s13 = smov 123   ;;  %s71_s14 = smov 122  }
   0x3   :  { %s72_s15 = smov 121  }
   0x9   :  { %v10_v1 = vld [vmem:[#allocation0] sm:$0xf]  }
   0xa   :  { %v22_v2 = vld [vmem:[#allocation0] sm:$0xf]   ;;  %11 = vrot.lane.b32.xlu0 %v10_v1, %s66_s0 }
   0xb   :  { %23 = vrot.lane.b32.xlu1 %v22_v2, %s67_s8  ;;  %v16_v3 = vld [vmem:[#allocation0] sm:$0xf]  }
   0xc   :  { %v28_v4 = vld [vmem:[#allocation0] sm:$0xf]  }
   0xd   :  { %v7_v5 = vld [vmem:[#allocation0] sm:$0xf]  }
   0xe   :  { %9 = vst.msk [vmem:[%s119_s1] ss:$8 sm:$0xf] %vm8_vm0, %v7_v5   ;;  %17 = vrot.lane.b32.xlu0 %v16_v3, %s68_s11  ;;  %v34_v6 = vld [vmem:[#allocation0] sm:$0xf]  }
   0xf   :  { %29 = vrot.lane.b32.xlu1 %v28_v4, %s69_s12  ;;  %v40_v7 = vld [vmem:[#allocation0] sm:$0xf]  }
  0x10   :  { %v46_v8 = vld [vmem:[#allocation0] sm:$0xf]  }
  0x12   :  { %35 = vrot.lane.b32.xlu0 %v34_v6, %s70_s13 }
  0x13   :  { %41 = vrot.lane.b32.xlu1 %v40_v7, %s71_s14 }
  0x16   :  { %47 = vrot.lane.b32.xlu0 %v46_v8, %s72_s15 }
  0x7c   :  { %v12_v9 = vpop.permute.xlu0 %11  }
  0x7d   :  { %v24_v10 = vpop.permute.xlu1 %23   ;;  %52 = vst.msk [vmem:[%s119_s1 + $0x1] ss:$8 sm:$0xf] %vm8_vm0, %v12_v9  }
  0x7e   :  { %54 = vst.msk [vmem:[%s119_s1 + $0x3] ss:$8 sm:$0xf] %vm8_vm0, %v24_v10  }
  0x80   :  { %v18_v11 = vpop.permute.xlu0 %17  }
  0x81   :  { %v30_v12 = vpop.permute.xlu1 %29   ;;  %53 = vst.msk [vmem:[%s119_s1 + $0x2] ss:$8 sm:$0xf] %vm8_vm0, %v18_v11  }
  0x82   :  { %55 = vst.msk [vmem:[%s119_s1 + $0x4] ss:$8 sm:$0xf] %vm8_vm0, %v30_v12  }
  0x84   :  { %v36_v13 = vpop.permute.xlu0 %35  }
  0x85   :  { %v42_v14 = vpop.permute.xlu1 %41   ;;  %56 = vst.msk [vmem:[%s119_s1 + $0x5] ss:$8 sm:$0xf] %vm8_vm0, %v36_v13  }
  0x86   :  { %57 = vst.msk [vmem:[%s119_s1 + $0x6] ss:$8 sm:$0xf] %vm8_vm0, %v42_v14  }
  0x88   :  { %v48_v15 = vpop.permute.xlu0 %47  }
  0x89   :  { %58 = vst.msk [vmem:[%s119_s1 + $0x7] ss:$8 sm:$0xf] %vm8_vm0, %v48_v15  }

// kernel: cfnet_forward.69
= control target key start
LH: loop header
LB: loop body
LE: loop exit
PB: predicated region body
PF: predicated region fallthrough
CT: control target
= control target key end

     0   :  { %s537_s12 = smov 0   ;;  %s571_s0 = inlined_call_operand.vmem [shape: bf16[2,32,72], index: 0, kind: input, shape index: {}]   ;;  %s572_s1 = inlined_call_operand.vmem [shape: bf16[2,72,128], index: 1, kind: input, shape index: {}]   ;;  %s573_s2 = inlined_call_operand.vmem [shape: f32[2,32,1], index: 2, kind: input, shape index: {}]   ;;  %s574_s3 = inlined_call_operand.vmem [shape: f32[2,32,128], index: 3, kind: output, shape index: {}]  }
   0x1 LB: > { %s441_s13 = sadd.s32 4294967295, %s514_s12   ;;  %p445_p0 = scmp.ge.s32.totalorder %s514_s12, 1  ;;  %s514_s12 = sphi %s537_s12, %s13_s12  }
   0x2   : > { %p157_p1 = scmp.lt.s32.totalorder %s514_s12, 3 }
   0x4   : > { %p158_p2 = pnand %p445_p0, %p157_p1 }
   0x5   : > { %p191_p3 = scmp.lt.s32.totalorder (!%p158_p2), %s441_s13, 1 }
   0x6   : > { %161 = sbr.rel (%p158_p2) target bundleno = 241 (0xf1), region = 32 }
   0xb   : > { %v516_v0 = vmov 0   ;;  %s576_s13 = smov (!%p191_p3, %s441_s13), 1  ;;  %vm293_vm0 = vcmask 1043456   ;;  %vm286_vm1 = vcmask 588800  }
   0xc   : > { %500 = vset.pattern.permute.xlu1 %v516_v0  ;;  %499 = vset.pattern.permute.xlu0 %v516_v0  ;;  %s489_s14 = smul.u32 36, %s576_s13  ;;  %s464_s15 = sshll.u32 %s576_s13, 4 }
   0xd   : > { %s195_s18 = scalar_lea.vmem %s571_s0, %s464_s15  ;;  %s465_s22 = sshll.u32 %s576_s13, 5 }
   0xe   : > { %s200_s21 = scalar_lea.vmem %s572_s1, %s489_s14  ;;  %v506_v1 = vld [vmem:[%s195_s18] sm:$0xff]   ;;  %s205_s25 = scalar_lea.vmem %s573_s2, %s465_s22  ;;  %v507_v12 = vld [vmem:[%s195_s18 + $0x8] sm:$0xff]  }
   0xf   : > { %v501_v2 = vld [vmem:[%s200_s21 + $0x20] ss:$0 sps:$4 sm:$0xff]   ;;  %v502_v3 = vld [vmem:[%s200_s21 + $0x18] sm:$0xff]   ;;  %484 = vmatprep.mubr.msk.bf16.mxu0 %vm286_vm1, %v506_v1  ;;  %v503_v5 = vld [vmem:[%s200_s21 + $0x10] sm:$0xff]   ;;  %s210_s28 = scalar_lea.vmem %s574_s3, %s465_s22 }
  0x10   : > { %488 = vmatprep.subr.msk.bf16.mxu0 %vm293_vm0, %v501_v2  ;;  %v295_v4 = vsel %vm293_vm0, %v501_v2, 0  ;;  %v227_v6 = vld [vmem:[%s205_s25 + $0x10] sm:$0xff]  ;;  %v225_v7 = vld [vmem:[%s205_s25] sm:$0xff]  ;;  %v228_v8 = vld [vmem:[%s205_s25 + $0x18] sm:$0xff] }
  0x11   : > { %475 = vmatpush3.bf16.msra.mxu0 %v295_v4  ;;  %241 = vperm.xlu1 %500, %v227_v6   ;;  %v504_v9 = vld [vmem:[%s200_s21 + $0x8] sm:$0xff]   ;;  %v505_v11 = vld [vmem:[%s200_s21] sm:$0xff]  }
  0x12   : > { %476 = vmatprep.subr.bf16.mxu0 %v502_v3  ;;  %231 = vperm.xlu0 %499, %v225_v7   ;;  %v226_v10 = vld [vmem:[%s205_s25 + $0x8] sm:$0xff] }
  0x15   : > { %477 = vmatpush3.bf16.msra.mxu0 %v502_v3  ;;  %246 = vperm.xlu1 %500, %v228_v8  }
  0x16   : > { %478 = vmatprep.subr.bf16.mxu0 %v503_v5  ;;  %236 = vperm.xlu0 %499, %v226_v10  }
  0x19   : > { %479 = vmatpush3.bf16.msra.mxu0 %v503_v5 }
  0x1a   : > { %480 = vmatprep.subr.bf16.mxu0 %v504_v9 }
  0x1d   : > { %481 = vmatpush3.bf16.msra.mxu0 %v504_v9 }
  0x1e   : > { %482 = vmatprep.subr.bf16.mxu0 %v505_v11 }
  0x21   : > { %483 = vmatpush3.bf16.msra.mxu0 %v505_v11 }
  0x24   : > { %485 = vmatmul.mubr.msk.bf16.vlgmr.msra.gmra.mxu0 %vm286_vm1, %v507_v12 }
  0x8c   : > { %v242_v13 = vpop.permute.xlu1 %241 }
  0x8d   : > { %v232_v14 = vpop.permute.xlu0 %231 }
  0x90   : > { %v247_v20 = vpop.permute.xlu1 %246 }
  0x91   : > { %v237_v25 = vpop.permute.xlu0 %236 }
  0xe4   : > { %v486_v15 = vpop.f32.mrf.mxu0 }
  0xe5   : > { %v340_v16 = vadd.f32 %v486_v15, %v242_v13 }
  0xe6   : > { %v331_v17 = vpop.f32.mrf.mxu0 }
  0xe7   : > { %vm348_vm2 = vcmp.ge.f32.partialorder %v340_v16, 0.0  ;;  %v352_v18 = vmul.f32 0.2, %v340_v16  ;;  %v332_v19 = vadd.f32 %v331_v17, %v232_v14 }
  0xe8   : > { %v487_v21 = vpop.f32.mrf.mxu0 }
  0xe9   : > { %v356_v22 = vsel %vm348_vm2, %v340_v16, %v352_v18  ;;  %vm346_vm3 = vcmp.ge.f32.partialorder %v332_v19, 0.0  ;;  %v350_v23 = vmul.f32 0.2, %v332_v19  ;;  %v343_v24 = vadd.f32 %v487_v21, %v247_v20 }
  0xea   : > { %360 = vst [vmem:[%s210_s28 + $0x10] sm:$0xff] %v356_v22  ;;  %v334_v26 = vpop.f32.mrf.mxu0 }
  0xeb   : > { %v354_v27 = vsel %vm346_vm3, %v332_v19, %v350_v23  ;;  %vm349_vm4 = vcmp.ge.f32.partialorder %v343_v24, 0.0  ;;  %v353_v28 = vmul.f32 0.2, %v343_v24  ;;  %v335_v29 = vadd.f32 %v334_v26, %v237_v25 }
  0xec   : > { %358 = vst [vmem:[%s210_s28] sm:$0xff] %v354_v27 }
  0xed   : > { %v357_v30 = vsel %vm349_vm4, %v343_v24, %v353_v28  ;;  %vm347_vm5 = vcmp.ge.f32.partialorder %v335_v29, 0.0  ;;  %v351_v31 = vmul.f32 0.2, %v335_v29 }
  0xee   : > { %361 = vst [vmem:[%s210_s28 + $0x18] sm:$0xff] %v357_v30 }
  0xef   : > { %v355_v32 = vsel %vm347_vm5, %v335_v29, %v351_v31 }
  0xf0   : > { %359 = vst [vmem:[%s210_s28 + $0x8] sm:$0xff] %v355_v32 }
  0xf1 PF: > { %s13_s12 = sadd.s32 1, %s514_s12  }
  0xf2   : > { %p10_p4 = scmp.ge.s32.totalorder %s13_s12, 4  }
  0xf4   :  { %12 = sbr.rel (!%p10_p4) target bundleno = 1 (0x1), region = 68 }

// kernel: cfnet_forward.70
= control target key start
LH: loop header
LB: loop body
LE: loop exit
PB: predicated region body
PF: predicated region fallthrough
CT: control target
= control target key end

     0   :  { %s666_s12 = smov 0   ;;  %s718_s0 = inlined_call_operand.vmem [shape: bf16[2,8,288], index: 0, kind: input, shape index: {}]   ;;  %s719_s1 = inlined_call_operand.vmem [shape: bf16[2,288,128], index: 1, kind: input, shape index: {}]   ;;  %s720_s2 = inlined_call_operand.vmem [shape: f32[2,8,1], index: 2, kind: input, shape index: {}]   ;;  %s721_s3 = inlined_call_operand.vmem [shape: f32[2,8,128], index: 3, kind: output, shape index: {}]  }
   0x1 LB: > { %s534_s13 = sadd.s32 4294967295, %s641_s12   ;;  %p538_p0 = scmp.ge.s32.totalorder %s641_s12, 1  ;;  %s641_s12 = sphi %s666_s12, %s13_s12  }
   0x2   : > { %p156_p1 = scmp.lt.s32.totalorder %s641_s12, 3 }
   0x4   : > { %p157_p2 = pnand %p538_p0, %p156_p1 }
   0x5   : > { %p188_p3 = scmp.lt.s32.totalorder (!%p157_p2), %s534_s13, 1 }
   0x6   : > { %160 = sbr.rel (%p157_p2) target bundleno = 253 (0xfd), region = 32 }
   0xb   : > { %v643_v0 = vmov 0.0   ;;  %vm644_vm0 = vmmov 0   ;;  %s723_s13 = smov (!%p188_p3, %s534_s13), 1  ;;  %v645_v1 = vmov 0   ;;  %vm369_vm1 = vcmask 261120  }
   0xc   : > { %592 = vmatprep.subr.bf16.mxu1 %v643_v0  ;;  %596 = vmatprep.mubr.msk.bf16.mxu1 %vm644_vm0, %v643_v0  ;;  %s601_s14 = smul.u32 144, %s723_s13  ;;  %s541_s15 = sshll.u32 %s723_s13, 3 }
   0xd   : > { %613 = vset.pattern.permute.xlu0 %v645_v1  ;;  %s201_s18 = scalar_lea.vmem %s720_s2, %s541_s15  ;;  %s600_s22 = smul.u32 12, %s723_s13 }
   0xe   : > { %s686_s21 = scalar_lea.vmem %s719_s1, %s601_s14  ;;  %v245_v2 = vld [vmem:[%s201_s18] sm:$0xff]  ;;  %s205_s28 = scalar_lea.vmem %s721_s3, %s541_s15 }
   0xf   : > { %v614_v3 = vld [vmem:[%s686_s21 + $0x78] sm:$0xff]   ;;  %248 = vperm.xlu0 %613, %v245_v2   ;;  %v616_v5 = vld [vmem:[%s686_s21 + $0x70] sm:$0xff]   ;;  %v618_v7 = vld [vmem:[%s686_s21 + $0x68] sm:$0xff]   ;;  %s192_s25 = scalar_lea.vmem %s718_s0, %s600_s22 }
  0x10   : > { %v615_v4 = vld [vmem:[%s686_s21 + $0x38] sm:$0xff]   ;;  %567 = vmatprep.subr.bf16.mxu0 %v614_v3  ;;  %v617_v6 = vld [vmem:[%s686_s21 + $0x30] sm:$0xff]   ;;  %v619_v8 = vld [vmem:[%s686_s21 + $0x28] sm:$0xff]  }
  0x11   : > { %568 = vmatpush3.bf16.msra.mxu0 %v615_v4  ;;  %v620_v9 = vld [vmem:[%s686_s21 + $0x60] sm:$0xff]   ;;  %v622_v11 = vld [vmem:[%s686_s21 + $0x58] sm:$0xff]   ;;  %v628_v12 = vld [vmem:[%s686_s21 + $0x88] sm:$0xff]  }
  0x12   : > { %569 = vmatprep.subr.bf16.mxu0 %v616_v5  ;;  %v621_v10 = vld [vmem:[%s686_s21 + $0x20] sm:$0xff]   ;;  %v623_v13 = vld [vmem:[%s686_s21 + $0x18] sm:$0xff]   ;;  %v624_v14 = vld [vmem:[%s686_s21 + $0x50] sm:$0xff]   ;;  %593 = vmatpush3.bf16.msra.mxu1 %v628_v12 }
  0x13   : > { %594 = vmatprep.subr.bf16.mxu1 %v643_v0  ;;  %v631_v15 = vld [vmem:[%s686_s21 + $0x80] sm:$0xff]   ;;  %v625_v17 = vld [vmem:[%s686_s21 + $0x10] sm:$0xff]   ;;  %v634_v19 = vld [vmem:[%s192_s25 + $0x8] ss:$0 sps:$4 sm:$0xff]  }
  0x14   : > { %v207_v16 = vld [vmem:[%s192_s25] sm:$0xff]  ;;  %v626_v20 = vld [vmem:[%s686_s21 + $0x48] sm:$0xff]  }
  0x15   : > { %570 = vmatpush3.bf16.msra.mxu0 %v617_v6  ;;  %v544_v18 = vcombine.high %v207_v16, %v207_v16  ;;  %v627_v21 = vld [vmem:[%s686_s21 + $0x8] sm:$0xff]   ;;  %v629_v22 = vld [vmem:[%s686_s21 + $0x40] sm:$0xff]   ;;  %v543_v24 = vcombine.low %v207_v16, %v207_v16 }
  0x16   : > { %571 = vmatprep.subr.bf16.mxu0 %v618_v7  ;;  %595 = vmatpush3.bf16.msra.mxu1 %v631_v15  ;;  %v630_v23 = vld [vmem:[%s686_s21] sm:$0xff]  }
  0x17   : > { %405 = vmatprep.mubr.bf16.mxu0 %v544_v18 }
  0x19   : > { %572 = vmatpush3.bf16.msra.mxu0 %v619_v8  ;;  %597 = vmatmul.mubr.msk.bf16.vlgmr.msra.gmra.mxu1 %vm369_vm1, %v634_v19 }
  0x1a   : > { %573 = vmatprep.subr.bf16.mxu0 %v620_v9 }
  0x1d   : > { %574 = vmatpush3.bf16.msra.mxu0 %v621_v10 }
  0x1e   : > { %575 = vmatprep.subr.bf16.mxu0 %v622_v11 }
  0x21   : > { %576 = vmatpush3.bf16.msra.mxu0 %v623_v13 }
  0x22   : > { %577 = vmatprep.subr.bf16.mxu0 %v624_v14 }
  0x25   : > { %578 = vmatpush3.bf16.msra.mxu0 %v625_v17 }
  0x26   : > { %579 = vmatprep.subr.bf16.mxu0 %v626_v20 }
  0x29   : > { %580 = vmatpush3.bf16.msra.mxu0 %v627_v21 }
  0x2a   : > { %581 = vmatprep.subr.bf16.mxu0 %v629_v22 }
  0x2d   : > { %582 = vmatpush3.bf16.msra.mxu0 %v630_v23 }
  0x30   : > { %406 = vmatmul.mubr.bf16.vlgmr.msra.gmra.mxu0 %v543_v24 }
  0x8a   : > { %v249_v31 = vpop.permute.xlu0 %248 }
  0xd9   : > { %v447_v25 = vpop.f32.mrf.mxu1 }
  0xdb   : > { %v598_v26 = vpop.f32.mrf.mxu1 }
  0xdd   : > { %v450_v27 = vpop.f32.mrf.mxu1 }
  0xdf   : > { %v599_v28 = vpop.f32.mrf.mxu1 }
  0xf0   : > { %v583_v29 = vpop.f32.mrf.mxu0 }
  0xf2   : > { %v584_v30 = vpop.f32.mrf.mxu0 }
  0xf3   : > { %v585_v32 = vadd.f32 %v584_v30, %v583_v29 }
  0xf4   : > { %v586_v33 = vpop.f32.mrf.mxu0 }
  0xf5   : > { %v408_v34 = vadd.f32 %v585_v32, %v249_v31 }
  0xf6   : > { %v587_v35 = vpop.f32.mrf.mxu0 }
  0xf7   : > { %v448_v36 = vadd.f32 %v447_v25, %v408_v34 }
  0xf9   : > { %vm453_vm2 = vcmp.ge.f32.partialorder %v448_v36, 0.0  ;;  %v454_v37 = vmul.f32 0.2, %v448_v36 }
  0xfb   : > { %v455_v38 = vsel %vm453_vm2, %v448_v36, %v454_v37 }
  0xfc   : > { %456 = vst [vmem:[%s205_s28] sm:$0xff] %v455_v38 }
  0xfd PF: > { %s13_s12 = sadd.s32 1, %s641_s12  }
  0xfe   : > { %p10_p4 = scmp.ge.s32.totalorder %s13_s12, 4  }
 0x100   :  { %12 = sbr.rel (!%p10_p4) target bundleno = 1 (0x1), region = 68 }

// kernel: cfnet_forward.71
= control target key start
LH: loop header
LB: loop body
LE: loop exit
PB: predicated region body
PF: predicated region fallthrough
CT: control target
= control target key end

     0   :  { %s411_s12 = smov 0   ;;  %s434_s0 = inlined_call_operand.vmem [shape: bf16[2,8,16], index: 0, kind: input, shape index: {}]   ;;  %s435_s1 = inlined_call_operand.vmem [shape: bf16[2,16,128], index: 1, kind: input, shape index: {}]   ;;  %s436_s2 = inlined_call_operand.vmem [shape: f32[2,8,1], index: 2, kind: input, shape index: {}]   ;;  %s437_s3 = inlined_call_operand.vmem [shape: f32[2,8,128], index: 3, kind: output, shape index: {}]  }
   0x1 LB: > { %s344_s13 = sadd.s32 4294967295, %s386_s12   ;;  %p348_p0 = scmp.ge.s32.totalorder %s386_s12, 1  ;;  %s386_s12 = sphi %s411_s12, %s13_s12  }
   0x2   : > { %p155_p1 = scmp.lt.s32.totalorder %s386_s12, 3 }
   0x4   : > { %p156_p2 = pnand %p348_p0, %p155_p1 }
   0x5   : > { %p186_p3 = scmp.lt.s32.totalorder (!%p156_p2), %s344_s13, 1 }
   0x6   : > { %159 = sbr.rel (%p156_p2) target bundleno = 217 (0xd9), region = 32 }
   0xb   : > { %v388_v0 = vmov 0.0   ;;  %vm389_vm0 = vmmov 0   ;;  %s439_s13 = smov (!%p186_p3, %s344_s13), 1  ;;  %v390_v1 = vmov 0   ;;  %vm219_vm1 = vcmask 130048  }
   0xc   : > { %361 = vmatprep.subr.bf16.mxu0 %v388_v0  ;;  %363 = vmatprep.mubr.msk.bf16.mxu0 %vm389_vm0, %v388_v0  ;;  %s358_s14 = sshll.u32 %s439_s13, 3  ;;  %s349_s15 = sshll.u32 %s439_s13, 2 }
   0xd   : > { %378 = vset.pattern.permute.xlu0 %v390_v1  ;;  %s194_s18 = scalar_lea.vmem %s435_s1, %s358_s14  ;;  %s189_s21 = scalar_lea.vmem %s434_s0, %s349_s15 }
   0xe   : > { %v379_v2 = vld [vmem:[%s194_s18] sm:$0xff]   ;;  %s198_s24 = scalar_lea.vmem %s436_s2, %s358_s14  ;;  %s202_s27 = scalar_lea.vmem %s437_s3, %s358_s14 }
   0xf   : > { %v207_v3 = vld [vmem:[%s198_s24] sm:$0xff]  ;;  %362 = vmatpush3.bf16.msra.mxu0 %v379_v2 }
  0x10   : > { %v204_v4 = vld [vmem:[%s189_s21] sm:$0xf]  ;;  %210 = vperm.xlu0 %378, %v207_v3  }
  0x12   : > { %364 = vmatmul.mubr.msk.bf16.vlgmr.msra.gmra.mxu0 %vm219_vm1, %v204_v4 }
  0x8b   : > { %v211_v5 = vpop.permute.xlu0 %210 }
  0xd2   : > { %v257_v6 = vpop.f32.mrf.mxu0 }
  0xd3   : > { %v258_v7 = vadd.f32 %v257_v6, %v211_v5 }
  0xd4   : > { %v365_v8 = vpop.f32.mrf.mxu0 }
  0xd5   : > { %vm263_vm2 = vcmp.ge.f32.partialorder %v258_v7, 0.0  ;;  %v264_v9 = vmul.f32 0.2, %v258_v7 }
  0xd6   : > { %v260_v10 = vpop.f32.mrf.mxu0 }
  0xd7   : > { %v265_v11 = vsel %vm263_vm2, %v258_v7, %v264_v9 }
  0xd8   : > { %266 = vst [vmem:[%s202_s27] sm:$0xff] %v265_v11  ;;  %v366_v12 = vpop.f32.mrf.mxu0 }
  0xd9 PF: > { %s13_s12 = sadd.s32 1, %s386_s12  }
  0xda   : > { %p10_p4 = scmp.ge.s32.totalorder %s13_s12, 4  }
  0xdc   :  { %12 = sbr.rel (!%p10_p4) target bundleno = 1 (0x1), region = 68 }

// kernel: cfnet_forward.73
= control target key start
LH: loop header
LB: loop body
LE: loop exit
PB: predicated region body
PF: predicated region fallthrough
CT: control target
= control target key end

     0   :  { %s484_s12 = smov 0   ;;  %s512_s0 = inlined_call_operand.vmem [shape: bf16[2,8,16], index: 0, kind: input, shape index: {}]   ;;  %s513_s1 = inlined_call_operand.vmem [shape: bf16[2,16,512], index: 1, kind: input, shape index: {}]   ;;  %s514_s2 = inlined_call_operand.vmem [shape: f32[2,8,1], index: 2, kind: input, shape index: {}]   ;;  %s515_s3 = inlined_call_operand.vmem [shape: f32[2,8,512], index: 3, kind: output, shape index: {}]  }
   0x1 LB: > { %s418_s13 = sadd.s32 4294967295, %s461_s12   ;;  %p422_p0 = scmp.ge.s32.totalorder %s461_s12, 1  ;;  %s461_s12 = sphi %s484_s12, %s13_s12  }
   0x2   : > { %p155_p1 = scmp.lt.s32.totalorder %s461_s12, 3 }
   0x4   : > { %p156_p2 = pnand %p422_p0, %p155_p1 }
   0x5   : > { %p187_p3 = scmp.lt.s32.totalorder (!%p156_p2), %s418_s13, 1 }
   0x6   : > { %159 = sbr.rel (%p156_p2) target bundleno = 222 (0xde), region = 32 }
   0xb   : > { %v463_v0 = vmov 0   ;;  %s517_s13 = smov (!%p187_p3, %s418_s13), 1  ;;  %vm237_vm0 = vcmask 130048  }
   0xc   : > { %273 = vmatprep.mubr.bf16.mxu0 %v463_v0  ;;  %314 = vmatprep.mubr.bf16.mxu1 %v463_v0  ;;  %s437_s14 = sshll.u32 %s517_s13, 5  ;;  %s423_s15 = sshll.u32 %s517_s13, 2 }
   0xd   : > { %448 = vset.pattern.permute.xlu0 %v463_v0  ;;  %s195_s18 = scalar_lea.vmem %s513_s1, %s437_s14  ;;  %s426_s19 = sshll.u32 %s517_s13, 3 }
   0xe   : > { %v449_v1 = vld [vmem:[%s195_s18 + $0x4] ss:$16 sps:$4 sm:$0xff]   ;;  %v451_v2 = vld [vmem:[%s195_s18 + $0xc] ss:$16 sps:$4 sm:$0xff]   ;;  %s190_s22 = scalar_lea.vmem %s512_s0, %s423_s15  ;;  %s199_s25 = scalar_lea.vmem %s514_s2, %s426_s19  ;;  %v453_v3 = vld [vmem:[%s195_s18] ss:$16 sps:$4 sm:$0xff]  }
   0xf   : > { %255 = vmatprep.subr.bf16.mxu0 %v449_v1  ;;  %v454_v4 = vld [vmem:[%s195_s18 + $0x8] ss:$16 sps:$4 sm:$0xff]   ;;  %296 = vmatprep.subr.bf16.mxu1 %v451_v2  ;;  %v211_v5 = vld [vmem:[%s199_s25] sm:$0xff]  ;;  %s204_s28 = scalar_lea.vmem %s515_s3, %s437_s14 }
  0x10   : > { %256 = vmatpush1.bf16.msra.mxu0 %v453_v3  ;;  %297 = vmatpush1.bf16.msra.mxu1 %v454_v4  ;;  %v206_v6 = vld [vmem:[%s190_s22] sm:$0xf] }
  0x11   : > { %214 = vperm.xlu0 %448, %v211_v5  }
  0x13   : > { %433 = vmatmul.mubr.msk.bf16.vlgmr.msra.gmra.mxu0 %vm237_vm0, %v206_v6  ;;  %434 = vmatmul.mubr.msk.bf16.vlgmr.msra.gmra.mxu1 %vm237_vm0, %v206_v6 }
  0x8c   : > { %v215_v7 = vpop.permute.xlu0 %214 }
  0xd3   : > { %v275_v8 = vpop.f32.mrf.mxu0  ;;  %v316_v9 = vpop.f32.mrf.mxu1 }
  0xd4   : > { %v276_v10 = vadd.f32 %v275_v8, %v215_v7  ;;  %v317_v11 = vadd.f32 %v316_v9, %v215_v7 }
  0xd5   : > { %v277_v12 = vpop.f32.mrf.mxu0  ;;  %v318_v13 = vpop.f32.mrf.mxu1 }
  0xd6   : > { %vm323_vm1 = vcmp.ge.f32.partialorder %v276_v10, 0.0  ;;  %v327_v14 = vmul.f32 0.2, %v276_v10  ;;  %vm325_vm2 = vcmp.ge.f32.partialorder %v317_v11, 0.0  ;;  %v329_v15 = vmul.f32 0.2, %v317_v11 }
  0xd7   : > { %v278_v16 = vadd.f32 %v277_v12, %v215_v7  ;;  %v319_v17 = vadd.f32 %v318_v13, %v215_v7  ;;  %v279_v18 = vpop.f32.mrf.mxu0  ;;  %v320_v19 = vpop.f32.mrf.mxu1 }
  0xd8   : > { %v331_v20 = vsel %vm323_vm1, %v276_v10, %v327_v14  ;;  %v333_v21 = vsel %vm325_vm2, %v317_v11, %v329_v15 }
  0xd9   : > { %335 = vst [vmem:[%s204_s28] sm:$0xff] %v331_v20  ;;  %337 = vst [vmem:[%s204_s28 + $0x10] sm:$0xff] %v333_v21  ;;  %vm324_vm3 = vcmp.ge.f32.partialorder %v278_v16, 0.0  ;;  %v328_v22 = vmul.f32 0.2, %v278_v16  ;;  %vm326_vm4 = vcmp.ge.f32.partialorder %v319_v17, 0.0  ;;  %v280_v24 = vpop.f32.mrf.mxu0  ;;  %v321_v25 = vpop.f32.mrf.mxu1 }
  0xda   : > { %v330_v23 = vmul.f32 0.2, %v319_v17 }
  0xdb   : > { %v332_v26 = vsel %vm324_vm3, %v278_v16, %v328_v22 }
  0xdc   : > { %v334_v27 = vsel %vm326_vm4, %v319_v17, %v330_v23  ;;  %336 = vst [vmem:[%s204_s28 + $0x8] sm:$0xff] %v332_v26 }
  0xdd   : > { %338 = vst [vmem:[%s204_s28 + $0x18] sm:$0xff] %v334_v27 }
  0xde PF: > { %s13_s12 = sadd.s32 1, %s461_s12  }
  0xdf   : > { %p10_p4 = scmp.ge.s32.totalorder %s13_s12, 4  }
  0xe1   :  { %12 = sbr.rel (!%p10_p4) target bundleno = 1 (0x1), region = 68 }

// kernel: cfnet_forward.75
= control target key start
LH: loop header
LB: loop body
LE: loop exit
PB: predicated region body
PF: predicated region fallthrough
CT: control target
= control target key end

     0   :  { %s423_s12 = smov 0   ;;  %s446_s0 = inlined_call_operand.vmem [shape: bf16[2,8,24], index: 0, kind: input, shape index: {}]   ;;  %s447_s1 = inlined_call_operand.vmem [shape: bf16[2,24,128], index: 1, kind: input, shape index: {}]   ;;  %s448_s2 = inlined_call_operand.vmem [shape: f32[2,8,1], index: 2, kind: input, shape index: {}]   ;;  %s449_s3 = inlined_call_operand.vmem [shape: f32[2,8,128], index: 3, kind: output, shape index: {}]  }
   0x1 LB: > { %s352_s13 = sadd.s32 4294967295, %s398_s12   ;;  %p356_p0 = scmp.ge.s32.totalorder %s398_s12, 1  ;;  %s398_s12 = sphi %s423_s12, %s13_s12  }
   0x2   : > { %p155_p1 = scmp.lt.s32.totalorder %s398_s12, 3 }
   0x4   : > { %p156_p2 = pnand %p356_p0, %p155_p1 }
   0x5   : > { %p186_p3 = scmp.lt.s32.totalorder (!%p156_p2), %s352_s13, 1 }
   0x6   : > { %159 = sbr.rel (%p156_p2) target bundleno = 223 (0xdf), region = 32 }
   0xb   : > { %v400_v0 = vmov 0.0   ;;  %vm401_vm0 = vmmov 0   ;;  %s451_s13 = smov (!%p186_p3, %s352_s13), 1  ;;  %v402_v1 = vmov 0   ;;  %vm227_vm1 = vcmask 1043456  }
   0xc   : > { %369 = vmatprep.subr.bf16.mxu0 %v400_v0  ;;  %373 = vmatprep.mubr.msk.bf16.mxu0 %vm401_vm0, %v400_v0  ;;  %s377_s14 = smul.u32 12, %s451_s13  ;;  %s359_s15 = sshll.u32 %s451_s13, 3  ;;  %vm223_vm2 = vcmask 195584  }
   0xd   : > { %389 = vset.pattern.permute.xlu0 %v402_v1  ;;  %s198_s21 = scalar_lea.vmem %s448_s2, %s359_s15  ;;  %s357_s22 = sshll.u32 %s451_s13, 2 }
   0xe   : > { %s194_s18 = scalar_lea.vmem %s447_s1, %s377_s14  ;;  %v208_v3 = vld [vmem:[%s198_s21] sm:$0xff]  ;;  %s189_s25 = scalar_lea.vmem %s446_s0, %s357_s22 }
   0xf   : > { %v390_v2 = vld [vmem:[%s194_s18 + $0x8] ss:$0 sps:$4 sm:$0xff]   ;;  %211 = vperm.xlu0 %389, %v208_v3   ;;  %v391_v5 = vld [vmem:[%s194_s18] sm:$0xff]   ;;  %s202_s28 = scalar_lea.vmem %s449_s3, %s359_s15 }
  0x10   : > { %v229_v4 = vsel %vm227_vm1, %v390_v2, 0  ;;  %v204_v6 = vld [vmem:[%s189_s25] sm:$0xf] }
  0x11   : > { %370 = vmatpush3.bf16.msra.mxu0 %v229_v4 }
  0x12   : > { %371 = vmatprep.subr.bf16.mxu0 %v400_v0 }
  0x15   : > { %372 = vmatpush3.bf16.msra.mxu0 %v391_v5 }
  0x18   : > { %374 = vmatmul.mubr.msk.bf16.vlgmr.msra.gmra.mxu0 %vm223_vm2, %v204_v6 }
  0x8a   : > { %v212_v7 = vpop.permute.xlu0 %211 }
  0xd8   : > { %v265_v8 = vpop.f32.mrf.mxu0 }
  0xd9   : > { %v266_v9 = vadd.f32 %v265_v8, %v212_v7 }
  0xda   : > { %v375_v10 = vpop.f32.mrf.mxu0 }
  0xdb   : > { %vm271_vm3 = vcmp.ge.f32.partialorder %v266_v9, 0.0  ;;  %v272_v11 = vmul.f32 0.2, %v266_v9 }
  0xdc   : > { %v268_v12 = vpop.f32.mrf.mxu0 }
  0xdd   : > { %v273_v13 = vsel %vm271_vm3, %v266_v9, %v272_v11 }
  0xde   : > { %274 = vst [vmem:[%s202_s28] sm:$0xff] %v273_v13  ;;  %v376_v14 = vpop.f32.mrf.mxu0 }
  0xdf PF: > { %s13_s12 = sadd.s32 1, %s398_s12  }
  0xe0   : > { %p10_p4 = scmp.ge.s32.totalorder %s13_s12, 4  }
  0xe2   :  { %12 = sbr.rel (!%p10_p4) target bundleno = 1 (0x1), region = 68 }

// kernel: cfnet_forward.77
= control target key start
LH: loop header
LB: loop body
LE: loop exit
PB: predicated region body
PF: predicated region fallthrough
CT: control target
= control target key end

     0   :  { %s518_s12 = smov 0   ;;  %s547_s0 = inlined_call_operand.vmem [shape: bf16[2,8,24], index: 0, kind: input, shape index: {}]   ;;  %s548_s1 = inlined_call_operand.vmem [shape: bf16[2,24,512], index: 1, kind: input, shape index: {}]   ;;  %s549_s2 = inlined_call_operand.vmem [shape: f32[2,8,1], index: 2, kind: input, shape index: {}]   ;;  %s550_s3 = inlined_call_operand.vmem [shape: f32[2,8,512], index: 3, kind: output, shape index: {}]  }
   0x1 LB: > { %s443_s13 = sadd.s32 4294967295, %s495_s12   ;;  %p447_p0 = scmp.ge.s32.totalorder %s495_s12, 1  ;;  %s495_s12 = sphi %s518_s12, %s13_s12  }
   0x2   : > { %p155_p1 = scmp.lt.s32.totalorder %s495_s12, 3 }
   0x4   : > { %p156_p2 = pnand %p447_p0, %p155_p1 }
   0x5   : > { %p187_p3 = scmp.lt.s32.totalorder (!%p156_p2), %s443_s13, 1 }
   0x6   : > { %159 = sbr.rel (%p156_p2) target bundleno = 229 (0xe5), region = 32 }
   0xb   : > { %v497_v0 = vmov 0   ;;  %s552_s13 = smov (!%p187_p3, %s443_s13), 1  ;;  %vm253_vm0 = vcmask 1043456   ;;  %vm249_vm1 = vcmask 195584  }
   0xc   : > { %298 = vmatprep.mubr.bf16.mxu0 %v497_v0  ;;  %339 = vmatprep.mubr.bf16.mxu1 %v497_v0  ;;  %s468_s14 = smul.u32 48, %s552_s13  ;;  %s450_s15 = sshll.u32 %s552_s13, 3 }
   0xd   : > { %478 = vset.pattern.permute.xlu0 %v497_v0  ;;  %s199_s21 = scalar_lea.vmem %s549_s2, %s450_s15  ;;  %s448_s22 = sshll.u32 %s552_s13, 2 }
   0xe   : > { %s195_s18 = scalar_lea.vmem %s548_s1, %s468_s14  ;;  %v213_v11 = vld [vmem:[%s199_s21] sm:$0xff]  ;;  %s190_s25 = scalar_lea.vmem %s547_s0, %s448_s22 }
   0xf   : > { %v211_v1 = vld [vmem:[%s195_s18 + $0x20] sm:$0xff]  ;;  %v212_v2 = vld [vmem:[%s195_s18 + $0x28] sm:$0xff]  ;;  %216 = vperm.xlu0 %478, %v213_v11   ;;  %s467_s26 = sshll.u32 %s552_s13, 5 }
  0x10   : > { %v458_v3 = vcombine.high %v211_v1, %v211_v1  ;;  %v460_v4 = vcombine.high %v212_v2, %v212_v2  ;;  %v457_v5 = vcombine.low %v211_v1, %v211_v1  ;;  %v459_v6 = vcombine.low %v212_v2, %v212_v2  ;;  %v483_v7 = vld [vmem:[%s195_s18 + $0x4] ss:$16 sps:$4 sm:$0xff]   ;;  %v485_v8 = vld [vmem:[%s195_s18 + $0xc] ss:$16 sps:$4 sm:$0xff]   ;;  %v487_v12 = vld [vmem:[%s195_s18] ss:$16 sps:$4 sm:$0xff]   ;;  %s204_s29 = scalar_lea.vmem %s550_s3, %s467_s26 }
  0x11   : > { %v488_v13 = vld [vmem:[%s195_s18 + $0x8] ss:$16 sps:$4 sm:$0xff]   ;;  %v206_v14 = vld [vmem:[%s190_s25] sm:$0xf] }
  0x12   : > { %461 = vmatprep.subr.msk.bf16.mxu0 %vm253_vm0, %v458_v3  ;;  %463 = vmatprep.subr.msk.bf16.mxu1 %vm253_vm0, %v460_v4  ;;  %v255_v9 = vsel %vm253_vm0, %v457_v5, 0  ;;  %v261_v10 = vsel %vm253_vm0, %v459_v6, 0 }
  0x13   : > { %279 = vmatpush1.bf16.msra.mxu0 %v255_v9  ;;  %320 = vmatpush1.bf16.msra.mxu1 %v261_v10 }
  0x14   : > { %280 = vmatprep.subr.bf16.mxu0 %v483_v7  ;;  %321 = vmatprep.subr.bf16.mxu1 %v485_v8 }
  0x17   : > { %281 = vmatpush1.bf16.msra.mxu0 %v487_v12  ;;  %322 = vmatpush1.bf16.msra.mxu1 %v488_v13 }
  0x1a   : > { %462 = vmatmul.mubr.msk.bf16.vlgmr.msra.gmra.mxu0 %vm249_vm1, %v206_v14  ;;  %464 = vmatmul.mubr.msk.bf16.vlgmr.msra.gmra.mxu1 %vm249_vm1, %v206_v14 }
  0x8a   : > { %v217_v15 = vpop.permute.xlu0 %216 }
  0xda   : > { %v300_v16 = vpop.f32.mrf.mxu0  ;;  %v341_v17 = vpop.f32.mrf.mxu1 }
  0xdb   : > { %v301_v18 = vadd.f32 %v300_v16, %v217_v15  ;;  %v342_v19 = vadd.f32 %v341_v17, %v217_v15 }
  0xdc   : > { %v302_v20 = vpop.f32.mrf.mxu0  ;;  %v343_v21 = vpop.f32.mrf.mxu1 }
  0xdd   : > { %vm348_vm2 = vcmp.ge.f32.partialorder %v301_v18, 0.0  ;;  %v352_v22 = vmul.f32 0.2, %v301_v18  ;;  %vm350_vm3 = vcmp.ge.f32.partialorder %v342_v19, 0.0  ;;  %v354_v23 = vmul.f32 0.2, %v342_v19 }
  0xde   : > { %v303_v24 = vadd.f32 %v302_v20, %v217_v15  ;;  %v344_v25 = vadd.f32 %v343_v21, %v217_v15  ;;  %v304_v26 = vpop.f32.mrf.mxu0  ;;  %v345_v27 = vpop.f32.mrf.mxu1 }
  0xdf   : > { %v356_v28 = vsel %vm348_vm2, %v301_v18, %v352_v22  ;;  %v358_v29 = vsel %vm350_vm3, %v342_v19, %v354_v23 }
  0xe0   : > { %360 = vst [vmem:[%s204_s29] sm:$0xff] %v356_v28  ;;  %362 = vst [vmem:[%s204_s29 + $0x10] sm:$0xff] %v358_v29  ;;  %vm349_vm4 = vcmp.ge.f32.partialorder %v303_v24, 0.0  ;;  %v353_v30 = vmul.f32 0.2, %v303_v24  ;;  %vm351_vm5 = vcmp.ge.f32.partialorder %v344_v25, 0.0  ;;  %v305_v32 = vpop.f32.mrf.mxu0  ;;  %v346_v33 = vpop.f32.mrf.mxu1 }
  0xe1   : > { %v355_v31 = vmul.f32 0.2, %v344_v25 }
  0xe2   : > { %v357_v34 = vsel %vm349_vm4, %v303_v24, %v353_v30 }
  0xe3   : > { %v359_v35 = vsel %vm351_vm5, %v344_v25, %v355_v31  ;;  %361 = vst [vmem:[%s204_s29 + $0x8] sm:$0xff] %v357_v34 }
  0xe4   : > { %363 = vst [vmem:[%s204_s29 + $0x18] sm:$0xff] %v359_v35 }
  0xe5 PF: > { %s13_s12 = sadd.s32 1, %s495_s12  }
  0xe6   : > { %p10_p4 = scmp.ge.s32.totalorder %s13_s12, 4  }
  0xe8   :  { %12 = sbr.rel (!%p10_p4) target bundleno = 1 (0x1), region = 68 }

// kernel: cfnet_forward.106
= control target key start
LH: loop header
LB: loop body
LE: loop exit
PB: predicated region body
PF: predicated region fallthrough
CT: control target
= control target key end

     0   :  { %vm41_vm0 = vcmask 1044480   ;;  %vm42_vm1 = vcmask 1045504   ;;  %v117_v0 = vmov 0.0   ;;  %v118_v2 = vmov 65535   ;;  %s156_s1 = inlined_call_operand.vmem [shape: bf16[1,27,128], index: 1, kind: input, shape index: {}]   ;;  %s157_s2 = inlined_call_operand.vmem [shape: f32[1,8,1], index: 2, kind: input, shape index: {}]   ;;  %s158_s0 = inlined_call_operand.vmem [shape: bf16[1,8,27], index: 0, kind: input, shape index: {}]   ;;  %s159_s3 = inlined_call_operand.vmem [shape: f32[1,8,128], index: 3, kind: output, shape index: {}]  }
   0x1   :  { %102 = vmatprep.subr.bf16.mxu0 %v117_v0  ;;  %v115_v1 = vld [vmem:[%s156_s1 + $0x8] sm:$0x3f]   ;;  %v43_v3 = vsel %vm41_vm0, 4294967295, %v118_v2  ;;  %vm119_vm2 = vmmov 0   ;;  %v120_v6 = vmov 0   ;;  %v20_v7 = vld [vmem:[%s157_s2] sm:$0xff] }
   0x2   :  { %v44_v4 = vsel %vm42_vm1, %v43_v3, 0  ;;  %106 = vmatprep.mubr.msk.bf16.mxu0 %vm119_vm2, %v117_v0  ;;  %114 = vset.pattern.permute.xlu0 %v120_v6  ;;  %v116_v8 = vld [vmem:[%s156_s1] sm:$0xff]   ;;  %vm37_vm3 = vcmask 220160  }
   0x3   :  { %v46_v5 = vand.u32 %v115_v1, %v44_v4  ;;  %23 = vperm.xlu0 %114, %v20_v7   ;;  %v15_v9 = vld [vmem:[%s158_s0] sm:$0xf] }
   0x5   :  { %103 = vmatpush3.bf16.msra.mxu0 %v46_v5 }
   0x6   :  { %104 = vmatprep.subr.bf16.mxu0 %v117_v0 }
   0x9   :  { %105 = vmatpush3.bf16.msra.mxu0 %v116_v8 }
   0xc   :  { %107 = vmatmul.mubr.msk.bf16.vlgmr.msra.gmra.mxu0 %vm37_vm3, %v15_v9 }
  0x7e   :  { %v24_v10 = vpop.permute.xlu0 %23 }
  0xcc   :  { %v82_v11 = vpop.f32.mrf.mxu0 }
  0xcd   :  { %v83_v12 = vadd.f32 %v82_v11, %v24_v10 }
  0xce   :  { %v108_v13 = vpop.f32.mrf.mxu0 }
  0xcf   :  { %vm88_vm4 = vcmp.ge.f32.partialorder %v83_v12, 0.0  ;;  %v89_v14 = vmul.f32 0.2, %v83_v12 }
  0xd0   :  { %v85_v15 = vpop.f32.mrf.mxu0 }
  0xd1   :  { %v90_v16 = vsel %vm88_vm4, %v83_v12, %v89_v14 }
  0xd2   :  { %91 = vst [vmem:[%s159_s3] sm:$0xff] %v90_v16  ;;  %v109_v17 = vpop.f32.mrf.mxu0 }

// kernel: cfnet_forward.107
= control target key start
LH: loop header
LB: loop body
LE: loop exit
PB: predicated region body
PF: predicated region fallthrough
CT: control target
= control target key end

     0   :  { %vm62_vm0 = vcmask 1043456   ;;  %v149_v0 = vmov 0.0   ;;  %vm150_vm1 = vmmov 0   ;;  %v151_v3 = vmov 0   ;;  %s196_s1 = inlined_call_operand.vmem [shape: bf16[1,72,128], index: 1, kind: input, shape index: {}]   ;;  %s197_s2 = inlined_call_operand.vmem [shape: f32[1,8,1], index: 2, kind: input, shape index: {}]   ;;  %s198_s0 = inlined_call_operand.vmem [shape: bf16[1,8,72], index: 0, kind: input, shape index: {}]   ;;  %s199_s3 = inlined_call_operand.vmem [shape: f32[1,8,128], index: 3, kind: output, shape index: {}]  }
   0x1   :  { %126 = vmatprep.subr.bf16.mxu0 %v149_v0  ;;  %v144_v1 = vld [vmem:[%s196_s1 + $0x20] ss:$0 sps:$4 sm:$0xff]   ;;  %136 = vmatprep.mubr.msk.bf16.mxu0 %vm150_vm1, %v149_v0  ;;  %v145_v4 = vld [vmem:[%s196_s1 + $0x18] sm:$0xff]   ;;  %v146_v6 = vld [vmem:[%s196_s1 + $0x10] sm:$0xff]   ;;  %vm58_vm2 = vcmask 588800  }
   0x2   :  { %v64_v2 = vsel %vm62_vm0, %v144_v1, 0  ;;  %143 = vset.pattern.permute.xlu0 %v151_v3  ;;  %v25_v5 = vld [vmem:[%s197_s2] sm:$0xff]  ;;  %v147_v7 = vld [vmem:[%s196_s1 + $0x8] sm:$0xff]  }
   0x3   :  { %127 = vmatpush3.bf16.msra.mxu0 %v64_v2  ;;  %28 = vperm.xlu0 %143, %v25_v5   ;;  %v148_v8 = vld [vmem:[%s196_s1] sm:$0xff]  }
   0x4   :  { %128 = vmatprep.subr.bf16.mxu0 %v149_v0  ;;  %v15_v9 = vld [vmem:[%s198_s0] sm:$0xf] }
   0x7   :  { %129 = vmatpush3.bf16.msra.mxu0 %v145_v4 }
   0x8   :  { %130 = vmatprep.subr.bf16.mxu0 %v149_v0 }
   0xb   :  { %131 = vmatpush3.bf16.msra.mxu0 %v146_v6 }
   0xc   :  { %132 = vmatprep.subr.bf16.mxu0 %v149_v0 }
   0xf   :  { %133 = vmatpush3.bf16.msra.mxu0 %v147_v7 }
  0x10   :  { %134 = vmatprep.subr.bf16.mxu0 %v149_v0 }
  0x13   :  { %135 = vmatpush3.bf16.msra.mxu0 %v148_v8 }
  0x16   :  { %137 = vmatmul.mubr.msk.bf16.vlgmr.msra.gmra.mxu0 %vm58_vm2, %v15_v9 }
  0x7e   :  { %v29_v10 = vpop.permute.xlu0 %28 }
  0xd6   :  { %v100_v11 = vpop.f32.mrf.mxu0 }
  0xd7   :  { %v101_v12 = vadd.f32 %v100_v11, %v29_v10 }
  0xd8   :  { %v138_v13 = vpop.f32.mrf.mxu0 }
  0xd9   :  { %vm106_vm3 = vcmp.ge.f32.partialorder %v101_v12, 0.0  ;;  %v107_v14 = vmul.f32 0.2, %v101_v12 }
  0xda   :  { %v103_v15 = vpop.f32.mrf.mxu0 }
  0xdb   :  { %v108_v16 = vsel %vm106_vm3, %v101_v12, %v107_v14 }
  0xdc   :  { %109 = vst [vmem:[%s199_s3] sm:$0xff] %v108_v16  ;;  %v139_v17 = vpop.f32.mrf.mxu0 }

// kernel: cfnet_forward.109
= control target key start
LH: loop header
LB: loop body
LE: loop exit
PB: predicated region body
PF: predicated region fallthrough
CT: control target
= control target key end

     0   :  { %s546_s12 = smov 0   ;;  %s595_s0 = inlined_call_operand.vmem [shape: bf16[2,8,216], index: 0, kind: input, shape index: {}]   ;;  %s596_s1 = inlined_call_operand.vmem [shape: bf16[2,216,128], index: 1, kind: input, shape index: {}]   ;;  %s597_s2 = inlined_call_operand.vmem [shape: f32[2,8,1], index: 2, kind: input, shape index: {}]   ;;  %s598_s3 = inlined_call_operand.vmem [shape: f32[2,8,128], index: 3, kind: output, shape index: {}]  }
   0x1 LB: > { %s552_s13 = sadd.s32 4294967295, %s523_s12   ;;  %p464_p0 = scmp.ge.s32.totalorder %s523_s12, 1  ;;  %s523_s12 = sphi %s546_s12, %s13_s12  }
   0x2   : > { %p156_p1 = scmp.lt.s32.totalorder %s523_s12, 3 }
   0x4   : > { %p157_p2 = pnand %p464_p0, %p156_p1 }
   0x5   : > { %p188_p3 = scmp.lt.s32.totalorder (!%p157_p2), %s552_s13, 1  ;;  %p376_p4 = scmp.eq.s32.totalorder (!%p157_p2), %s552_s13, 1 }
   0x6   : > { %160 = sbr.rel (%p157_p2) target bundleno = 271 (0x10f), region = 32 }
   0xb   : > { %v525_v0 = vmov 0   ;;  %s189_s14 = scalar_select %p188_p3, %s552_s13, 1  ;;  %vm328_vm0 = vcmask 719872   ;;  %vm332_vm1 = vcmask 1043456  }
   0xc   : > { %336 = vmatprep.subr.bf16.mxu0 %v525_v0  ;;  %500 = vset.pattern.permute.xlu0 %v525_v0  ;;  %s377_s26 = scalar_select %p376_p4, 0.2, 0.1 }
   0xd   : > { %s490_s15 = smul.u32 108, %s189_s14  ;;  %s558_s16 = sshll.u32 %s189_s14, 3 }
   0xe   : > { %s192_s19 = scalar_lea.vmem %s595_s0, %s558_s16  ;;  %s201_s22 = scalar_lea.vmem %s597_s2, %s558_s16  ;;  %v379_v22 = vstv %s377_s26 }
   0xf   : > { %s571_s25 = scalar_lea.vmem %s596_s1, %s490_s15  ;;  %v207_v1 = vld [vmem:[%s192_s19] sm:$0xff]  ;;  %s205_s29 = scalar_lea.vmem %s598_s3, %s558_s16 }
  0x10   : > { %v235_v2 = vld [vmem:[%s201_s22] sm:$0xff]  ;;  %v501_v3 = vld [vmem:[%s571_s25 + $0x38] sm:$0xff]   ;;  %v471_v4 = vcombine.high %v207_v1, %v207_v1  ;;  %v502_v5 = vld [vmem:[%s571_s25 + $0x30] sm:$0xff]   ;;  %v470_v19 = vcombine.low %v207_v1, %v207_v1 }
  0x11   : > { %238 = vperm.xlu0 %500, %v235_v2   ;;  %337 = vmatpush1.bf16.msra.mxu0 %v501_v3  ;;  %v503_v6 = vld [vmem:[%s571_s25 + $0x28] sm:$0xff]   ;;  %v504_v7 = vld [vmem:[%s571_s25 + $0x20] sm:$0xff]   ;;  %v505_v8 = vld [vmem:[%s571_s25 + $0x18] sm:$0xff]  }
  0x12   : > { %486 = vmatprep.mubr.msk.bf16.mxu0 %vm328_vm0, %v471_v4  ;;  %338 = vmatprep.subr.bf16.mxu0 %v525_v0  ;;  %v506_v9 = vld [vmem:[%s571_s25 + $0x10] sm:$0xff]   ;;  %v507_v10 = vld [vmem:[%s571_s25 + $0x8] sm:$0xff]   ;;  %v508_v11 = vld [vmem:[%s571_s25] sm:$0xff]  }
  0x13   : > { %v509_v12 = vld [vmem:[%s571_s25 + $0x68] ss:$0 sps:$4 sm:$0xff]   ;;  %v510_v14 = vld [vmem:[%s571_s25 + $0x60] sm:$0xff]   ;;  %v511_v15 = vld [vmem:[%s571_s25 + $0x58] sm:$0xff]  }
  0x14   : > { %v334_v13 = vsel %vm332_vm1, %v509_v12, 0  ;;  %v512_v16 = vld [vmem:[%s571_s25 + $0x50] sm:$0xff]   ;;  %v513_v17 = vld [vmem:[%s571_s25 + $0x48] sm:$0xff]   ;;  %v514_v18 = vld [vmem:[%s571_s25 + $0x40] sm:$0xff]  }
  0x15   : > { %339 = vmatpush1.bf16.msra.mxu0 %v502_v5 }
  0x16   : > { %340 = vmatprep.subr.bf16.mxu0 %v525_v0 }
  0x19   : > { %341 = vmatpush1.bf16.msra.mxu0 %v503_v6 }
  0x1a   : > { %342 = vmatprep.subr.bf16.mxu0 %v525_v0 }
  0x1d   : > { %343 = vmatpush1.bf16.msra.mxu0 %v504_v7 }
  0x1e   : > { %344 = vmatprep.subr.bf16.mxu0 %v525_v0 }
  0x21   : > { %345 = vmatpush1.bf16.msra.mxu0 %v505_v8 }
  0x22   : > { %346 = vmatprep.subr.bf16.mxu0 %v525_v0 }
  0x25   : > { %347 = vmatpush1.bf16.msra.mxu0 %v506_v9 }
  0x26   : > { %348 = vmatprep.subr.bf16.mxu0 %v525_v0 }
  0x29   : > { %349 = vmatpush1.bf16.msra.mxu0 %v507_v10 }
  0x2a   : > { %350 = vmatprep.subr.bf16.mxu0 %v525_v0 }
  0x2d   : > { %351 = vmatpush1.bf16.msra.mxu0 %v508_v11 }
  0x2e   : > { %356 = vmatprep.subr.bf16.mxu0 %v525_v0 }
  0x31   : > { %357 = vmatpush2.bf16.msra.mxu0 %v334_v13 }
  0x32   : > { %358 = vmatprep.subr.bf16.mxu0 %v525_v0 }
  0x35   : > { %359 = vmatpush2.bf16.msra.mxu0 %v510_v14 }
  0x36   : > { %360 = vmatprep.subr.bf16.mxu0 %v525_v0 }
  0x39   : > { %361 = vmatpush2.bf16.msra.mxu0 %v511_v15 }
  0x3a   : > { %362 = vmatprep.subr.bf16.mxu0 %v525_v0 }
  0x3d   : > { %363 = vmatpush2.bf16.msra.mxu0 %v512_v16 }
  0x3e   : > { %364 = vmatprep.subr.bf16.mxu0 %v525_v0 }
  0x41   : > { %365 = vmatpush2.bf16.msra.mxu0 %v513_v17 }
  0x42   : > { %366 = vmatprep.subr.bf16.mxu0 %v525_v0 }
  0x45   : > { %367 = vmatpush2.bf16.msra.mxu0 %v514_v18 }
  0x48   : > { %369 = vmatmul.mubr.bf16.vlgmr.msra.gmra.mxu0 %v470_v19 }
  0x8c   : > { %v239_v20 = vpop.permute.xlu0 %238 }
 0x108   : > { %v370_v21 = vpop.f32.mrf.mxu0 }
 0x109   : > { %v371_v23 = vadd.f32 %v370_v21, %v239_v20 }
 0x10a   : > { %v372_v24 = vpop.f32.mrf.mxu0 }
 0x10b   : > { %vm378_vm2 = vcmp.ge.f32.partialorder %v371_v23, 0.0  ;;  %v380_v25 = vmul.f32 %v379_v22, %v371_v23 }
 0x10c   : > { %v373_v26 = vpop.f32.mrf.mxu0 }
 0x10d   : > { %v381_v27 = vsel %vm378_vm2, %v371_v23, %v380_v25 }
 0x10e   : > { %382 = vst [vmem:[%s205_s29] sm:$0xff] %v381_v27  ;;  %v374_v28 = vpop.f32.mrf.mxu0 }
 0x10f PF: > { %s13_s12 = sadd.s32 1, %s523_s12  }
 0x110   : > { %p10_p5 = scmp.ge.s32.totalorder %s13_s12, 4  }
 0x112   :  { %12 = sbr.rel (!%p10_p5) target bundleno = 1 (0x1), region = 68 }

// kernel: cfnet_forward.110
= control target key start
LH: loop header
LB: loop body
LE: loop exit
PB: predicated region body
PF: predicated region fallthrough
CT: control target
= control target key end

     0   :  { %s465_s12 = smov 0   ;;  %s502_s0 = inlined_call_operand.vmem [shape: bf16[2,8,72], index: 0, kind: input, shape index: {}]   ;;  %s503_s1 = inlined_call_operand.vmem [shape: bf16[2,72,128], index: 1, kind: input, shape index: {}]   ;;  %s504_s2 = inlined_call_operand.vmem [shape: f32[2,8,1], index: 2, kind: input, shape index: {}]   ;;  %s505_s3 = inlined_call_operand.vmem [shape: f32[2,8,128], index: 3, kind: output, shape index: {}]  }
   0x1 LB: > { %s471_s13 = sadd.s32 4294967295, %s440_s12   ;;  %p383_p0 = scmp.ge.s32.totalorder %s440_s12, 1  ;;  %s440_s12 = sphi %s465_s12, %s13_s12  }
   0x2   : > { %p155_p1 = scmp.lt.s32.totalorder %s440_s12, 3 }
   0x4   : > { %p156_p2 = pnand %p383_p0, %p155_p1 }
   0x5   : > { %p186_p3 = scmp.lt.s32.totalorder (!%p156_p2), %s471_s13, 1  ;;  %p295_p4 = scmp.eq.s32.totalorder (!%p156_p2), %s471_s13, 1 }
   0x6   : > { %159 = sbr.rel (%p156_p2) target bundleno = 236 (0xec), region = 32 }
   0xb   : > { %v442_v0 = vmov 0.0   ;;  %vm443_vm0 = vmmov 0   ;;  %s477_s14 = scalar_select %p186_p3, %s471_s13, 1  ;;  %v444_v1 = vmov 0   ;;  %vm251_vm1 = vcmask 1043456  }
   0xc   : > { %402 = vmatprep.subr.bf16.mxu0 %v442_v0  ;;  %412 = vmatprep.mubr.msk.bf16.mxu0 %vm443_vm0, %v442_v0  ;;  %vm247_vm2 = vcmask 588800   ;;  %s296_s27 = scalar_select %p295_p4, 0.2, 0.1 }
   0xd   : > { %428 = vset.pattern.permute.xlu0 %v444_v1  ;;  %s416_s15 = smul.u32 36, %s477_s14  ;;  %s386_s16 = sshll.u32 %s477_s14, 3 }
   0xe   : > { %s198_s22 = scalar_lea.vmem %s504_s2, %s386_s16  ;;  %s384_s23 = sshll.u32 %s477_s14, 2  ;;  %v298_v12 = vstv %s296_s27 }
   0xf   : > { %s194_s19 = scalar_lea.vmem %s503_s1, %s416_s15  ;;  %v214_v5 = vld [vmem:[%s198_s22] sm:$0xff]  ;;  %s189_s26 = scalar_lea.vmem %s502_s0, %s384_s23 }
  0x10   : > { %v429_v2 = vld [vmem:[%s194_s19 + $0x20] ss:$0 sps:$4 sm:$0xff]   ;;  %v430_v4 = vld [vmem:[%s194_s19 + $0x18] sm:$0xff]   ;;  %217 = vperm.xlu0 %428, %v214_v5   ;;  %v431_v6 = vld [vmem:[%s194_s19 + $0x10] sm:$0xff]   ;;  %s202_s30 = scalar_lea.vmem %s505_s3, %s386_s16 }
  0x11   : > { %v253_v3 = vsel %vm251_vm1, %v429_v2, 0  ;;  %v432_v7 = vld [vmem:[%s194_s19 + $0x8] sm:$0xff]   ;;  %v433_v8 = vld [vmem:[%s194_s19] sm:$0xff]  }
  0x12   : > { %403 = vmatpush3.bf16.msra.mxu0 %v253_v3  ;;  %v204_v9 = vld [vmem:[%s189_s26] sm:$0xf] }
  0x13   : > { %404 = vmatprep.subr.bf16.mxu0 %v442_v0 }
  0x16   : > { %405 = vmatpush3.bf16.msra.mxu0 %v430_v4 }
  0x17   : > { %406 = vmatprep.subr.bf16.mxu0 %v442_v0 }
  0x1a   : > { %407 = vmatpush3.bf16.msra.mxu0 %v431_v6 }
  0x1b   : > { %408 = vmatprep.subr.bf16.mxu0 %v442_v0 }
  0x1e   : > { %409 = vmatpush3.bf16.msra.mxu0 %v432_v7 }
  0x1f   : > { %410 = vmatprep.subr.bf16.mxu0 %v442_v0 }
  0x22   : > { %411 = vmatpush3.bf16.msra.mxu0 %v433_v8 }
  0x25   : > { %413 = vmatmul.mubr.msk.bf16.vlgmr.msra.gmra.mxu0 %vm247_vm2, %v204_v9 }
  0x8b   : > { %v218_v10 = vpop.permute.xlu0 %217 }
  0xe5   : > { %v289_v11 = vpop.f32.mrf.mxu0 }
  0xe6   : > { %v290_v13 = vadd.f32 %v289_v11, %v218_v10 }
  0xe7   : > { %v414_v14 = vpop.f32.mrf.mxu0 }
  0xe8   : > { %vm297_vm3 = vcmp.ge.f32.partialorder %v290_v13, 0.0  ;;  %v299_v15 = vmul.f32 %v298_v12, %v290_v13 }
  0xe9   : > { %v292_v16 = vpop.f32.mrf.mxu0 }
  0xea   : > { %v300_v17 = vsel %vm297_vm3, %v290_v13, %v299_v15 }
  0xeb   : > { %301 = vst [vmem:[%s202_s30] sm:$0xff] %v300_v17  ;;  %v415_v18 = vpop.f32.mrf.mxu0 }
  0xec PF: > { %s13_s12 = sadd.s32 1, %s440_s12  }
  0xed   : > { %p10_p5 = scmp.ge.s32.totalorder %s13_s12, 4  }
  0xef   :  { %12 = sbr.rel (!%p10_p5) target bundleno = 1 (0x1), region = 68 }

// kernel: cfnet_forward.111
= control target key start
LH: loop header
LB: loop body
LE: loop exit
PB: predicated region body
PF: predicated region fallthrough
CT: control target
= control target key end

     0   :  { %vm294_vm0 = vcmask 1043456   ;;  %vm254_vm1 = vcmask 64512   ;;  %v577_v0 = vmov 0.0   ;;  %vm578_vm2 = vmmov 0   ;;  %s857_s1 = inlined_call_operand.vmem [shape: bf16[1,8,128], index: 1, kind: input, shape index: {}]   ;;  %s858_s0 = inlined_call_operand.vmem [shape: bf16[1,196,8], index: 0, kind: input, shape index: {}]   ;;  %s859_s2 = inlined_call_operand.vmem [shape: f32[1,196,1], index: 2, kind: input, shape index: {}]   ;;  %s860_s3 = inlined_call_operand.vmem [shape: f32[1,196,128], index: 3, kind: output, shape index: {}]  }
   0x1   :  { %503 = vmatprep.subr.bf16.mxu0 %v577_v0  ;;  %557 = vmatprep.subr.bf16.mxu1 %v577_v0  ;;  %v40_v1 = vld [vmem:[%s857_s1] sm:$0xf]  ;;  %v565_v4 = vld [vmem:[%s858_s0 + $0x38] sm:$0xff]   ;;  %v579_v5 = vmov 0   ;;  %v566_v6 = vld [vmem:[%s858_s0 + $0x8] sm:$0xff]  }
   0x2   :  { %v296_v2 = vsel %vm294_vm0, %v40_v1, 0  ;;  %505 = vmatprep.mubr.msk.bf16.mxu0 %vm578_vm2, %v577_v0  ;;  %533 = vmatprep.mubr.msk.bf16.mxu1 %vm578_vm2, %v577_v0  ;;  %v564_v3 = vld [vmem:[%s858_s0] sm:$0xff]   ;;  %v43_v9 = vld [vmem:[%s859_s2 + $0x10] sm:$0xff]  ;;  %v42_v10 = vld [vmem:[%s859_s2 + $0x8] sm:$0xff] }
   0x3   :  { %504 = vmatpush3.bf16.msra.mxu0 %v296_v2  ;;  %558 = vmatpush3.bf16.msra.mxu1 %v296_v2  ;;  %v41_v7 = vld [vmem:[%s859_s2] sm:$0xff]  ;;  %v44_v11 = vld [vmem:[%s859_s2 + $0x18] sm:$0xff]  ;;  %v568_v13 = vld [vmem:[%s858_s0 + $0x10] sm:$0xff]  }
   0x4   :  { %562 = vset.pattern.permute.xlu0 %v579_v5  ;;  %563 = vset.pattern.permute.xlu1 %v579_v5  ;;  %v567_v8 = vld [vmem:[%s858_s0 + $0x40] sm:$0xff]   ;;  %v569_v14 = vld [vmem:[%s858_s0 + $0x48] sm:$0xff]   ;;  %v47_v16 = vld [vmem:[%s859_s2 + $0x30] sm:$0xff] }
   0x5   :  { %68 = vperm.xlu0 %562, %v41_v7   ;;  %78 = vperm.xlu1 %563, %v43_v9   ;;  %v45_v12 = vld [vmem:[%s859_s2 + $0x20] sm:$0xff]  ;;  %v46_v15 = vld [vmem:[%s859_s2 + $0x28] sm:$0xff]  ;;  %v48_v17 = vld [vmem:[%s859_s2 + $0x38] sm:$0xff] }
   0x6   :  { %506 = vmatmul.mubr.msk.bf16.vlgmr.msra.gmra.mxu0 %vm254_vm1, %v564_v3  ;;  %534 = vmatmul.mubr.msk.bf16.vlgmr.msra.gmra.mxu1 %vm254_vm1, %v565_v4  ;;  %v49_v18 = vld [vmem:[%s859_s2 + $0x40] sm:$0xff]  ;;  %v570_v19 = vld [vmem:[%s858_s0 + $0x18] sm:$0xff]   ;;  %v571_v20 = vld [vmem:[%s858_s0 + $0x50] sm:$0xff]  }
   0x7   :  { %509 = vmatprep.mubr.msk.bf16.mxu0 %vm578_vm2, %v577_v0  ;;  %537 = vmatprep.mubr.msk.bf16.mxu1 %vm578_vm2, %v577_v0  ;;  %v50_v21 = vld [vmem:[%s859_s2 + $0x48] sm:$0xff]  ;;  %v51_v22 = vld [vmem:[%s859_s2 + $0x50] sm:$0xff]  ;;  %v52_v23 = vld [vmem:[%s859_s2 + $0x58] sm:$0xff] }
   0x8   :  { %v53_v24 = vld [vmem:[%s859_s2 + $0x60] sm:$0xff]  ;;  %v573_v26 = vld [vmem:[%s858_s0 + $0x58] sm:$0xff]   ;;  %v54_v27 = vld [vmem:[%s859_s2 + $0x68] sm:$0xff] }
   0x9   :  { %73 = vperm.xlu0 %562, %v42_v10   ;;  %83 = vperm.xlu1 %563, %v44_v11   ;;  %v572_v25 = vld [vmem:[%s858_s0 + $0x20] sm:$0xff]   ;;  %v55_v28 = vld [vmem:[%s859_s2 + $0x70] sm:$0xff]  ;;  %v56_v29 = vld [vmem:[%s859_s2 + $0x78] sm:$0xff] }
   0xa   :  { %v57_v30 = vld [vmem:[%s859_s2 + $0x80] sm:$0xff]  ;;  %v574_v31 = vld [vmem:[%s858_s0 + $0x28] sm:$0xff]   ;;  %v59_v34 = vld [vmem:[%s859_s2 + $0x90] sm:$0xff] }
   0xb   :  { %v575_v32 = vld [vmem:[%s858_s0 + $0x60] ss:$0 sps:$4 sm:$0x33]   ;;  %v58_v33 = vld [vmem:[%s859_s2 + $0x88] sm:$0xff]  ;;  %v60_v35 = vld [vmem:[%s859_s2 + $0x98] sm:$0xff] }
   0xc   :  { %v61_v36 = vld [vmem:[%s859_s2 + $0xa0] sm:$0xff]  ;;  %v576_v37 = vld [vmem:[%s858_s0 + $0x30] sm:$0xff]   ;;  %v62_v38 = vld [vmem:[%s859_s2 + $0xa8] sm:$0xff] }
   0xd   :  { %88 = vperm.xlu0 %562, %v45_v12   ;;  %93 = vperm.xlu1 %563, %v46_v15   ;;  %v63_v39 = vld [vmem:[%s859_s2 + $0xb0] sm:$0xff]  ;;  %v64_v40 = vld [vmem:[%s859_s2 + $0xb8] sm:$0xff]  ;;  %v65_v41 = vld [vmem:[%s859_s2 + $0xc0] sm:$0xf] }
   0xe   :  { %510 = vmatmul.mubr.msk.bf16.gmra.mxu0 %vm254_vm1, %v566_v6  ;;  %538 = vmatmul.mubr.msk.bf16.gmra.mxu1 %vm254_vm1, %v567_v8 }
   0xf   :  { %513 = vmatprep.mubr.msk.bf16.mxu0 %vm578_vm2, %v577_v0  ;;  %541 = vmatprep.mubr.msk.bf16.mxu1 %vm578_vm2, %v577_v0 }
  0x11   :  { %98 = vperm.xlu0 %562, %v47_v16   ;;  %103 = vperm.xlu1 %563, %v48_v17  }
  0x15   :  { %108 = vperm.xlu0 %562, %v49_v18   ;;  %113 = vperm.xlu1 %563, %v50_v21  }
  0x16   :  { %514 = vmatmul.mubr.msk.bf16.gmra.mxu0 %vm254_vm1, %v568_v13  ;;  %542 = vmatmul.mubr.msk.bf16.gmra.mxu1 %vm254_vm1, %v569_v14 }
  0x17   :  { %517 = vmatprep.mubr.msk.bf16.mxu0 %vm578_vm2, %v577_v0  ;;  %545 = vmatprep.mubr.msk.bf16.mxu1 %vm578_vm2, %v577_v0 }
  0x19   :  { %118 = vperm.xlu0 %562, %v51_v22   ;;  %123 = vperm.xlu1 %563, %v52_v23  }
  0x1d   :  { %128 = vperm.xlu0 %562, %v53_v24   ;;  %133 = vperm.xlu1 %563, %v54_v27  }
  0x1e   :  { %518 = vmatmul.mubr.msk.bf16.gmra.mxu0 %vm254_vm1, %v570_v19  ;;  %546 = vmatmul.mubr.msk.bf16.gmra.mxu1 %vm254_vm1, %v571_v20 }
  0x1f   :  { %521 = vmatprep.mubr.msk.bf16.mxu0 %vm578_vm2, %v577_v0  ;;  %549 = vmatprep.mubr.msk.bf16.mxu1 %vm578_vm2, %v577_v0 }
  0x21   :  { %138 = vperm.xlu0 %562, %v55_v28   ;;  %143 = vperm.xlu1 %563, %v56_v29  }
  0x25   :  { %148 = vperm.xlu0 %562, %v57_v30   ;;  %153 = vperm.xlu1 %563, %v58_v33  }
  0x26   :  { %522 = vmatmul.mubr.msk.bf16.gmra.mxu0 %vm254_vm1, %v572_v25  ;;  %550 = vmatmul.mubr.msk.bf16.gmra.mxu1 %vm254_vm1, %v573_v26 }
  0x27   :  { %525 = vmatprep.mubr.msk.bf16.mxu0 %vm578_vm2, %v577_v0  ;;  %553 = vmatprep.mubr.msk.bf16.mxu1 %vm578_vm2, %v577_v0 }
  0x29   :  { %158 = vperm.xlu0 %562, %v59_v34   ;;  %163 = vperm.xlu1 %563, %v60_v35  }
  0x2d   :  { %168 = vperm.xlu0 %562, %v61_v36   ;;  %173 = vperm.xlu1 %563, %v62_v38  }
  0x2e   :  { %526 = vmatmul.mubr.msk.bf16.gmra.mxu0 %vm254_vm1, %v574_v31  ;;  %554 = vmatmul.mubr.msk.bf16.gmra.mxu1 %vm254_vm1, %v575_v32 }
  0x2f   :  { %529 = vmatprep.mubr.msk.bf16.mxu0 %vm578_vm2, %v577_v0 }
  0x31   :  { %178 = vperm.xlu0 %562, %v63_v39   ;;  %183 = vperm.xlu1 %563, %v64_v40  }
  0x35   :  { %188 = vperm.xlu0 %562, %v65_v41  }
  0x36   :  { %530 = vmatmul.mubr.msk.bf16.gmra.mxu0 %vm254_vm1, %v576_v37 }
  0x80   :  { %v69_v42 = vpop.permute.xlu0 %68  ;;  %v79_v43 = vpop.permute.xlu1 %78 }
  0x84   :  { %v74_v44 = vpop.permute.xlu0 %73  ;;  %v84_v45 = vpop.permute.xlu1 %83 }
  0x88   :  { %v89_v46 = vpop.permute.xlu0 %88  ;;  %v94_v47 = vpop.permute.xlu1 %93 }
  0x8c   :  { %v758_v48 = vpop.permute.xlu0 %98  ;;  %v760_v49 = vpop.permute.xlu1 %103 }
  0x90   :  { %v762_v50 = vpop.permute.xlu0 %108  ;;  %v764_v51 = vpop.permute.xlu1 %113 }
  0x94   :  { %v766_v52 = vpop.permute.xlu0 %118  ;;  %v768_v53 = vpop.permute.xlu1 %123 }
  0x98   :  { %v770_v54 = vpop.permute.xlu0 %128  ;;  %v772_v55 = vpop.permute.xlu1 %133 }
  0x9c   :  { %v139_v56 = vpop.permute.xlu0 %138  ;;  %v144_v63 = vpop.permute.xlu1 %143 }
  0xa0   :  { %v149_v6 = vpop.permute.xlu0 %148  ;;  %v154_v13 = vpop.permute.xlu1 %153 }
  0xa4   :  { %v159_v20 = vpop.permute.xlu0 %158  ;;  %v164_v27 = vpop.permute.xlu1 %163 }
  0xa8   :  { %v169_v34 = vpop.permute.xlu0 %168  ;;  %v174_v41 = vpop.permute.xlu1 %173 }
  0xc6   :  { %v332_v57 = vpop.f32.mrf.mxu0  ;;  %v388_v58 = vpop.f32.mrf.mxu1 }
  0xc7   :  { %v333_v59 = vadd.f32 %v332_v57, %v69_v42  ;;  %v389_v60 = vadd.f32 %v388_v58, %v139_v56 }
  0xc8   :  { %v507_v61 = vpop.f32.mrf.mxu0  ;;  %v535_v62 = vpop.f32.mrf.mxu1 }
  0xc9   :  { %434 = vst [vmem:[%s860_s3] sm:$0xff] %v333_v59  ;;  %448 = vst [vmem:[%s860_s3 + $0x70] sm:$0xff] %v389_v60 }
  0xca   :  { %v335_v0 = vpop.f32.mrf.mxu0  ;;  %v391_v1 = vpop.f32.mrf.mxu1 }
  0xcb   :  { %v336_v2 = vadd.f32 %v335_v0, %v74_v44  ;;  %v392_v3 = vadd.f32 %v391_v1, %v144_v63 }
  0xcc   :  { %v508_v4 = vpop.f32.mrf.mxu0  ;;  %v536_v5 = vpop.f32.mrf.mxu1 }
  0xcd   :  { %435 = vst [vmem:[%s860_s3 + $0x8] sm:$0xff] %v336_v2  ;;  %449 = vst [vmem:[%s860_s3 + $0x78] sm:$0xff] %v392_v3 }
  0xce   :  { %v340_v7 = vpop.f32.mrf.mxu0  ;;  %v396_v8 = vpop.f32.mrf.mxu1 }
  0xcf   :  { %v341_v9 = vadd.f32 %v340_v7, %v79_v43  ;;  %v397_v10 = vadd.f32 %v396_v8, %v149_v6 }
  0xd0   :  { %v511_v11 = vpop.f32.mrf.mxu0  ;;  %v539_v12 = vpop.f32.mrf.mxu1 }
  0xd1   :  { %436 = vst [vmem:[%s860_s3 + $0x10] sm:$0xff] %v341_v9  ;;  %450 = vst [vmem:[%s860_s3 + $0x80] sm:$0xff] %v397_v10 }
  0xd2   :  { %v343_v14 = vpop.f32.mrf.mxu0  ;;  %v399_v15 = vpop.f32.mrf.mxu1 }
  0xd3   :  { %v344_v16 = vadd.f32 %v343_v14, %v84_v45  ;;  %v400_v17 = vadd.f32 %v399_v15, %v154_v13 }
  0xd4   :  { %v512_v18 = vpop.f32.mrf.mxu0  ;;  %v540_v19 = vpop.f32.mrf.mxu1 }
  0xd5   :  { %437 = vst [vmem:[%s860_s3 + $0x18] sm:$0xff] %v344_v16  ;;  %451 = vst [vmem:[%s860_s3 + $0x88] sm:$0xff] %v400_v17 }
  0xd6   :  { %v348_v21 = vpop.f32.mrf.mxu0  ;;  %v404_v22 = vpop.f32.mrf.mxu1 }
  0xd7   :  { %v349_v23 = vadd.f32 %v348_v21, %v89_v46  ;;  %v405_v24 = vadd.f32 %v404_v22, %v159_v20 }
  0xd8   :  { %v515_v25 = vpop.f32.mrf.mxu0  ;;  %v543_v26 = vpop.f32.mrf.mxu1 }
  0xd9   :  { %438 = vst [vmem:[%s860_s3 + $0x20] sm:$0xff] %v349_v23  ;;  %452 = vst [vmem:[%s860_s3 + $0x90] sm:$0xff] %v405_v24 }
  0xda   :  { %v351_v28 = vpop.f32.mrf.mxu0  ;;  %v407_v29 = vpop.f32.mrf.mxu1 }
  0xdb   :  { %v352_v30 = vadd.f32 %v351_v28, %v94_v47  ;;  %v408_v31 = vadd.f32 %v407_v29, %v164_v27 }
  0xdc   :  { %v516_v32 = vpop.f32.mrf.mxu0  ;;  %v544_v33 = vpop.f32.mrf.mxu1 }
  0xdd   :  { %439 = vst [vmem:[%s860_s3 + $0x28] sm:$0xff] %v352_v30  ;;  %453 = vst [vmem:[%s860_s3 + $0x98] sm:$0xff] %v408_v31 }
  0xde   :  { %v356_v35 = vpop.f32.mrf.mxu0  ;;  %v412_v36 = vpop.f32.mrf.mxu1 }
  0xdf   :  { %v357_v37 = vadd.f32 %v356_v35, %v758_v48  ;;  %v413_v38 = vadd.f32 %v412_v36, %v169_v34  ;;  %v179_v48 = vpop.permute.xlu0 %178 }
  0xe0   :  { %v519_v39 = vpop.f32.mrf.mxu0  ;;  %v547_v40 = vpop.f32.mrf.mxu1 }
  0xe1   :  { %440 = vst [vmem:[%s860_s3 + $0x30] sm:$0xff] %v357_v37  ;;  %454 = vst [vmem:[%s860_s3 + $0xa0] sm:$0xff] %v413_v38 }
  0xe2   :  { %v359_v42 = vpop.f32.mrf.mxu0  ;;  %v415_v43 = vpop.f32.mrf.mxu1 }
  0xe3   :  { %v360_v44 = vadd.f32 %v359_v42, %v760_v49  ;;  %v416_v45 = vadd.f32 %v415_v43, %v174_v41  ;;  %v184_v49 = vpop.permute.xlu1 %183 }
  0xe4   :  { %v520_v46 = vpop.f32.mrf.mxu0  ;;  %v548_v47 = vpop.f32.mrf.mxu1 }
  0xe5   :  { %441 = vst [vmem:[%s860_s3 + $0x38] sm:$0xff] %v360_v44  ;;  %455 = vst [vmem:[%s860_s3 + $0xa8] sm:$0xff] %v416_v45 }
  0xe6   :  { %v364_v56 = vpop.f32.mrf.mxu0  ;;  %v420_v57 = vpop.f32.mrf.mxu1 }
  0xe7   :  { %v365_v58 = vadd.f32 %v364_v56, %v762_v50  ;;  %v421_v59 = vadd.f32 %v420_v57, %v179_v48  ;;  %v189_v50 = vpop.permute.xlu0 %188 }
  0xe8   :  { %v523_v60 = vpop.f32.mrf.mxu0  ;;  %v551_v61 = vpop.f32.mrf.mxu1 }
  0xe9   :  { %442 = vst [vmem:[%s860_s3 + $0x40] sm:$0xff] %v365_v58  ;;  %456 = vst [vmem:[%s860_s3 + $0xb0] sm:$0xff] %v421_v59 }
  0xea   :  { %v367_v62 = vpop.f32.mrf.mxu0  ;;  %v423_v63 = vpop.f32.mrf.mxu1 }
  0xeb   :  { %v368_v0 = vadd.f32 %v367_v62, %v764_v51  ;;  %v424_v1 = vadd.f32 %v423_v63, %v184_v49 }
  0xec   :  { %v524_v2 = vpop.f32.mrf.mxu0  ;;  %v552_v3 = vpop.f32.mrf.mxu1 }
  0xed   :  { %443 = vst [vmem:[%s860_s3 + $0x48] sm:$0xff] %v368_v0  ;;  %457 = vst [vmem:[%s860_s3 + $0xb8] sm:$0xff] %v424_v1 }
  0xee   :  { %v372_v4 = vpop.f32.mrf.mxu0  ;;  %v428_v5 = vpop.f32.mrf.mxu1 }
  0xef   :  { %v373_v6 = vadd.f32 %v372_v4, %v766_v52  ;;  %v429_v7 = vadd.f32 %v428_v5, %v189_v50 }
  0xf0   :  { %v527_v8 = vpop.f32.mrf.mxu0  ;;  %v555_v9 = vpop.f32.mrf.mxu1 }
  0xf1   :  { %444 = vst [vmem:[%s860_s3 + $0x50] sm:$0xff] %v373_v6  ;;  %458 = vst [vmem:[%s860_s3 + $0xc0] sm:$0xf] %v429_v7 }
  0xf2   :  { %v375_v51 = vpop.f32.mrf.mxu0  ;;  %v431_v10 = vpop.f32.mrf.mxu1 }
  0xf3   :  { %v376_v11 = vadd.f32 %v375_v51, %v768_v53 }
  0xf4   :  { %v528_v12 = vpop.f32.mrf.mxu0  ;;  %v556_v13 = vpop.f32.mrf.mxu1 }
  0xf5   :  { %445 = vst [vmem:[%s860_s3 + $0x58] sm:$0xff] %v376_v11 }
  0xf6   :  { %v380_v52 = vpop.f32.mrf.mxu0 }
  0xf7   :  { %v381_v14 = vadd.f32 %v380_v52, %v770_v54 }
  0xf8   :  { %v531_v15 = vpop.f32.mrf.mxu0 }
  0xf9   :  { %446 = vst [vmem:[%s860_s3 + $0x60] sm:$0xff] %v381_v14 }
  0xfa   :  { %v383_v16 = vpop.f32.mrf.mxu0 }
  0xfb   :  { %v384_v17 = vadd.f32 %v383_v16, %v772_v55 }
  0xfc   :  { %v532_v18 = vpop.f32.mrf.mxu0 }
  0xfd   :  { %447 = vst [vmem:[%s860_s3 + $0x68] sm:$0xff] %v384_v17 }

// kernel: squeeze.191
= control target key start
LH: loop header
LB: loop body
LE: loop exit
PB: predicated region body
PF: predicated region fallthrough
CT: control target
= control target key end

     0   :  { %s1128_s8 = smov 125   ;;  %s1129_s9 = smov 126   ;;  %vm8_vm0 = vcmask 23552   ;;  %vm847_vm1 = vcmask 1031168   ;;  %vm861_vm2 = vcmask 1039360   ;;  %vm851_vm3 = vcmask 15360   ;;  %s1783_s0 = inlined_call_operand.vmem [shape: f32[384], index: 0, kind: input, shape index: {}]   ;;  %s1784_s1 = inlined_call_operand.vmem [shape: f32[2,8,8,3], index: 1, kind: output, shape index: {}]  }
   0x1   :  { %v5_v0 = vld [vmem:[%s1783_s0] sm:$0xf]  ;;  %s1127_s0 = smov 127   ;;  %s1130_s10 = smov 124   ;;  %vm865_vm4 = vcmask 7168   ;;  %vm854_vm5 = vcmask 23568  }
   0x2   :  { %6 = vst [vmem:[#allocation0] sm:$0xf] %v5_v0  ;;  %s1131_s11 = smov 123   ;;  %s1132_s12 = smov 122   ;;  %vm868_vm6 = vcmask 23560  }
   0x3   :  { %s1133_s13 = smov 121   ;;  %s1134_s14 = smov 120  }
   0x4   :  { %s1135_s15 = smov 119   ;;  %s1136_s16 = smov 118  }
   0x5   :  { %s1137_s17 = smov 117   ;;  %s1138_s18 = smov 116  }
   0x6   :  { %s1139_s19 = smov 115   ;;  %s1140_s20 = smov 114  }
   0x7   :  { %s1141_s21 = smov 113   ;;  %s1142_s22 = smov 112  }
   0x8   :  { %s1143_s23 = smov 111   ;;  %s1144_s24 = smov 110  }
   0x9   :  { %v11_v1 = vld [vmem:[#allocation0 + $0x1] sm:$0x1]   ;;  %v24_v2 = vld [vmem:[#allocation0] sm:$0x1]   ;;  %v18_v3 = vld [vmem:[#allocation0 + $0x2] sm:$0x1]  }
   0xa   :  { %12 = vrot.lane.b32.xlu0 %v11_v1, %s1127_s0  ;;  %25 = vrot.lane.b32.xlu1 %v24_v2, %s1128_s8  ;;  %v31_v4 = vld [vmem:[#allocation0 + $0x1] sm:$0x1]   ;;  %v38_v5 = vld [vmem:[#allocation0 + $0x2] sm:$0x1]   ;;  %v44_v6 = vld [vmem:[#allocation0] sm:$0x1]  }
   0xb   :  { %v51_v7 = vld [vmem:[#allocation0 + $0x1] sm:$0x1]   ;;  %v58_v8 = vld [vmem:[#allocation0 + $0x2] sm:$0x1]   ;;  %v64_v9 = vld [vmem:[#allocation0] sm:$0x1]  }
   0xc   :  { %v71_v10 = vld [vmem:[#allocation0 + $0x1] sm:$0x1]   ;;  %v78_v11 = vld [vmem:[#allocation0 + $0x2] sm:$0x1]   ;;  %v84_v12 = vld [vmem:[#allocation0] sm:$0x1]  }
   0xd   :  { %v91_v13 = vld [vmem:[#allocation0 + $0x1] sm:$0x1]   ;;  %v98_v14 = vld [vmem:[#allocation0 + $0x2] sm:$0x1]   ;;  %v104_v15 = vld [vmem:[#allocation0] sm:$0x1]  }
   0xe   :  { %19 = vrot.lane.b32.xlu0 %v18_v3, %s1129_s9  ;;  %32 = vrot.lane.b32.xlu1 %v31_v4, %s1130_s10  ;;  %v111_v16 = vld [vmem:[#allocation0 + $0x1] sm:$0x1]   ;;  %v118_v17 = vld [vmem:[#allocation0 + $0x2] sm:$0x1]   ;;  %v124_v18 = vld [vmem:[#allocation0] sm:$0x1]  }
   0xf   :  { %v131_v19 = vld [vmem:[#allocation0 + $0x1] sm:$0x1]   ;;  %v138_v20 = vld [vmem:[#allocation0 + $0x2] sm:$0x1]   ;;  %s1145_s25 = smov 109   ;;  %s1146_s26 = smov 108  }
  0x10   :  { %v144_v21 = vld [vmem:[#allocation0] sm:$0x1]   ;;  %v151_v22 = vld [vmem:[#allocation0 + $0x1] sm:$0x1]   ;;  %s1147_s27 = smov 107   ;;  %s1148_s28 = smov 106  }
  0x11   :  { %v158_v23 = vld [vmem:[#allocation0 + $0x2] sm:$0x1]   ;;  %v164_v24 = vld [vmem:[#allocation0] sm:$0x1]   ;;  %s1149_s29 = smov 105   ;;  %s1150_s30 = smov 104  }
  0x12   :  { %39 = vrot.lane.b32.xlu0 %v38_v5, %s1131_s11  ;;  %45 = vrot.lane.b32.xlu1 %v44_v6, %s1132_s12  ;;  %v171_v25 = vld [vmem:[#allocation0 + $0x1] sm:$0x1]   ;;  %v178_v26 = vld [vmem:[#allocation0 + $0x2] sm:$0x1]   ;;  %s1151_s2 = smov 103   ;;  %s1152_s3 = smov 102  }
  0x13   :  { %v184_v27 = vld [vmem:[#allocation0] sm:$0x1]   ;;  %v191_v28 = vld [vmem:[#allocation0 + $0x1] sm:$0x1]   ;;  %s1153_s4 = smov 101   ;;  %s1154_s5 = smov 100  }
  0x14   :  { %v198_v29 = vld [vmem:[#allocation0 + $0x2] sm:$0x1]   ;;  %v204_v30 = vld [vmem:[#allocation0] sm:$0x1]   ;;  %s1155_s6 = smov 99   ;;  %s1156_s7 = smov 98  }
  0x15   :  { %v211_v31 = vld [vmem:[#allocation0 + $0x1] sm:$0x1]   ;;  %v218_v32 = vld [vmem:[#allocation0 + $0x2] sm:$0x1]   ;;  %s1157_s0 = smov 97   ;;  %s1158_s8 = smov 96  }
  0x16   :  { %52 = vrot.lane.b32.xlu0 %v51_v7, %s1133_s13  ;;  %59 = vrot.lane.b32.xlu1 %v58_v8, %s1134_s14  ;;  %v224_v33 = vld [vmem:[#allocation0] sm:$0x1]   ;;  %v231_v34 = vld [vmem:[#allocation0 + $0x1] sm:$0x1]   ;;  %s1159_s9 = smov 95   ;;  %s1160_s10 = smov 94  }
  0x17   :  { %v238_v35 = vld [vmem:[#allocation0 + $0x2] sm:$0x1]   ;;  %v244_v36 = vld [vmem:[#allocation0] sm:$0x1]   ;;  %s1161_s11 = smov 93   ;;  %s1162_s12 = smov 92  }
  0x18   :  { %v251_v37 = vld [vmem:[#allocation0 + $0x1] sm:$0x1]   ;;  %v258_v38 = vld [vmem:[#allocation0 + $0x2] sm:$0x1]   ;;  %s1163_s13 = smov 91   ;;  %s1164_s14 = smov 90  }
  0x19   :  { %v264_v39 = vld [vmem:[#allocation0] sm:$0x1]   ;;  %v271_v40 = vld [vmem:[#allocation0 + $0x1] sm:$0x1]   ;;  %v278_v41 = vld [vmem:[#allocation0 + $0x2] sm:$0x1]  }
  0x1a   :  { %65 = vrot.lane.b32.xlu0 %v64_v9, %s1135_s15  ;;  %72 = vrot.lane.b32.xlu1 %v71_v10, %s1136_s16  ;;  %s1165_s15 = smov 89   ;;  %s1166_s16 = smov 88   ;;  %v284_v42 = vld [vmem:[#allocation0] sm:$0x1]   ;;  %v291_v43 = vld [vmem:[#allocation0 + $0x1] sm:$0x1]  }
  0x1b   :  { %v298_v44 = vld [vmem:[#allocation0 + $0x2] sm:$0x1]   ;;  %v304_v45 = vld [vmem:[#allocation0] sm:$0x1]   ;;  %v311_v46 = vld [vmem:[#allocation0 + $0x1] sm:$0x1]  }
  0x1c   :  { %v318_v47 = vld [vmem:[#allocation0 + $0x2] sm:$0x1]   ;;  %v324_v48 = vld [vmem:[#allocation0] sm:$0x1]   ;;  %v331_v49 = vld [vmem:[#allocation0 + $0x1] sm:$0x1]  }
  0x1d   :  { %v338_v50 = vld [vmem:[#allocation0 + $0x2] sm:$0x1]   ;;  %v344_v51 = vld [vmem:[#allocation0] sm:$0x1]   ;;  %v351_v52 = vld [vmem:[#allocation0 + $0x1] sm:$0x1]  }
  0x1e   :  { %79 = vrot.lane.b32.xlu0 %v78_v11, %s1137_s17  ;;  %85 = vrot.lane.b32.xlu1 %v84_v12, %s1138_s18  ;;  %s1167_s17 = smov 87   ;;  %s1168_s18 = smov 86   ;;  %v358_v53 = vld [vmem:[#allocation0 + $0x2] sm:$0x1]   ;;  %v364_v54 = vld [vmem:[#allocation0] sm:$0x1]  }
  0x1f   :  { %v371_v55 = vld [vmem:[#allocation0 + $0x1] sm:$0x1]   ;;  %v378_v56 = vld [vmem:[#allocation0 + $0x2] sm:$0x1]   ;;  %v384_v57 = vld [vmem:[#allocation0] sm:$0x1]  }
  0x20   :  { %v391_v58 = vld [vmem:[#allocation0 + $0x1] sm:$0x1]   ;;  %v398_v59 = vld [vmem:[#allocation0 + $0x2] sm:$0x1]   ;;  %v404_v60 = vld [vmem:[#allocation0] sm:$0x1]  }
  0x21   :  { %v411_v63 = vld [vmem:[#allocation0 + $0x1] sm:$0x1]   ;;  %v418_v0 = vld [vmem:[#allocation0 + $0x2] sm:$0x1]   ;;  %v424_v3 = vld [vmem:[#allocation0] sm:$0x1]  }
  0x22   :  { %92 = vrot.lane.b32.xlu0 %v91_v13, %s1139_s19  ;;  %99 = vrot.lane.b32.xlu1 %v98_v14, %s1140_s20  ;;  %s1169_s19 = smov 85   ;;  %s1170_s20 = smov 84   ;;  %v431_v4 = vld [vmem:[#allocation0 + $0x1] sm:$0x1]   ;;  %v438_v7 = vld [vmem:[#allocation0 + $0x2] sm:$0x1]  }
  0x23   :  { %v444_v8 = vld [vmem:[#allocation0] sm:$0x1]   ;;  %v451_v11 = vld [vmem:[#allocation0 + $0x1] sm:$0x1]   ;;  %v458_v12 = vld [vmem:[#allocation0 + $0x2] sm:$0x1]  }
  0x26   :  { %105 = vrot.lane.b32.xlu0 %v104_v15, %s1141_s21  ;;  %112 = vrot.lane.b32.xlu1 %v111_v16, %s1142_s22  ;;  %s1171_s21 = smov 83   ;;  %s1172_s22 = smov 82   ;;  %v464_v15 = vld [vmem:[#allocation0] sm:$0x1]   ;;  %v471_v16 = vld [vmem:[#allocation0 + $0x1] sm:$0x1]  }
  0x2a   :  { %119 = vrot.lane.b32.xlu0 %v118_v17, %s1143_s23  ;;  %125 = vrot.lane.b32.xlu1 %v124_v18, %s1144_s24  ;;  %s1173_s23 = smov 81   ;;  %s1174_s24 = smov 80  }
  0x2e   :  { %132 = vrot.lane.b32.xlu0 %v131_v19, %s1145_s25  ;;  %139 = vrot.lane.b32.xlu1 %v138_v20, %s1146_s26  ;;  %s1175_s25 = smov 79   ;;  %s1176_s26 = smov 78   ;;  %v478_v19 = vld [vmem:[#allocation0 + $0x2] sm:$0x1]   ;;  %v484_v20 = vld [vmem:[#allocation0] sm:$0x1]  }
  0x32   :  { %145 = vrot.lane.b32.xlu0 %v144_v21, %s1147_s27  ;;  %152 = vrot.lane.b32.xlu1 %v151_v22, %s1148_s28  ;;  %s1177_s27 = smov 77   ;;  %s1178_s28 = smov 76  }
  0x36   :  { %159 = vrot.lane.b32.xlu0 %v158_v23, %s1149_s29  ;;  %165 = vrot.lane.b32.xlu1 %v164_v24, %s1150_s30  ;;  %s1179_s29 = smov 75   ;;  %s1180_s30 = smov 74   ;;  %v491_v23 = vld [vmem:[#allocation0 + $0x1] sm:$0x1]   ;;  %v498_v24 = vld [vmem:[#allocation0 + $0x2] sm:$0x1]  }
  0x3a   :  { %172 = vrot.lane.b32.xlu0 %v171_v25, %s1151_s2  ;;  %179 = vrot.lane.b32.xlu1 %v178_v26, %s1152_s3  ;;  %s1181_s2 = smov 73   ;;  %s1182_s3 = smov 72  }
  0x3e   :  { %185 = vrot.lane.b32.xlu0 %v184_v27, %s1153_s4  ;;  %192 = vrot.lane.b32.xlu1 %v191_v28, %s1154_s5  ;;  %s1183_s4 = smov 71   ;;  %s1184_s5 = smov 70   ;;  %v504_v27 = vld [vmem:[#allocation0] sm:$0x1]   ;;  %v511_v28 = vld [vmem:[#allocation0 + $0x1] sm:$0x1]  }
  0x42   :  { %199 = vrot.lane.b32.xlu0 %v198_v29, %s1155_s6  ;;  %205 = vrot.lane.b32.xlu1 %v204_v30, %s1156_s7  ;;  %s1253_s6 = smov 3  }
  0x46   :  { %212 = vrot.lane.b32.xlu0 %v211_v31, %s1157_s0  ;;  %219 = vrot.lane.b32.xlu1 %v218_v32, %s1158_s8  ;;  %v518_v31 = vld [vmem:[#allocation0 + $0x2] sm:$0x1]   ;;  %v524_v32 = vld [vmem:[#allocation0] sm:$0x1]  }
  0x4a   :  { %225 = vrot.lane.b32.xlu0 %v224_v33, %s1159_s9  ;;  %232 = vrot.lane.b32.xlu1 %v231_v34, %s1160_s10  ;;  %s1185_s9 = smov 69   ;;  %s1186_s10 = smov 68  }
  0x4e   :  { %239 = vrot.lane.b32.xlu0 %v238_v35, %s1161_s11  ;;  %245 = vrot.lane.b32.xlu1 %v244_v36, %s1162_s12  ;;  %v531_v35 = vld [vmem:[#allocation0 + $0x1] sm:$0x1]   ;;  %v538_v36 = vld [vmem:[#allocation0 + $0x2] sm:$0x1]  }
  0x52   :  { %252 = vrot.lane.b32.xlu0 %v251_v37, %s1163_s13  ;;  %259 = vrot.lane.b32.xlu1 %v258_v38, %s1164_s14 }
  0x56   :  { %265 = vrot.lane.b32.xlu0 %v264_v39, %s1165_s15  ;;  %272 = vrot.lane.b32.xlu1 %v271_v40, %s1166_s16  ;;  %s1187_s15 = smov 67   ;;  %s1188_s16 = smov 66   ;;  %v544_v39 = vld [vmem:[#allocation0] sm:$0x1]   ;;  %v551_v40 = vld [vmem:[#allocation0 + $0x1] sm:$0x1]  }
  0x5a   :  { %279 = vrot.lane.b32.xlu0 %v278_v41, %s1167_s17  ;;  %285 = vrot.lane.b32.xlu1 %v284_v42, %s1168_s18  ;;  %s1247_s17 = smov 9   ;;  %s1248_s18 = smov 8  }
  0x5e   :  { %292 = vrot.lane.b32.xlu0 %v291_v43, %s1169_s19  ;;  %299 = vrot.lane.b32.xlu1 %v298_v44, %s1170_s20  ;;  %v558_v43 = vld [vmem:[#allocation0 + $0x2] sm:$0x1]   ;;  %v564_v44 = vld [vmem:[#allocation0] sm:$0x1]  }
  0x62   :  { %305 = vrot.lane.b32.xlu0 %v304_v45, %s1171_s21  ;;  %312 = vrot.lane.b32.xlu1 %v311_v46, %s1172_s22  ;;  %s1189_s21 = smov 65   ;;  %s1190_s22 = smov 64  }
  0x66   :  { %319 = vrot.lane.b32.xlu0 %v318_v47, %s1173_s23  ;;  %325 = vrot.lane.b32.xlu1 %v324_v48, %s1174_s24  ;;  %v571_v47 = vld [vmem:[#allocation0 + $0x1] sm:$0x1]   ;;  %v578_v48 = vld [vmem:[#allocation0 + $0x2] sm:$0x1]   ;;  %s1249_s23 = smov 7   ;;  %s1250_s24 = smov 6  }
  0x6a   :  { %332 = vrot.lane.b32.xlu0 %v331_v49, %s1175_s25  ;;  %339 = vrot.lane.b32.xlu1 %v338_v50, %s1176_s26 }
  0x6e   :  { %345 = vrot.lane.b32.xlu0 %v344_v51, %s1177_s27  ;;  %352 = vrot.lane.b32.xlu1 %v351_v52, %s1178_s28  ;;  %s1191_s27 = smov 63   ;;  %s1192_s28 = smov 62   ;;  %v584_v51 = vld [vmem:[#allocation0] sm:$0x1]   ;;  %v591_v52 = vld [vmem:[#allocation0 + $0x1] sm:$0x1]  }
  0x72   :  { %359 = vrot.lane.b32.xlu0 %v358_v53, %s1179_s29  ;;  %365 = vrot.lane.b32.xlu1 %v364_v54, %s1180_s30  ;;  %s1251_s29 = smov 5   ;;  %s1252_s30 = smov 4  }
  0x76   :  { %372 = vrot.lane.b32.xlu0 %v371_v55, %s1181_s2  ;;  %379 = vrot.lane.b32.xlu1 %v378_v56, %s1182_s3  ;;  %v598_v55 = vld [vmem:[#allocation0 + $0x2] sm:$0x1]   ;;  %v604_v56 = vld [vmem:[#allocation0] sm:$0x1]  }
  0x7a   :  { %385 = vrot.lane.b32.xlu0 %v384_v57, %s1183_s4  ;;  %392 = vrot.lane.b32.xlu1 %v391_v58, %s1184_s5  ;;  %s1193_s4 = smov 61   ;;  %s1194_s5 = smov 60  }
  0x7c   :  { %v13_v61 = vpop.permute.xlu0 %12   ;;  %v26_v62 = vpop.permute.xlu1 %25  }
  0x7d   :  { %871 = vst.msk [vmem:[%s1784_s1 + $0x2b] sm:$0x1] %vm8_vm0, %v13_v61   ;;  %873 = vst.msk [vmem:[%s1784_s1 + $0x1] sm:$0x1] %vm8_vm0, %v26_v62  }
  0x7e   :  { %399 = vrot.lane.b32.xlu0 %v398_v59, %s1185_s9  ;;  %405 = vrot.lane.b32.xlu1 %v404_v60, %s1186_s10  ;;  %s1195_s9 = smov 59   ;;  %s1196_s10 = smov 58   ;;  %v611_v59 = vld [vmem:[#allocation0 + $0x1] sm:$0x1]   ;;  %v618_v60 = vld [vmem:[#allocation0 + $0x2] sm:$0x1]  }
  0x80   :  { %v20_v1 = vpop.permute.xlu0 %19   ;;  %v33_v2 = vpop.permute.xlu1 %32  }
  0x81   :  { %872 = vst.msk [vmem:[%s1784_s1 + $0x56] sm:$0x1] %vm8_vm0, %v20_v1   ;;  %874 = vst.msk [vmem:[%s1784_s1 + $0x2c] sm:$0x1] %vm8_vm0, %v33_v2  }
  0x82   :  { %412 = vrot.lane.b32.xlu0 %v411_v63, %s1187_s15  ;;  %419 = vrot.lane.b32.xlu1 %v418_v0, %s1188_s16  ;;  %s1197_s15 = smov 57   ;;  %s1198_s16 = smov 56   ;;  %v624_v63 = vld [vmem:[#allocation0] sm:$0x1]   ;;  %v631_v0 = vld [vmem:[#allocation0 + $0x1] sm:$0x1]  }
  0x84   :  { %v40_v5 = vpop.permute.xlu0 %39   ;;  %v46_v6 = vpop.permute.xlu1 %45  }
  0x85   :  { %875 = vst.msk [vmem:[%s1784_s1 + $0x57] sm:$0x1] %vm8_vm0, %v40_v5   ;;  %876 = vst.msk [vmem:[%s1784_s1 + $0x2] sm:$0x1] %vm8_vm0, %v46_v6  }
  0x86   :  { %425 = vrot.lane.b32.xlu0 %v424_v3, %s1189_s21  ;;  %432 = vrot.lane.b32.xlu1 %v431_v4, %s1190_s22  ;;  %s1199_s21 = smov 55   ;;  %s1200_s22 = smov 54   ;;  %v638_v3 = vld [vmem:[#allocation0 + $0x2] sm:$0x1]   ;;  %v644_v4 = vld [vmem:[#allocation0] sm:$0x1]  }
  0x88   :  { %v53_v9 = vpop.permute.xlu0 %52   ;;  %v60_v10 = vpop.permute.xlu1 %59  }
  0x89   :  { %877 = vst.msk [vmem:[%s1784_s1 + $0x2d] sm:$0x1] %vm8_vm0, %v53_v9   ;;  %878 = vst.msk [vmem:[%s1784_s1 + $0x58] sm:$0x1] %vm8_vm0, %v60_v10   ;;  %v844_v9 = vld [vmem:[#allocation0] sm:$0x1]  }
  0x8a   :  { %439 = vrot.lane.b32.xlu0 %v438_v7, %s1191_s27  ;;  %445 = vrot.lane.b32.xlu1 %v444_v8, %s1192_s28  ;;  %s1201_s27 = smov 53   ;;  %s1202_s28 = smov 52   ;;  %v651_v7 = vld [vmem:[#allocation0 + $0x1] sm:$0x1]   ;;  %v658_v8 = vld [vmem:[#allocation0 + $0x2] sm:$0x1]  }
  0x8b   :  { %v846_v10 = vld [vmem:[#allocation0 + $0x1] sm:$0x1]  }
  0x8c   :  { %v66_v13 = vpop.permute.xlu0 %65   ;;  %v73_v14 = vpop.permute.xlu1 %72  }
  0x8d   :  { %879 = vst.msk [vmem:[%s1784_s1 + $0x3] sm:$0x1] %vm8_vm0, %v66_v13   ;;  %880 = vst.msk [vmem:[%s1784_s1 + $0x2e] sm:$0x1] %vm8_vm0, %v73_v14   ;;  %v858_v13 = vld [vmem:[#allocation0 + $0x1] sm:$0x1]  }
  0x8e   :  { %452 = vrot.lane.b32.xlu0 %v451_v11, %s1193_s4  ;;  %459 = vrot.lane.b32.xlu1 %v458_v12, %s1194_s5  ;;  %s1203_s4 = smov 51   ;;  %s1204_s5 = smov 50   ;;  %v860_v14 = vld [vmem:[#allocation0 + $0x2] sm:$0x1]  }
  0x90   :  { %v80_v17 = vpop.permute.xlu0 %79   ;;  %v86_v18 = vpop.permute.xlu1 %85  }
  0x91   :  { %881 = vst.msk [vmem:[%s1784_s1 + $0x59] sm:$0x1] %vm8_vm0, %v80_v17   ;;  %882 = vst.msk [vmem:[%s1784_s1 + $0x4] sm:$0x1] %vm8_vm0, %v86_v18  }
  0x92   :  { %465 = vrot.lane.b32.xlu0 %v464_v15, %s1195_s9  ;;  %472 = vrot.lane.b32.xlu1 %v471_v16, %s1196_s10  ;;  %s1205_s9 = smov 49   ;;  %s1206_s10 = smov 48   ;;  %v848_v15 = vsel %vm847_vm1, %v846_v10, %v844_v9  ;;  %v862_v16 = vsel %vm861_vm2, %v860_v14, %v858_v13 }
  0x94   :  { %v93_v21 = vpop.permute.xlu0 %92   ;;  %v100_v22 = vpop.permute.xlu1 %99  }
  0x95   :  { %883 = vst.msk [vmem:[%s1784_s1 + $0x2f] sm:$0x1] %vm8_vm0, %v93_v21   ;;  %884 = vst.msk [vmem:[%s1784_s1 + $0x5a] sm:$0x1] %vm8_vm0, %v100_v22  }
  0x96   :  { %479 = vrot.lane.b32.xlu0 %v478_v19, %s1197_s15  ;;  %485 = vrot.lane.b32.xlu1 %v484_v20, %s1198_s16  ;;  %s1207_s15 = smov 47   ;;  %s1208_s16 = smov 46   ;;  %v664_v19 = vld [vmem:[#allocation0] sm:$0x1]   ;;  %v671_v20 = vld [vmem:[#allocation0 + $0x1] sm:$0x1]  }
  0x98   :  { %v106_v25 = vpop.permute.xlu0 %105   ;;  %v113_v26 = vpop.permute.xlu1 %112  }
  0x99   :  { %885 = vst.msk [vmem:[%s1784_s1 + $0x5] sm:$0x1] %vm8_vm0, %v106_v25   ;;  %886 = vst.msk [vmem:[%s1784_s1 + $0x30] sm:$0x1] %vm8_vm0, %v113_v26  }
  0x9a   :  { %492 = vrot.lane.b32.xlu0 %v491_v23, %s1199_s21  ;;  %499 = vrot.lane.b32.xlu1 %v498_v24, %s1200_s22  ;;  %s1209_s21 = smov 45   ;;  %s1210_s22 = smov 44   ;;  %v678_v23 = vld [vmem:[#allocation0 + $0x2] sm:$0x1]   ;;  %v684_v24 = vld [vmem:[#allocation0] sm:$0x1]  }
  0x9c   :  { %v120_v29 = vpop.permute.xlu0 %119   ;;  %v126_v30 = vpop.permute.xlu1 %125  }
  0x9d   :  { %887 = vst.msk [vmem:[%s1784_s1 + $0x5b] sm:$0x1] %vm8_vm0, %v120_v29   ;;  %888 = vst.msk [vmem:[%s1784_s1 + $0x6] sm:$0x1] %vm8_vm0, %v126_v30  }
  0x9e   :  { %505 = vrot.lane.b32.xlu0 %v504_v27, %s1201_s27  ;;  %512 = vrot.lane.b32.xlu1 %v511_v28, %s1202_s28  ;;  %s1211_s27 = smov 43   ;;  %s1212_s28 = smov 42   ;;  %v691_v27 = vld [vmem:[#allocation0 + $0x1] sm:$0x1]   ;;  %v698_v28 = vld [vmem:[#allocation0 + $0x2] sm:$0x1]  }
  0xa0   :  { %v133_v33 = vpop.permute.xlu0 %132   ;;  %v140_v34 = vpop.permute.xlu1 %139  }
  0xa1   :  { %889 = vst.msk [vmem:[%s1784_s1 + $0x31] sm:$0x1] %vm8_vm0, %v133_v33   ;;  %890 = vst.msk [vmem:[%s1784_s1 + $0x5c] sm:$0x1] %vm8_vm0, %v140_v34  }
  0xa2   :  { %519 = vrot.lane.b32.xlu0 %v518_v31, %s1203_s4  ;;  %525 = vrot.lane.b32.xlu1 %v524_v32, %s1204_s5  ;;  %s1213_s4 = smov 41   ;;  %s1214_s5 = smov 40   ;;  %v704_v31 = vld [vmem:[#allocation0] sm:$0x1]   ;;  %v711_v32 = vld [vmem:[#allocation0 + $0x1] sm:$0x1]  }
  0xa4   :  { %v146_v37 = vpop.permute.xlu0 %145   ;;  %v153_v38 = vpop.permute.xlu1 %152  }
  0xa5   :  { %891 = vst.msk [vmem:[%s1784_s1 + $0x7] sm:$0x1] %vm8_vm0, %v146_v37   ;;  %892 = vst.msk [vmem:[%s1784_s1 + $0x32] sm:$0x1] %vm8_vm0, %v153_v38  }
  0xa6   :  { %532 = vrot.lane.b32.xlu0 %v531_v35, %s1205_s9  ;;  %539 = vrot.lane.b32.xlu1 %v538_v36, %s1206_s10  ;;  %s1215_s9 = smov 39   ;;  %s1216_s10 = smov 38   ;;  %v718_v35 = vld [vmem:[#allocation0 + $0x2] sm:$0x1]   ;;  %v724_v36 = vld [vmem:[#allocation0] sm:$0x1]  }
  0xa8   :  { %v160_v41 = vpop.permute.xlu0 %159   ;;  %v166_v42 = vpop.permute.xlu1 %165  }
  0xa9   :  { %893 = vst.msk [vmem:[%s1784_s1 + $0x5d] sm:$0x1] %vm8_vm0, %v160_v41   ;;  %894 = vst.msk [vmem:[%s1784_s1 + $0x8] sm:$0x1] %vm8_vm0, %v166_v42  }
  0xaa   :  { %545 = vrot.lane.b32.xlu0 %v544_v39, %s1207_s15  ;;  %552 = vrot.lane.b32.xlu1 %v551_v40, %s1208_s16  ;;  %s1217_s15 = smov 37   ;;  %s1218_s16 = smov 36   ;;  %v731_v39 = vld [vmem:[#allocation0 + $0x1] sm:$0x1]   ;;  %v738_v40 = vld [vmem:[#allocation0 + $0x2] sm:$0x1]  }
  0xac   :  { %v173_v45 = vpop.permute.xlu0 %172   ;;  %v180_v46 = vpop.permute.xlu1 %179  }
  0xad   :  { %895 = vst.msk [vmem:[%s1784_s1 + $0x33] sm:$0x1] %vm8_vm0, %v173_v45   ;;  %896 = vst.msk [vmem:[%s1784_s1 + $0x5e] sm:$0x1] %vm8_vm0, %v180_v46  }
  0xae   :  { %559 = vrot.lane.b32.xlu0 %v558_v43, %s1209_s21  ;;  %565 = vrot.lane.b32.xlu1 %v564_v44, %s1210_s22  ;;  %s1219_s21 = smov 35   ;;  %s1220_s22 = smov 34   ;;  %v744_v43 = vld [vmem:[#allocation0] sm:$0x1]   ;;  %v751_v44 = vld [vmem:[#allocation0 + $0x1] sm:$0x1]  }
  0xb0   :  { %v186_v49 = vpop.permute.xlu0 %185   ;;  %v193_v50 = vpop.permute.xlu1 %192  }
  0xb1   :  { %897 = vst.msk [vmem:[%s1784_s1 + $0x9] sm:$0x1] %vm8_vm0, %v186_v49   ;;  %898 = vst.msk [vmem:[%s1784_s1 + $0x34] sm:$0x1] %vm8_vm0, %v193_v50  }
  0xb2   :  { %572 = vrot.lane.b32.xlu0 %v571_v47, %s1211_s27  ;;  %579 = vrot.lane.b32.xlu1 %v578_v48, %s1212_s28  ;;  %s1221_s27 = smov 33   ;;  %s1222_s28 = smov 32   ;;  %v758_v47 = vld [vmem:[#allocation0 + $0x2] sm:$0x1]   ;;  %v764_v48 = vld [vmem:[#allocation0] sm:$0x1]  }
  0xb4   :  { %v200_v53 = vpop.permute.xlu0 %199   ;;  %v206_v54 = vpop.permute.xlu1 %205  }
  0xb5   :  { %899 = vst.msk [vmem:[%s1784_s1 + $0x5f] sm:$0x1] %vm8_vm0, %v200_v53   ;;  %900 = vst.msk [vmem:[%s1784_s1 + $0xa] sm:$0x1] %vm8_vm0, %v206_v54  }
  0xb6   :  { %585 = vrot.lane.b32.xlu0 %v584_v51, %s1213_s4  ;;  %592 = vrot.lane.b32.xlu1 %v591_v52, %s1214_s5  ;;  %s1223_s4 = smov 31   ;;  %s1224_s5 = smov 30   ;;  %v771_v51 = vld [vmem:[#allocation0 + $0x1] sm:$0x1]   ;;  %v778_v52 = vld [vmem:[#allocation0 + $0x2] sm:$0x1]  }
  0xb8   :  { %v213_v57 = vpop.permute.xlu0 %212   ;;  %v220_v58 = vpop.permute.xlu1 %219  }
  0xb9   :  { %901 = vst.msk [vmem:[%s1784_s1 + $0x35] sm:$0x1] %vm8_vm0, %v213_v57   ;;  %902 = vst.msk [vmem:[%s1784_s1 + $0x60] sm:$0x1] %vm8_vm0, %v220_v58  }
  0xba   :  { %599 = vrot.lane.b32.xlu0 %v598_v55, %s1215_s9  ;;  %605 = vrot.lane.b32.xlu1 %v604_v56, %s1216_s10  ;;  %s1225_s9 = smov 2   ;;  %s1226_s10 = smov 1   ;;  %v784_v55 = vld [vmem:[#allocation0] sm:$0x1]   ;;  %v791_v56 = vld [vmem:[#allocation0 + $0x1] sm:$0x1]  }
  0xbc   :  { %v226_v61 = vpop.permute.xlu0 %225   ;;  %v233_v62 = vpop.permute.xlu1 %232  }
  0xbd   :  { %903 = vst.msk [vmem:[%s1784_s1 + $0xb] sm:$0x1] %vm8_vm0, %v226_v61   ;;  %904 = vst.msk [vmem:[%s1784_s1 + $0x36] sm:$0x1] %vm8_vm0, %v233_v62  }
  0xbe   :  { %612 = vrot.lane.b32.xlu0 %v611_v59, %s1217_s15  ;;  %619 = vrot.lane.b32.xlu1 %v618_v60, %s1218_s16  ;;  %s1227_s15 = smov 29   ;;  %s1228_s16 = smov 28   ;;  %v798_v59 = vld [vmem:[#allocation0 + $0x2] sm:$0x1]   ;;  %v804_v60 = vld [vmem:[#allocation0] sm:$0x1]  }
  0xc0   :  { %v240_v1 = vpop.permute.xlu0 %239   ;;  %v246_v2 = vpop.permute.xlu1 %245  }
  0xc1   :  { %905 = vst.msk [vmem:[%s1784_s1 + $0x61] sm:$0x1] %vm8_vm0, %v240_v1   ;;  %906 = vst.msk [vmem:[%s1784_s1 + $0xc] sm:$0x1] %vm8_vm0, %v246_v2   ;;  %v818_v1 = vld [vmem:[#allocation0 + $0x2] sm:$0x1]  }
  0xc2   :  { %625 = vrot.lane.b32.xlu0 %v624_v63, %s1219_s21  ;;  %632 = vrot.lane.b32.xlu1 %v631_v0, %s1220_s22  ;;  %s1229_s21 = smov 27   ;;  %s1230_s22 = smov 26   ;;  %v7_v63 = vld [vmem:[#allocation0] sm:$0x1]   ;;  %v811_v0 = vld [vmem:[#allocation0 + $0x1] sm:$0x1]  }
  0xc3   :  { %9 = vst.msk [vmem:[%s1784_s1] sm:$0x1] %vm8_vm0, %v7_v63  }
  0xc4   :  { %v253_v5 = vpop.permute.xlu0 %252   ;;  %v260_v6 = vpop.permute.xlu1 %259  }
  0xc5   :  { %907 = vst.msk [vmem:[%s1784_s1 + $0x37] sm:$0x1] %vm8_vm0, %v253_v5   ;;  %908 = vst.msk [vmem:[%s1784_s1 + $0x62] sm:$0x1] %vm8_vm0, %v260_v6   ;;  %v831_v5 = vld [vmem:[#allocation0 + $0x1] sm:$0x1]  }
  0xc6   :  { %639 = vrot.lane.b32.xlu0 %v638_v3, %s1221_s27  ;;  %645 = vrot.lane.b32.xlu1 %v644_v4, %s1222_s28  ;;  %s1231_s27 = smov 25   ;;  %s1232_s28 = smov 24   ;;  %v824_v4 = vld [vmem:[#allocation0] sm:$0x1]  }
  0xc8   :  { %v266_v11 = vpop.permute.xlu0 %265   ;;  %v273_v12 = vpop.permute.xlu1 %272  }
  0xc9   :  { %909 = vst.msk [vmem:[%s1784_s1 + $0xd] sm:$0x1] %vm8_vm0, %v266_v11   ;;  %910 = vst.msk [vmem:[%s1784_s1 + $0x38] sm:$0x1] %vm8_vm0, %v273_v12  }
  0xca   :  { %652 = vrot.lane.b32.xlu0 %v651_v7, %s1223_s4  ;;  %659 = vrot.lane.b32.xlu1 %v658_v8, %s1224_s5  ;;  %s1233_s4 = smov 23   ;;  %s1234_s5 = smov 22   ;;  %v838_v8 = vld [vmem:[#allocation0 + $0x2] sm:$0x1]  }
  0xcc   :  { %v280_v17 = vpop.permute.xlu0 %279   ;;  %v286_v18 = vpop.permute.xlu1 %285  }
  0xcd   :  { %911 = vst.msk [vmem:[%s1784_s1 + $0x63] sm:$0x1] %vm8_vm0, %v280_v17   ;;  %912 = vst.msk [vmem:[%s1784_s1 + $0xe] sm:$0x1] %vm8_vm0, %v286_v18  }
  0xce   :  { %849 = vrot.lane.b32.xlu0 %v848_v15, %s1225_s9  ;;  %863 = vrot.lane.b32.xlu1 %v862_v16, %s1226_s10  ;;  %s1235_s9 = smov 21   ;;  %s1236_s10 = smov 20  }
  0xd0   :  { %v293_v21 = vpop.permute.xlu0 %292   ;;  %v300_v22 = vpop.permute.xlu1 %299  }
  0xd1   :  { %913 = vst.msk [vmem:[%s1784_s1 + $0x39] sm:$0x1] %vm8_vm0, %v293_v21   ;;  %914 = vst.msk [vmem:[%s1784_s1 + $0x64] sm:$0x1] %vm8_vm0, %v300_v22  }
  0xd2   :  { %665 = vrot.lane.b32.xlu0 %v664_v19, %s1227_s15  ;;  %672 = vrot.lane.b32.xlu1 %v671_v20, %s1228_s16  ;;  %s1237_s15 = smov 19   ;;  %s1238_s16 = smov 18  }
  0xd4   :  { %v306_v25 = vpop.permute.xlu0 %305   ;;  %v313_v26 = vpop.permute.xlu1 %312  }
  0xd5   :  { %915 = vst.msk [vmem:[%s1784_s1 + $0xf] sm:$0x1] %vm8_vm0, %v306_v25   ;;  %916 = vst.msk [vmem:[%s1784_s1 + $0x3a] sm:$0x1] %vm8_vm0, %v313_v26  }
  0xd6   :  { %679 = vrot.lane.b32.xlu0 %v678_v23, %s1229_s21  ;;  %685 = vrot.lane.b32.xlu1 %v684_v24, %s1230_s22  ;;  %s1239_s21 = smov 17   ;;  %s1240_s22 = smov 16  }
  0xd8   :  { %v320_v29 = vpop.permute.xlu0 %319   ;;  %v326_v30 = vpop.permute.xlu1 %325  }
  0xd9   :  { %917 = vst.msk [vmem:[%s1784_s1 + $0x65] sm:$0x1] %vm8_vm0, %v320_v29   ;;  %918 = vst.msk [vmem:[%s1784_s1 + $0x10] sm:$0x1] %vm8_vm0, %v326_v30  }
  0xda   :  { %692 = vrot.lane.b32.xlu0 %v691_v27, %s1231_s27  ;;  %699 = vrot.lane.b32.xlu1 %v698_v28, %s1232_s28  ;;  %s1241_s27 = smov 15   ;;  %s1242_s28 = smov 14  }
  0xdc   :  { %v333_v33 = vpop.permute.xlu0 %332   ;;  %v340_v34 = vpop.permute.xlu1 %339  }
  0xdd   :  { %919 = vst.msk [vmem:[%s1784_s1 + $0x3b] sm:$0x1] %vm8_vm0, %v333_v33   ;;  %920 = vst.msk [vmem:[%s1784_s1 + $0x66] sm:$0x1] %vm8_vm0, %v340_v34  }
  0xde   :  { %705 = vrot.lane.b32.xlu0 %v704_v31, %s1233_s4  ;;  %712 = vrot.lane.b32.xlu1 %v711_v32, %s1234_s5  ;;  %s1243_s4 = smov 13   ;;  %s1244_s5 = smov 12  }
  0xe0   :  { %v346_v37 = vpop.permute.xlu0 %345   ;;  %v353_v38 = vpop.permute.xlu1 %352  }
  0xe1   :  { %921 = vst.msk [vmem:[%s1784_s1 + $0x11] sm:$0x1] %vm8_vm0, %v346_v37   ;;  %922 = vst.msk [vmem:[%s1784_s1 + $0x3c] sm:$0x1] %vm8_vm0, %v353_v38  }
  0xe2   :  { %719 = vrot.lane.b32.xlu0 %v718_v35, %s1235_s9  ;;  %725 = vrot.lane.b32.xlu1 %v724_v36, %s1236_s10  ;;  %s1245_s9 = smov 11   ;;  %s1246_s10 = smov 10  }
  0xe4   :  { %v360_v41 = vpop.permute.xlu0 %359   ;;  %v366_v42 = vpop.permute.xlu1 %365  }
  0xe5   :  { %923 = vst.msk [vmem:[%s1784_s1 + $0x67] sm:$0x1] %vm8_vm0, %v360_v41   ;;  %924 = vst.msk [vmem:[%s1784_s1 + $0x12] sm:$0x1] %vm8_vm0, %v366_v42  }
  0xe6   :  { %732 = vrot.lane.b32.xlu0 %v731_v39, %s1237_s15  ;;  %739 = vrot.lane.b32.xlu1 %v738_v40, %s1238_s16 }
  0xe8   :  { %v373_v45 = vpop.permute.xlu0 %372   ;;  %v380_v46 = vpop.permute.xlu1 %379  }
  0xe9   :  { %925 = vst.msk [vmem:[%s1784_s1 + $0x3d] sm:$0x1] %vm8_vm0, %v373_v45   ;;  %926 = vst.msk [vmem:[%s1784_s1 + $0x68] sm:$0x1] %vm8_vm0, %v380_v46  }
  0xea   :  { %745 = vrot.lane.b32.xlu0 %v744_v43, %s1239_s21  ;;  %752 = vrot.lane.b32.xlu1 %v751_v44, %s1240_s22 }
  0xec   :  { %v386_v49 = vpop.permute.xlu0 %385   ;;  %v393_v50 = vpop.permute.xlu1 %392  }
  0xed   :  { %927 = vst.msk [vmem:[%s1784_s1 + $0x13] sm:$0x1] %vm8_vm0, %v386_v49   ;;  %928 = vst.msk [vmem:[%s1784_s1 + $0x3e] sm:$0x1] %vm8_vm0, %v393_v50  }
  0xee   :  { %759 = vrot.lane.b32.xlu0 %v758_v47, %s1241_s27  ;;  %765 = vrot.lane.b32.xlu1 %v764_v48, %s1242_s28 }
  0xf0   :  { %v400_v53 = vpop.permute.xlu0 %399   ;;  %v406_v54 = vpop.permute.xlu1 %405  }
  0xf1   :  { %929 = vst.msk [vmem:[%s1784_s1 + $0x69] sm:$0x1] %vm8_vm0, %v400_v53   ;;  %930 = vst.msk [vmem:[%s1784_s1 + $0x14] sm:$0x1] %vm8_vm0, %v406_v54  }
  0xf2   :  { %772 = vrot.lane.b32.xlu0 %v771_v51, %s1243_s4  ;;  %779 = vrot.lane.b32.xlu1 %v778_v52, %s1244_s5 }
  0xf4   :  { %v413_v57 = vpop.permute.xlu0 %412   ;;  %v420_v58 = vpop.permute.xlu1 %419  }
  0xf5   :  { %931 = vst.msk [vmem:[%s1784_s1 + $0x3f] sm:$0x1] %vm8_vm0, %v413_v57   ;;  %932 = vst.msk [vmem:[%s1784_s1 + $0x6a] sm:$0x1] %vm8_vm0, %v420_v58  }
  0xf6   :  { %785 = vrot.lane.b32.xlu0 %v784_v55, %s1245_s9  ;;  %792 = vrot.lane.b32.xlu1 %v791_v56, %s1246_s10 }
  0xf8   :  { %v426_v61 = vpop.permute.xlu0 %425   ;;  %v433_v62 = vpop.permute.xlu1 %432  }
  0xf9   :  { %933 = vst.msk [vmem:[%s1784_s1 + $0x15] sm:$0x1] %vm8_vm0, %v426_v61   ;;  %934 = vst.msk [vmem:[%s1784_s1 + $0x40] sm:$0x1] %vm8_vm0, %v433_v62  }
  0xfa   :  { %799 = vrot.lane.b32.xlu0 %v798_v59, %s1247_s17  ;;  %805 = vrot.lane.b32.xlu1 %v804_v60, %s1248_s18 }
  0xfc   :  { %v440_v2 = vpop.permute.xlu0 %439   ;;  %v446_v3 = vpop.permute.xlu1 %445  }
  0xfd   :  { %935 = vst.msk [vmem:[%s1784_s1 + $0x6b] sm:$0x1] %vm8_vm0, %v440_v2   ;;  %936 = vst.msk [vmem:[%s1784_s1 + $0x16] sm:$0x1] %vm8_vm0, %v446_v3  }
  0xfe   :  { %812 = vrot.lane.b32.xlu0 %v811_v0, %s1249_s23  ;;  %819 = vrot.lane.b32.xlu1 %v818_v1, %s1250_s24 }
 0x100   :  { %v453_v6 = vpop.permute.xlu0 %452   ;;  %v460_v7 = vpop.permute.xlu1 %459  }
 0x101   :  { %937 = vst.msk [vmem:[%s1784_s1 + $0x41] sm:$0x1] %vm8_vm0, %v453_v6   ;;  %938 = vst.msk [vmem:[%s1784_s1 + $0x6c] sm:$0x1] %vm8_vm0, %v460_v7  }
 0x102   :  { %825 = vrot.lane.b32.xlu0 %v824_v4, %s1251_s29  ;;  %832 = vrot.lane.b32.xlu1 %v831_v5, %s1252_s30 }
 0x104   :  { %v466_v9 = vpop.permute.xlu0 %465   ;;  %v473_v10 = vpop.permute.xlu1 %472  }
 0x105   :  { %939 = vst.msk [vmem:[%s1784_s1 + $0x17] sm:$0x1] %vm8_vm0, %v466_v9   ;;  %940 = vst.msk [vmem:[%s1784_s1 + $0x42] sm:$0x1] %vm8_vm0, %v473_v10  }
 0x106   :  { %839 = vrot.lane.b32.xlu0 %v838_v8, %s1253_s6 }
 0x108   :  { %v480_v11 = vpop.permute.xlu0 %479   ;;  %v486_v12 = vpop.permute.xlu1 %485  }
 0x109   :  { %941 = vst.msk [vmem:[%s1784_s1 + $0x6d] sm:$0x1] %vm8_vm0, %v480_v11   ;;  %942 = vst.msk [vmem:[%s1784_s1 + $0x18] sm:$0x1] %vm8_vm0, %v486_v12  }
 0x10c   :  { %v493_v13 = vpop.permute.xlu0 %492   ;;  %v500_v14 = vpop.permute.xlu1 %499  }
 0x10d   :  { %943 = vst.msk [vmem:[%s1784_s1 + $0x43] sm:$0x1] %vm8_vm0, %v493_v13   ;;  %944 = vst.msk [vmem:[%s1784_s1 + $0x6e] sm:$0x1] %vm8_vm0, %v500_v14  }
 0x110   :  { %v506_v15 = vpop.permute.xlu0 %505   ;;  %v513_v16 = vpop.permute.xlu1 %512  }
 0x111   :  { %945 = vst.msk [vmem:[%s1784_s1 + $0x19] sm:$0x1] %vm8_vm0, %v506_v15   ;;  %946 = vst.msk [vmem:[%s1784_s1 + $0x44] sm:$0x1] %vm8_vm0, %v513_v16  }
 0x114   :  { %v520_v17 = vpop.permute.xlu0 %519   ;;  %v526_v18 = vpop.permute.xlu1 %525  }
 0x115   :  { %947 = vst.msk [vmem:[%s1784_s1 + $0x6f] sm:$0x1] %vm8_vm0, %v520_v17   ;;  %948 = vst.msk [vmem:[%s1784_s1 + $0x1a] sm:$0x1] %vm8_vm0, %v526_v18  }
 0x118   :  { %v533_v19 = vpop.permute.xlu0 %532   ;;  %v540_v20 = vpop.permute.xlu1 %539  }
 0x119   :  { %949 = vst.msk [vmem:[%s1784_s1 + $0x45] sm:$0x1] %vm8_vm0, %v533_v19   ;;  %950 = vst.msk [vmem:[%s1784_s1 + $0x70] sm:$0x1] %vm8_vm0, %v540_v20  }
 0x11c   :  { %v546_v21 = vpop.permute.xlu0 %545   ;;  %v553_v22 = vpop.permute.xlu1 %552  }
 0x11d   :  { %951 = vst.msk [vmem:[%s1784_s1 + $0x1b] sm:$0x1] %vm8_vm0, %v546_v21   ;;  %952 = vst.msk [vmem:[%s1784_s1 + $0x46] sm:$0x1] %vm8_vm0, %v553_v22  }
 0x120   :  { %v560_v23 = vpop.permute.xlu0 %559   ;;  %v566_v24 = vpop.permute.xlu1 %565  }
 0x121   :  { %953 = vst.msk [vmem:[%s1784_s1 + $0x71] sm:$0x1] %vm8_vm0, %v560_v23   ;;  %954 = vst.msk [vmem:[%s1784_s1 + $0x1c] sm:$0x1] %vm8_vm0, %v566_v24  }
 0x124   :  { %v573_v25 = vpop.permute.xlu0 %572   ;;  %v580_v26 = vpop.permute.xlu1 %579  }
 0x125   :  { %955 = vst.msk [vmem:[%s1784_s1 + $0x47] sm:$0x1] %vm8_vm0, %v573_v25   ;;  %956 = vst.msk [vmem:[%s1784_s1 + $0x72] sm:$0x1] %vm8_vm0, %v580_v26  }
 0x128   :  { %v586_v27 = vpop.permute.xlu0 %585   ;;  %v593_v28 = vpop.permute.xlu1 %592  }
 0x129   :  { %957 = vst.msk [vmem:[%s1784_s1 + $0x1d] sm:$0x1] %vm8_vm0, %v586_v27   ;;  %958 = vst.msk [vmem:[%s1784_s1 + $0x48] sm:$0x1] %vm8_vm0, %v593_v28  }
 0x12c   :  { %v600_v29 = vpop.permute.xlu0 %599   ;;  %v606_v30 = vpop.permute.xlu1 %605  }
 0x12d   :  { %959 = vst.msk [vmem:[%s1784_s1 + $0x73] sm:$0x1] %vm8_vm0, %v600_v29   ;;  %960 = vst.msk [vmem:[%s1784_s1 + $0x1e] sm:$0x1] %vm8_vm0, %v606_v30  }
 0x130   :  { %v613_v31 = vpop.permute.xlu0 %612   ;;  %v620_v32 = vpop.permute.xlu1 %619  }
 0x131   :  { %961 = vst.msk [vmem:[%s1784_s1 + $0x49] sm:$0x1] %vm8_vm0, %v613_v31   ;;  %962 = vst.msk [vmem:[%s1784_s1 + $0x74] sm:$0x1] %vm8_vm0, %v620_v32  }
 0x134   :  { %v626_v33 = vpop.permute.xlu0 %625   ;;  %v633_v34 = vpop.permute.xlu1 %632  }
 0x135   :  { %963 = vst.msk [vmem:[%s1784_s1 + $0x1f] sm:$0x1] %vm8_vm0, %v626_v33   ;;  %964 = vst.msk [vmem:[%s1784_s1 + $0x4a] sm:$0x1] %vm8_vm0, %v633_v34  }
 0x138   :  { %v640_v35 = vpop.permute.xlu0 %639   ;;  %v646_v36 = vpop.permute.xlu1 %645  }
 0x139   :  { %965 = vst.msk [vmem:[%s1784_s1 + $0x75] sm:$0x1] %vm8_vm0, %v640_v35   ;;  %966 = vst.msk [vmem:[%s1784_s1 + $0x20] sm:$0x1] %vm8_vm0, %v646_v36  }
 0x13c   :  { %v653_v37 = vpop.permute.xlu0 %652   ;;  %v660_v38 = vpop.permute.xlu1 %659  }
 0x13d   :  { %967 = vst.msk [vmem:[%s1784_s1 + $0x4b] sm:$0x1] %vm8_vm0, %v653_v37   ;;  %968 = vst.msk [vmem:[%s1784_s1 + $0x76] sm:$0x1] %vm8_vm0, %v660_v38  }
 0x140   :  { %v850_v39 = vpop.permute.xlu0 %849   ;;  %v864_v40 = vpop.permute.xlu1 %863  }
 0x141   :  { %996 = vst.msk [vmem:[%s1784_s1 + $0x2a] sm:$0x1] %vm851_vm3, %v850_v39  }
 0x142   :  { %998 = vst.msk [vmem:[%s1784_s1 + $0x55] sm:$0x1] %vm865_vm4, %v864_v40  }
 0x143   :  { %997 = vst.msk [vmem:[%s1784_s1 + $0x2a] sm:$0x1] %vm854_vm5, %v850_v39  }
 0x144   :  { %999 = vst.msk [vmem:[%s1784_s1 + $0x55] sm:$0x1] %vm868_vm6, %v864_v40   ;;  %v666_v41 = vpop.permute.xlu0 %665   ;;  %v673_v42 = vpop.permute.xlu1 %672  }
 0x145   :  { %969 = vst.msk [vmem:[%s1784_s1 + $0x21] sm:$0x1] %vm8_vm0, %v666_v41   ;;  %970 = vst.msk [vmem:[%s1784_s1 + $0x4c] sm:$0x1] %vm8_vm0, %v673_v42  }
 0x148   :  { %v680_v43 = vpop.permute.xlu0 %679   ;;  %v686_v44 = vpop.permute.xlu1 %685  }
 0x149   :  { %971 = vst.msk [vmem:[%s1784_s1 + $0x77] sm:$0x1] %vm8_vm0, %v680_v43   ;;  %972 = vst.msk [vmem:[%s1784_s1 + $0x22] sm:$0x1] %vm8_vm0, %v686_v44  }
 0x14c   :  { %v693_v45 = vpop.permute.xlu0 %692   ;;  %v700_v46 = vpop.permute.xlu1 %699  }
 0x14d   :  { %973 = vst.msk [vmem:[%s1784_s1 + $0x4d] sm:$0x1] %vm8_vm0, %v693_v45   ;;  %974 = vst.msk [vmem:[%s1784_s1 + $0x78] sm:$0x1] %vm8_vm0, %v700_v46  }
 0x150   :  { %v706_v47 = vpop.permute.xlu0 %705   ;;  %v713_v48 = vpop.permute.xlu1 %712  }
 0x151   :  { %975 = vst.msk [vmem:[%s1784_s1 + $0x23] sm:$0x1] %vm8_vm0, %v706_v47   ;;  %976 = vst.msk [vmem:[%s1784_s1 + $0x4e] sm:$0x1] %vm8_vm0, %v713_v48  }
 0x154   :  { %v720_v49 = vpop.permute.xlu0 %719   ;;  %v726_v50 = vpop.permute.xlu1 %725  }
 0x155   :  { %977 = vst.msk [vmem:[%s1784_s1 + $0x79] sm:$0x1] %vm8_vm0, %v720_v49   ;;  %978 = vst.msk [vmem:[%s1784_s1 + $0x24] sm:$0x1] %vm8_vm0, %v726_v50  }
 0x158   :  { %v733_v51 = vpop.permute.xlu0 %732   ;;  %v740_v52 = vpop.permute.xlu1 %739  }
 0x159   :  { %979 = vst.msk [vmem:[%s1784_s1 + $0x4f] sm:$0x1] %vm8_vm0, %v733_v51   ;;  %980 = vst.msk [vmem:[%s1784_s1 + $0x7a] sm:$0x1] %vm8_vm0, %v740_v52  }
 0x15c   :  { %v746_v53 = vpop.permute.xlu0 %745   ;;  %v753_v54 = vpop.permute.xlu1 %752  }
 0x15d   :  { %981 = vst.msk [vmem:[%s1784_s1 + $0x25] sm:$0x1] %vm8_vm0, %v746_v53   ;;  %982 = vst.msk [vmem:[%s1784_s1 + $0x50] sm:$0x1] %vm8_vm0, %v753_v54  }
 0x160   :  { %v760_v55 = vpop.permute.xlu0 %759   ;;  %v766_v56 = vpop.permute.xlu1 %765  }
 0x161   :  { %983 = vst.msk [vmem:[%s1784_s1 + $0x7b] sm:$0x1] %vm8_vm0, %v760_v55   ;;  %984 = vst.msk [vmem:[%s1784_s1 + $0x26] sm:$0x1] %vm8_vm0, %v766_v56  }
 0x164   :  { %v773_v57 = vpop.permute.xlu0 %772   ;;  %v780_v58 = vpop.permute.xlu1 %779  }
 0x165   :  { %985 = vst.msk [vmem:[%s1784_s1 + $0x51] sm:$0x1] %vm8_vm0, %v773_v57   ;;  %986 = vst.msk [vmem:[%s1784_s1 + $0x7c] sm:$0x1] %vm8_vm0, %v780_v58  }
 0x168   :  { %v786_v59 = vpop.permute.xlu0 %785   ;;  %v793_v60 = vpop.permute.xlu1 %792  }
 0x169   :  { %987 = vst.msk [vmem:[%s1784_s1 + $0x27] sm:$0x1] %vm8_vm0, %v786_v59   ;;  %988 = vst.msk [vmem:[%s1784_s1 + $0x52] sm:$0x1] %vm8_vm0, %v793_v60  }
 0x16c   :  { %v800_v61 = vpop.permute.xlu0 %799   ;;  %v806_v62 = vpop.permute.xlu1 %805  }
 0x16d   :  { %989 = vst.msk [vmem:[%s1784_s1 + $0x7d] sm:$0x1] %vm8_vm0, %v800_v61   ;;  %990 = vst.msk [vmem:[%s1784_s1 + $0x28] sm:$0x1] %vm8_vm0, %v806_v62  }
 0x170   :  { %v813_v63 = vpop.permute.xlu0 %812   ;;  %v820_v0 = vpop.permute.xlu1 %819  }
 0x171   :  { %991 = vst.msk [vmem:[%s1784_s1 + $0x53] sm:$0x1] %vm8_vm0, %v813_v63   ;;  %992 = vst.msk [vmem:[%s1784_s1 + $0x7e] sm:$0x1] %vm8_vm0, %v820_v0  }
 0x174   :  { %v826_v1 = vpop.permute.xlu0 %825   ;;  %v833_v2 = vpop.permute.xlu1 %832  }
 0x175   :  { %993 = vst.msk [vmem:[%s1784_s1 + $0x29] sm:$0x1] %vm8_vm0, %v826_v1   ;;  %994 = vst.msk [vmem:[%s1784_s1 + $0x54] sm:$0x1] %vm8_vm0, %v833_v2  }
 0x178   :  { %v840_v3 = vpop.permute.xlu0 %839  }
 0x179   :  { %995 = vst.msk [vmem:[%s1784_s1 + $0x7f] sm:$0x1] %vm8_vm0, %v840_v3  }

// kernel: cfnet_forward.113
= control target key start
LH: loop header
LB: loop body
LE: loop exit
PB: predicated region body
PF: predicated region fallthrough
CT: control target
= control target key end

     0   :  { %s860_s9 = smov 0   ;;  %s862_s10 = smov 0   ;;  %s1065_s0 = inlined_call_operand.vmem [shape: bf16[196,384], index: 0, kind: input, shape index: {}]   ;;  %s1066_s1 = inlined_call_operand.vmem [shape: bf16[196,384], index: 1, kind: input, shape index: {}]   ;;  %s1067_s2 = inlined_call_operand.vmem [shape: f32[1,384], index: 2, kind: output, shape index: {}]  }
   0x1   :  { %s864_s11 = smov 0  }
   0x2 LB: > { %s667_s12 = sadd.s32 4294967295, %s843_s11   ;;  %s877_s13 = sadd.s32 1, %s843_s11   ;;  %s843_s11 = sphi %s864_s11, %s1071_s11   ;;  %s839_s10 = sphi %s862_s10, %s1070_s10   ;;  %s835_s9 = sphi %s860_s9, %s1069_s9  }
   0x3   : > { %s16_s14 = ssub.s32 %s843_s11, %s877_s13  ;;  %s19_s15 = sadd.s32 1, %s839_s10 }
   0x4   : > { %p17_p0 = scmp.eq.s32.totalorder %s16_s14, 0  ;;  %p26_p1 = scmp.ne.s32.totalorder %s839_s10, %s835_s9 }
   0x5   : > { %p27_p2 = scmp.eq.s32.totalorder %s843_s11, 0  ;;  %p670_p4 = scmp.ge.s32.totalorder %s843_s11, 3 }
   0x6   : > { %s886_s16 = scalar_select %p17_p0, %s839_s10, %s19_s15  }
   0x7   : > { %p888_p3 = por %p27_p2, %p26_p1  ;;  %104 = sbr.rel (%p670_p4) target bundleno = 54 (0x36), region = 16 }
   0xc   : > { %107 = sbr.rel (!%p888_p3) target bundleno = 33 (0x21), region = 20  ;;  %s109_s18 = sand.u32 (%p888_p3), 1, %s839_s10  }
   0xd   : > { %s671_s19 = sshll.u32 (%p888_p3), %s843_s11, 2  ;;  %s794_s20 = smul.u32 (%p888_p3), 100, %s109_s18 }
   0xe   : > { %s900_s23 = scalar_lea.vmem (%p888_p3), %s1065_s0, %s671_s19 }
   0xf   : > { %v130_v0 = vld [vmem:[%s900_s23] sm:$0xf] (%p888_p3)  ;;  %v132_v1 = vld [vmem:[%s900_s23 + $0xc] sm:$0xf] (%p888_p3)  ;;  %v134_v2 = vld [vmem:[%s900_s23 + $0x18] sm:$0xf] (%p888_p3) }
  0x10   : > { %v136_v3 = vld [vmem:[%s900_s23 + $0x24] sm:$0xf] (%p888_p3)  ;;  %v138_v4 = vld [vmem:[%s900_s23 + $0x30] sm:$0xf] (%p888_p3)  ;;  %s907_s24 = scalar_lea.vmem (%p888_p3), [#allocation2], %s794_s20 }
  0x11   : > { %131 = vst [vmem:[%s907_s24] sm:$0xf] %v130_v0  ;;  %133 = vst [vmem:[%s907_s24 + $0x4] sm:$0xf] %v132_v1  ;;  %v140_v5 = vld [vmem:[%s900_s23 + $0x3c] sm:$0xf] }
  0x12   : > { %135 = vst [vmem:[%s907_s24 + $0x8] sm:$0xf] %v134_v2  ;;  %137 = vst [vmem:[%s907_s24 + $0xc] sm:$0xf] %v136_v3  ;;  %v142_v6 = vld [vmem:[%s900_s23 + $0x48] sm:$0xf] }
  0x13   : > { %139 = vst [vmem:[%s907_s24 + $0x10] sm:$0xf] %v138_v4  ;;  %v144_v7 = vld [vmem:[%s900_s23 + $0x54] sm:$0xf]  ;;  %141 = vst [vmem:[%s907_s24 + $0x14] sm:$0xf] %v140_v5 }
  0x14   : > { %143 = vst [vmem:[%s907_s24 + $0x18] sm:$0xf] %v142_v6  ;;  %145 = vst [vmem:[%s907_s24 + $0x1c] sm:$0xf] %v144_v7  ;;  %v146_v8 = vld [vmem:[%s900_s23 + $0x60] sm:$0xf] }
  0x15   : > { %v148_v9 = vld [vmem:[%s900_s23 + $0x6c] sm:$0xf]  ;;  %v150_v10 = vld [vmem:[%s900_s23 + $0x78] sm:$0xf]  ;;  %147 = vst [vmem:[%s907_s24 + $0x20] sm:$0xf] %v146_v8 }
  0x16   : > { %149 = vst [vmem:[%s907_s24 + $0x24] sm:$0xf] %v148_v9  ;;  %151 = vst [vmem:[%s907_s24 + $0x28] sm:$0xf] %v150_v10  ;;  %v152_v11 = vld [vmem:[%s900_s23 + $0x84] sm:$0xf] }
  0x17   : > { %v154_v12 = vld [vmem:[%s900_s23 + $0x90] sm:$0xf]  ;;  %v156_v13 = vld [vmem:[%s900_s23 + $0x9c] sm:$0xf]  ;;  %153 = vst [vmem:[%s907_s24 + $0x2c] sm:$0xf] %v152_v11 }
  0x18   : > { %155 = vst [vmem:[%s907_s24 + $0x30] sm:$0xf] %v154_v12  ;;  %157 = vst [vmem:[%s907_s24 + $0x34] sm:$0xf] %v156_v13  ;;  %v158_v14 = vld [vmem:[%s900_s23 + $0xa8] sm:$0xf] }
  0x19   : > { %v160_v15 = vld [vmem:[%s900_s23 + $0xb4] sm:$0xf]  ;;  %v162_v16 = vld [vmem:[%s900_s23 + $0xc0] sm:$0xf]  ;;  %159 = vst [vmem:[%s907_s24 + $0x38] sm:$0xf] %v158_v14 }
  0x1a   : > { %161 = vst [vmem:[%s907_s24 + $0x3c] sm:$0xf] %v160_v15  ;;  %163 = vst [vmem:[%s907_s24 + $0x40] sm:$0xf] %v162_v16  ;;  %v164_v17 = vld [vmem:[%s900_s23 + $0xcc] sm:$0xf] }
  0x1b   : > { %v166_v18 = vld [vmem:[%s900_s23 + $0xd8] sm:$0xf]  ;;  %v168_v19 = vld [vmem:[%s900_s23 + $0xe4] sm:$0xf]  ;;  %165 = vst [vmem:[%s907_s24 + $0x44] sm:$0xf] %v164_v17 }
  0x1c   : > { %167 = vst [vmem:[%s907_s24 + $0x48] sm:$0xf] %v166_v18  ;;  %169 = vst [vmem:[%s907_s24 + $0x4c] sm:$0xf] %v168_v19  ;;  %v170_v20 = vld [vmem:[%s900_s23 + $0xf0] sm:$0xf] }
  0x1d   : > { %v172_v21 = vld [vmem:[%s900_s23 + $0xfc] sm:$0xf]  ;;  %v174_v22 = vld [vmem:[%s900_s23 + $0x108] sm:$0xf]  ;;  %171 = vst [vmem:[%s907_s24 + $0x50] sm:$0xf] %v170_v20 }
  0x1e   : > { %173 = vst [vmem:[%s907_s24 + $0x54] sm:$0xf] %v172_v21  ;;  %175 = vst [vmem:[%s907_s24 + $0x58] sm:$0xf] %v174_v22  ;;  %v176_v23 = vld [vmem:[%s900_s23 + $0x114] sm:$0xf] }
  0x1f   : > { %v178_v24 = vld [vmem:[%s900_s23 + $0x120] sm:$0xf]  ;;  %177 = vst [vmem:[%s907_s24 + $0x5c] sm:$0xf] %v176_v23 }
  0x20   : > { %179 = vst [vmem:[%s907_s24 + $0x60] sm:$0xf] %v178_v24 }
  0x21 PF: > { %253 = sbr.rel (!%p888_p3) target bundleno = 54 (0x36), region = 61  ;;  %s255_s25 = sand.u32 (%p888_p3), 1, %s839_s10  }
  0x22   : > { %s672_s26 = sshll.u32 (%p888_p3), %s843_s11, 2  ;;  %s795_s27 = smul.u32 (%p888_p3), 100, %s255_s25 }
  0x23   : > { %s961_s30 = scalar_lea.vmem (%p888_p3), %s1066_s1, %s672_s26 }
  0x24   : > { %v276_v25 = vld [vmem:[%s961_s30] sm:$0xf] (%p888_p3)  ;;  %v278_v26 = vld [vmem:[%s961_s30 + $0xc] sm:$0xf] (%p888_p3)  ;;  %v280_v27 = vld [vmem:[%s961_s30 + $0x18] sm:$0xf] (%p888_p3) }
  0x25   : > { %v282_v28 = vld [vmem:[%s961_s30 + $0x24] sm:$0xf] (%p888_p3)  ;;  %v284_v29 = vld [vmem:[%s961_s30 + $0x30] sm:$0xf] (%p888_p3)  ;;  %s968_s3 = scalar_lea.vmem (%p888_p3), [#allocation3], %s795_s27 }
  0x26   : > { %277 = vst [vmem:[%s968_s3] sm:$0xf] %v276_v25  ;;  %279 = vst [vmem:[%s968_s3 + $0x4] sm:$0xf] %v278_v26  ;;  %v286_v30 = vld [vmem:[%s961_s30 + $0x3c] sm:$0xf] }
  0x27   : > { %281 = vst [vmem:[%s968_s3 + $0x8] sm:$0xf] %v280_v27  ;;  %283 = vst [vmem:[%s968_s3 + $0xc] sm:$0xf] %v282_v28  ;;  %v288_v31 = vld [vmem:[%s961_s30 + $0x48] sm:$0xf] }
  0x28   : > { %285 = vst [vmem:[%s968_s3 + $0x10] sm:$0xf] %v284_v29  ;;  %v290_v32 = vld [vmem:[%s961_s30 + $0x54] sm:$0xf]  ;;  %287 = vst [vmem:[%s968_s3 + $0x14] sm:$0xf] %v286_v30 }
  0x29   : > { %289 = vst [vmem:[%s968_s3 + $0x18] sm:$0xf] %v288_v31  ;;  %291 = vst [vmem:[%s968_s3 + $0x1c] sm:$0xf] %v290_v32  ;;  %v292_v33 = vld [vmem:[%s961_s30 + $0x60] sm:$0xf] }
  0x2a   : > { %v294_v34 = vld [vmem:[%s961_s30 + $0x6c] sm:$0xf]  ;;  %v296_v35 = vld [vmem:[%s961_s30 + $0x78] sm:$0xf]  ;;  %293 = vst [vmem:[%s968_s3 + $0x20] sm:$0xf] %v292_v33 }
  0x2b   : > { %295 = vst [vmem:[%s968_s3 + $0x24] sm:$0xf] %v294_v34  ;;  %297 = vst [vmem:[%s968_s3 + $0x28] sm:$0xf] %v296_v35  ;;  %v298_v36 = vld [vmem:[%s961_s30 + $0x84] sm:$0xf] }
  0x2c   : > { %v300_v37 = vld [vmem:[%s961_s30 + $0x90] sm:$0xf]  ;;  %v302_v38 = vld [vmem:[%s961_s30 + $0x9c] sm:$0xf]  ;;  %299 = vst [vmem:[%s968_s3 + $0x2c] sm:$0xf] %v298_v36 }
  0x2d   : > { %301 = vst [vmem:[%s968_s3 + $0x30] sm:$0xf] %v300_v37  ;;  %303 = vst [vmem:[%s968_s3 + $0x34] sm:$0xf] %v302_v38  ;;  %v304_v39 = vld [vmem:[%s961_s30 + $0xa8] sm:$0xf] }
  0x2e   : > { %v306_v40 = vld [vmem:[%s961_s30 + $0xb4] sm:$0xf]  ;;  %v308_v41 = vld [vmem:[%s961_s30 + $0xc0] sm:$0xf]  ;;  %305 = vst [vmem:[%s968_s3 + $0x38] sm:$0xf] %v304_v39 }
  0x2f   : > { %307 = vst [vmem:[%s968_s3 + $0x3c] sm:$0xf] %v306_v40  ;;  %309 = vst [vmem:[%s968_s3 + $0x40] sm:$0xf] %v308_v41  ;;  %v310_v42 = vld [vmem:[%s961_s30 + $0xcc] sm:$0xf] }
  0x30   : > { %v312_v43 = vld [vmem:[%s961_s30 + $0xd8] sm:$0xf]  ;;  %v314_v44 = vld [vmem:[%s961_s30 + $0xe4] sm:$0xf]  ;;  %311 = vst [vmem:[%s968_s3 + $0x44] sm:$0xf] %v310_v42 }
  0x31   : > { %313 = vst [vmem:[%s968_s3 + $0x48] sm:$0xf] %v312_v43  ;;  %315 = vst [vmem:[%s968_s3 + $0x4c] sm:$0xf] %v314_v44  ;;  %v316_v45 = vld [vmem:[%s961_s30 + $0xf0] sm:$0xf] }
  0x32   : > { %v318_v46 = vld [vmem:[%s961_s30 + $0xfc] sm:$0xf]  ;;  %v320_v47 = vld [vmem:[%s961_s30 + $0x108] sm:$0xf]  ;;  %317 = vst [vmem:[%s968_s3 + $0x50] sm:$0xf] %v316_v45 }
  0x33   : > { %319 = vst [vmem:[%s968_s3 + $0x54] sm:$0xf] %v318_v46  ;;  %321 = vst [vmem:[%s968_s3 + $0x58] sm:$0xf] %v320_v47  ;;  %v322_v48 = vld [vmem:[%s961_s30 + $0x114] sm:$0xf] }
  0x34   : > { %v324_v49 = vld [vmem:[%s961_s30 + $0x120] sm:$0xf]  ;;  %323 = vst [vmem:[%s968_s3 + $0x5c] sm:$0xf] %v322_v48 }
  0x35   : > { %325 = vst [vmem:[%s968_s3 + $0x60] sm:$0xf] %v324_v49 }
  0x36 PF: > { %p673_p5 = scmp.ge.s32.totalorder %s843_s11, 1  ;;  %p398_p6 = scmp.lt.s32.totalorder %s843_s11, 4 }
  0x38   : > { %p399_p7 = pnand %p673_p5, %p398_p6 }
  0x39   : > { %s405_s4 = sand.u32 (!%p399_p7), 1, %s835_s9   ;;  %p435_p8 = scmp.lt.s32.totalorder (!%p399_p7), %s667_s12, 2 }
  0x3a   : > { %402 = sbr.rel (%p399_p7) target bundleno = 129 (0x81), region = 102 }
  0x3b   : > { %s796_s5 = smul.u32 (!%p399_p7), 100, %s405_s4 }
  0x3d   : > { %s1018_s6 = scalar_lea.vmem (!%p399_p7), [#allocation2], %s796_s5  ;;  %s1021_s7 = scalar_lea.vmem (!%p399_p7), [#allocation3], %s796_s5 }
  0x3f   : > { %v677_v50 = vld [vmem:[%s1018_s6] sm:$0xff]   ;;  %v725_v51 = vld [vmem:[%s1021_s7] sm:$0xff]   ;;  %v783_v53 = vld [vmem:[%s1021_s7 + $0x8] sm:$0xff]   ;;  %vm586_vm0 = vcmask 1043456   ;;  %s1073_s12 = smov (!%p435_p8, %s667_s12), 2 }
  0x40   : > { %v772_v52 = vld [vmem:[%s1018_s6 + $0x8] sm:$0xff]   ;;  %v678_v54 = vunpack.c.l.bf16 %v677_v50  ;;  %v679_v55 = vunpack.c.h.bf16 %v677_v50  ;;  %v726_v56 = vunpack.c.l.bf16 %v725_v51  ;;  %v727_v57 = vunpack.c.h.bf16 %v725_v51  ;;  %v773_v60 = vld [vmem:[%s1018_s6 + $0x10] sm:$0xff]   ;;  %v784_v61 = vld [vmem:[%s1021_s7 + $0x10] sm:$0xff]   ;;  %s437_s14 = scalar_lea.vmem %s1067_s2, %s1073_s12 }
  0x41   : > { %v682_v58 = vunpack.c.l.bf16 %v772_v52  ;;  %v730_v59 = vunpack.c.l.bf16 %v783_v53  ;;  %v683_v62 = vunpack.c.h.bf16 %v772_v52  ;;  %v731_v63 = vunpack.c.h.bf16 %v783_v53  ;;  %v774_v5 = vld [vmem:[%s1018_s6 + $0x18] sm:$0xff]   ;;  %v785_v6 = vld [vmem:[%s1021_s7 + $0x18] sm:$0xff]   ;;  %v786_v16 = vld [vmem:[%s1021_s7 + $0x20] sm:$0xff]  }
  0x42   : > { %v538_v0 = vmul.f32 %v726_v56, %v678_v54  ;;  %v539_v1 = vmul.f32 %v727_v57, %v679_v55  ;;  %v686_v2 = vunpack.c.l.bf16 %v773_v60  ;;  %v734_v3 = vunpack.c.l.bf16 %v784_v61  ;;  %v775_v15 = vld [vmem:[%s1018_s6 + $0x20] sm:$0xff]   ;;  %v776_v25 = vld [vmem:[%s1018_s6 + $0x28] sm:$0xff]   ;;  %v787_v26 = vld [vmem:[%s1021_s7 + $0x28] sm:$0xff]  }
  0x43   : > { %v540_v4 = vmul.f32 %v730_v59, %v682_v58  ;;  %v687_v7 = vunpack.c.h.bf16 %v773_v60  ;;  %v735_v8 = vunpack.c.h.bf16 %v784_v61  ;;  %v541_v9 = vmul.f32 %v731_v63, %v683_v62  ;;  %v777_v35 = vld [vmem:[%s1018_s6 + $0x30] sm:$0xff]   ;;  %v788_v36 = vld [vmem:[%s1021_s7 + $0x30] sm:$0xff]   ;;  %v789_v46 = vld [vmem:[%s1021_s7 + $0x38] sm:$0xff]  }
  0x44   : > { %v563_v10 = vadd.f32 %v539_v1, %v538_v0  ;;  %v690_v11 = vunpack.c.l.bf16 %v774_v5  ;;  %v738_v12 = vunpack.c.l.bf16 %v785_v6  ;;  %v542_v13 = vmul.f32 %v734_v3, %v686_v2  ;;  %v778_v45 = vld [vmem:[%s1018_s6 + $0x38] sm:$0xff]   ;;  %v779_v55 = vld [vmem:[%s1018_s6 + $0x40] sm:$0xff]   ;;  %v790_v56 = vld [vmem:[%s1021_s7 + $0x40] sm:$0xff]  }
  0x45   : > { %v691_v17 = vunpack.c.h.bf16 %v774_v5  ;;  %v739_v18 = vunpack.c.h.bf16 %v785_v6  ;;  %v543_v19 = vmul.f32 %v735_v8, %v687_v7  ;;  %v694_v21 = vunpack.c.l.bf16 %v775_v15  ;;  %v780_v1 = vld [vmem:[%s1018_s6 + $0x48] sm:$0xff]   ;;  %v791_v2 = vld [vmem:[%s1021_s7 + $0x48] sm:$0xff]  }
  0x46   : > { %v564_v14 = vadd.f32 %v563_v10, %v540_v4  ;;  %v742_v22 = vunpack.c.l.bf16 %v786_v16  ;;  %v544_v23 = vmul.f32 %v738_v12, %v690_v11  ;;  %v695_v27 = vunpack.c.h.bf16 %v775_v15  ;;  %v781_v11 = vld [vmem:[%s1018_s6 + $0x50] sm:$0xff]   ;;  %v792_v12 = vld [vmem:[%s1021_s7 + $0x50] sm:$0xff]  }
  0x47   : > { %v743_v28 = vunpack.c.h.bf16 %v786_v16  ;;  %v545_v29 = vmul.f32 %v739_v18, %v691_v17  ;;  %v698_v31 = vunpack.c.l.bf16 %v776_v25  ;;  %v746_v32 = vunpack.c.l.bf16 %v787_v26 }
  0x48   : > { %v565_v20 = vadd.f32 %v564_v14, %v541_v9  ;;  %v546_v33 = vmul.f32 %v742_v22, %v694_v21  ;;  %v699_v37 = vunpack.c.h.bf16 %v776_v25  ;;  %v747_v38 = vunpack.c.h.bf16 %v787_v26  ;;  %v782_v21 = vld [vmem:[%s1018_s6 + $0x58] sm:$0xff]   ;;  %v793_v22 = vld [vmem:[%s1021_s7 + $0x58] sm:$0xff]   ;;  %v512_v26 = vld [vmem:[%s1021_s7 + $0x60] sm:$0x3] }
  0x49   : > { %v547_v39 = vmul.f32 %v743_v28, %v695_v27  ;;  %v702_v41 = vunpack.c.l.bf16 %v777_v35  ;;  %v750_v42 = vunpack.c.l.bf16 %v788_v36  ;;  %v548_v43 = vmul.f32 %v746_v32, %v698_v31 }
  0x4a   : > { %v566_v24 = vadd.f32 %v565_v20, %v542_v13  ;;  %v703_v47 = vunpack.c.h.bf16 %v777_v35  ;;  %v751_v48 = vunpack.c.h.bf16 %v788_v36  ;;  %v549_v49 = vmul.f32 %v747_v38, %v699_v37 }
  0x4b   : > { %v706_v51 = vunpack.c.l.bf16 %v778_v45  ;;  %v754_v52 = vunpack.c.l.bf16 %v789_v46  ;;  %v550_v53 = vmul.f32 %v750_v42, %v702_v41  ;;  %v707_v57 = vunpack.c.h.bf16 %v778_v45 }
  0x4c   : > { %v567_v30 = vadd.f32 %v566_v24, %v543_v19  ;;  %v755_v58 = vunpack.c.h.bf16 %v789_v46  ;;  %v551_v59 = vmul.f32 %v751_v48, %v703_v47  ;;  %v710_v61 = vunpack.c.l.bf16 %v779_v55  ;;  %v462_v24 = vld [vmem:[%s1018_s6 + $0x60] sm:$0x3] }
  0x4d   : > { %v758_v62 = vunpack.c.l.bf16 %v790_v56  ;;  %v552_v63 = vmul.f32 %v754_v52, %v706_v51  ;;  %v711_v3 = vunpack.c.h.bf16 %v779_v55  ;;  %v759_v4 = vunpack.c.h.bf16 %v790_v56 }
  0x4e   : > { %v568_v34 = vadd.f32 %v567_v30, %v544_v23  ;;  %v553_v5 = vmul.f32 %v755_v58, %v707_v57  ;;  %v714_v7 = vunpack.c.l.bf16 %v780_v1  ;;  %v762_v8 = vunpack.c.l.bf16 %v791_v2 }
  0x4f   : > { %v554_v9 = vmul.f32 %v758_v62, %v710_v61  ;;  %v715_v13 = vunpack.c.h.bf16 %v780_v1  ;;  %v763_v14 = vunpack.c.h.bf16 %v791_v2  ;;  %v555_v15 = vmul.f32 %v759_v4, %v711_v3 }
  0x50   : > { %v569_v40 = vadd.f32 %v568_v34, %v545_v29  ;;  %v718_v17 = vunpack.c.l.bf16 %v781_v11  ;;  %v766_v18 = vunpack.c.l.bf16 %v792_v12  ;;  %v556_v19 = vmul.f32 %v762_v8, %v714_v7 }
  0x51   : > { %v719_v23 = vunpack.c.h.bf16 %v781_v11  ;;  %v767_v25 = vunpack.c.h.bf16 %v792_v12  ;;  %v557_v27 = vmul.f32 %v763_v14, %v715_v13  ;;  %v722_v29 = vunpack.c.l.bf16 %v782_v21 }
  0x52   : > { %v570_v44 = vadd.f32 %v569_v40, %v546_v33  ;;  %v770_v30 = vunpack.c.l.bf16 %v793_v22  ;;  %v558_v31 = vmul.f32 %v766_v18, %v718_v17  ;;  %v487_v33 = vunpack.c.l.bf16 %v462_v24 }
  0x53   : > { %v537_v34 = vunpack.c.l.bf16 %v512_v26  ;;  %v723_v35 = vunpack.c.h.bf16 %v782_v21  ;;  %v771_v36 = vunpack.c.h.bf16 %v793_v22  ;;  %v559_v37 = vmul.f32 %v767_v25, %v719_v23 }
  0x54   : > { %v571_v50 = vadd.f32 %v570_v44, %v547_v39  ;;  %v560_v39 = vmul.f32 %v770_v30, %v722_v29 }
  0x55   : > { %v562_v41 = vmul.f32 %v537_v34, %v487_v33  ;;  %v561_v42 = vmul.f32 %v771_v36, %v723_v35 }
  0x56   : > { %v572_v54 = vadd.f32 %v571_v50, %v548_v43 }
  0x57   : > { %v587_v45 = vsel %vm586_vm0, %v562_v41, 0.0 }
  0x58   : > { %v573_v60 = vadd.f32 %v572_v54, %v549_v49 }
  0x5a   : > { %v574_v0 = vadd.f32 %v573_v60, %v550_v53 }
  0x5c   : > { %v575_v6 = vadd.f32 %v574_v0, %v551_v59 }
  0x5e   : > { %v576_v10 = vadd.f32 %v575_v6, %v552_v63 }
  0x60   : > { %v577_v16 = vadd.f32 %v576_v10, %v553_v5 }
  0x62   : > { %v578_v20 = vadd.f32 %v577_v16, %v554_v9 }
  0x64   : > { %v579_v28 = vadd.f32 %v578_v20, %v555_v15 }
  0x66   : > { %v580_v32 = vadd.f32 %v579_v28, %v556_v19 }
  0x68   : > { %v581_v38 = vadd.f32 %v580_v32, %v557_v27 }
  0x6a   : > { %v582_v40 = vadd.f32 %v581_v38, %v558_v31 }
  0x6c   : > { %v583_v43 = vadd.f32 %v582_v40, %v559_v37 }
  0x6e   : > { %v584_v44 = vadd.f32 %v583_v43, %v560_v39 }
  0x70   : > { %v585_v46 = vadd.f32 %v584_v44, %v561_v42 }
  0x72   : > { %v588_v47 = vadd.f32 %v587_v45, %v585_v46 }
  0x74   : > { %v589_v48 = vrot.slane %v588_v47, 4 }
  0x76   : > { %v590_v49 = vadd.f32 %v589_v48, %v588_v47 }
  0x78   : > { %v591_v50 = vrot.slane %v590_v49, 2 }
  0x7a   : > { %v592_v51 = vadd.f32 %v591_v50, %v590_v49 }
  0x7c   : > { %v593_v52 = vrot.slane %v592_v51, 1 }
  0x7e   : > { %v594_v53 = vadd.f32 %v593_v52, %v592_v51 }
  0x80   : > { %595 = vst [vmem:[%s437_s14] sm:$0x1] %v594_v53 }
  0x81 PF: > { %p9_p9 = scmp.ge.s32.totalorder %s877_s13, 5   ;;  %s1069_s9 = smov %s839_s10 }
  0x82   : > { %s1070_s10 = smov %s886_s16  ;;  %s1071_s11 = smov %s877_s13 }
  0x83   :  { %11 = sbr.rel (!%p9_p9) target bundleno = 2 (0x2), region = 153 }

// kernel: cfnet_forward.112
= control target key start
LH: loop header
LB: loop body
LE: loop exit
PB: predicated region body
PF: predicated region fallthrough
CT: control target
= control target key end

     0   :  { %vm27_vm0 = vcmask 1043456   ;;  %v92_v0 = vmov 0.0   ;;  %vm93_vm1 = vmmov 0   ;;  %v94_v3 = vmov 0   ;;  %s127_s1 = inlined_call_operand.vmem [shape: bf16[1,8,128], index: 1, kind: input, shape index: {}]   ;;  %s128_s0 = inlined_call_operand.vmem [shape: bf16[1,3,8], index: 0, kind: input, shape index: {}]   ;;  %s129_s2 = inlined_call_operand.vmem [shape: f32[1,3,1], index: 2, kind: input, shape index: {}]   ;;  %s130_s3 = inlined_call_operand.vmem [shape: f32[1,3,128], index: 3, kind: output, shape index: {}]  }
   0x1   :  { %82 = vmatprep.subr.bf16.mxu0 %v92_v0  ;;  %v16_v1 = vld [vmem:[%s127_s1] sm:$0xf]  ;;  %84 = vmatprep.mubr.msk.bf16.mxu0 %vm93_vm1, %v92_v0  ;;  %vm23_vm2 = vcmask 64512  }
   0x2   :  { %v29_v2 = vsel %vm27_vm0, %v16_v1, 0  ;;  %91 = vset.pattern.permute.xlu0 %v94_v3  ;;  %v17_v4 = vld [vmem:[%s129_s2] sm:$0x7] }
   0x3   :  { %83 = vmatpush3.bf16.msra.mxu0 %v29_v2  ;;  %v15_v5 = vld [vmem:[%s128_s0] sm:$0x3]  ;;  %20 = vperm.xlu0 %91, %v17_v4  }
   0x6   :  { %85 = vmatmul.mubr.msk.bf16.vlgmr.msra.gmra.mxu0 %vm23_vm2, %v15_v5 }
  0x7e   :  { %v21_v6 = vpop.permute.xlu0 %20 }
  0xc6   :  { %v65_v7 = vpop.f32.mrf.mxu0 }
  0xc7   :  { %v66_v8 = vadd.f32 %v65_v7, %v21_v6 }
  0xc8   :  { %v86_v9 = vpop.f32.mrf.mxu0 }
  0xc9   :  { %vm71_vm3 = vcmp.ge.f32.partialorder %v66_v8, 0.0  ;;  %v72_v10 = vmul.f32 0.1, %v66_v8 }
  0xca   :  { %v68_v11 = vpop.f32.mrf.mxu0 }
  0xcb   :  { %v73_v12 = vsel %vm71_vm3, %v66_v8, %v72_v10 }
  0xcc   :  { %74 = vst [vmem:[%s130_s3] sm:$0x7] %v73_v12  ;;  %v87_v13 = vpop.f32.mrf.mxu0 }

// kernel: tile.234
= control target key start
LH: loop header
LB: loop body
LE: loop exit
PB: predicated region body
PF: predicated region fallthrough
CT: control target
= control target key end

     0   :  { %vm8_vm0 = vcmask 64512   ;;  %s40_s8 = smov 8   ;;  %s41_s9 = smov 16   ;;  %vm14_vm1 = vcmask 261312   ;;  %vm20_vm2 = vcmask 195712   ;;  %vm26_vm3 = vcmask 130112   ;;  %s58_s0 = inlined_call_operand.vmem [shape: f32[4,8], index: 0, kind: input, shape index: {}]   ;;  %s59_s1 = inlined_call_operand.vmem [shape: f32[1,32,1], index: 1, kind: output, shape index: {}]  }
   0x1   :  { %v5_v0 = vld [vmem:[%s58_s0] sm:$0xf]  ;;  %s39_s0 = smov 24  }
   0x2   :  { %6 = vst [vmem:[#allocation1] sm:$0xf] %v5_v0 }
   0x9   :  { %v11_v1 = vld [vmem:[#allocation1 + $0x3] sm:$0x1]   ;;  %v23_v2 = vld [vmem:[#allocation1 + $0x1] sm:$0x1]   ;;  %v7_v3 = vld [vmem:[#allocation1] sm:$0x1]  }
   0xa   :  { %12 = vrot.lane.b32.xlu0 %v11_v1, %s39_s0  ;;  %24 = vrot.lane.b32.xlu1 %v23_v2, %s40_s8  ;;  %v17_v4 = vld [vmem:[#allocation1 + $0x2] sm:$0x1]   ;;  %9 = vst.msk [vmem:[#allocation0] sm:$0x1] %vm8_vm0, %v7_v3  }
   0xe   :  { %18 = vrot.lane.b32.xlu0 %v17_v4, %s41_s9 }
  0x7c   :  { %v13_v5 = vpop.permute.xlu0 %12   ;;  %v25_v6 = vpop.permute.xlu1 %24  }
  0x7d   :  { %15 = vst.msk [vmem:[#allocation0] sm:$0x1] %vm14_vm1, %v13_v5  }
  0x80   :  { %v19_v7 = vpop.permute.xlu0 %18  }
  0x81   :  { %21 = vst.msk [vmem:[#allocation0] sm:$0x1] %vm20_vm2, %v19_v7  }
  0x82   :  { %27 = vst.msk [vmem:[#allocation0] sm:$0x1] %vm26_vm3, %v25_v6  }
  0x89   :  { %v32_v8 = vld [vmem:[#allocation0] sm:$0x1] }
  0x8a   :  { %35 = vst [vmem:[%s59_s1] sm:$0x1] %v32_v8 }

// kernel: cfnet_forward.130
= control target key start
LH: loop header
LB: loop body
LE: loop exit
PB: predicated region body
PF: predicated region fallthrough
CT: control target
= control target key end

     0   :  { %s537_s12 = smov 0   ;;  %s571_s0 = inlined_call_operand.vmem [shape: bf16[6,32,72], index: 0, kind: input, shape index: {}]   ;;  %s572_s1 = inlined_call_operand.vmem [shape: bf16[6,72,128], index: 1, kind: input, shape index: {}]   ;;  %s573_s2 = inlined_call_operand.vmem [shape: f32[6,32,1], index: 2, kind: input, shape index: {}]   ;;  %s574_s3 = inlined_call_operand.vmem [shape: f32[6,32,128], index: 3, kind: output, shape index: {}]  }
   0x1 LB: > { %s441_s13 = sadd.s32 4294967295, %s514_s12   ;;  %p445_p0 = scmp.ge.s32.totalorder %s514_s12, 1  ;;  %s514_s12 = sphi %s537_s12, %s13_s12  }
   0x2   : > { %p157_p1 = scmp.lt.s32.totalorder %s514_s12, 7 }
   0x4   : > { %p158_p2 = pnand %p445_p0, %p157_p1 }
   0x5   : > { %p191_p3 = scmp.lt.s32.totalorder (!%p158_p2), %s441_s13, 5 }
   0x6   : > { %161 = sbr.rel (%p158_p2) target bundleno = 241 (0xf1), region = 32 }
   0xb   : > { %v516_v0 = vmov 0   ;;  %s576_s13 = smov (!%p191_p3, %s441_s13), 5  ;;  %vm293_vm0 = vcmask 1043456   ;;  %vm286_vm1 = vcmask 588800  }
   0xc   : > { %500 = vset.pattern.permute.xlu1 %v516_v0  ;;  %499 = vset.pattern.permute.xlu0 %v516_v0  ;;  %s489_s14 = smul.u32 36, %s576_s13  ;;  %s464_s15 = sshll.u32 %s576_s13, 4 }
   0xd   : > { %s195_s18 = scalar_lea.vmem %s571_s0, %s464_s15  ;;  %s465_s22 = sshll.u32 %s576_s13, 5 }
   0xe   : > { %s200_s21 = scalar_lea.vmem %s572_s1, %s489_s14  ;;  %v506_v1 = vld [vmem:[%s195_s18] sm:$0xff]   ;;  %s205_s25 = scalar_lea.vmem %s573_s2, %s465_s22  ;;  %v507_v12 = vld [vmem:[%s195_s18 + $0x8] sm:$0xff]  }
   0xf   : > { %v501_v2 = vld [vmem:[%s200_s21 + $0x20] ss:$0 sps:$4 sm:$0xff]   ;;  %v502_v3 = vld [vmem:[%s200_s21 + $0x18] sm:$0xff]   ;;  %484 = vmatprep.mubr.msk.bf16.mxu0 %vm286_vm1, %v506_v1  ;;  %v503_v5 = vld [vmem:[%s200_s21 + $0x10] sm:$0xff]   ;;  %s210_s28 = scalar_lea.vmem %s574_s3, %s465_s22 }
  0x10   : > { %488 = vmatprep.subr.msk.bf16.mxu0 %vm293_vm0, %v501_v2  ;;  %v295_v4 = vsel %vm293_vm0, %v501_v2, 0  ;;  %v227_v6 = vld [vmem:[%s205_s25 + $0x10] sm:$0xff]  ;;  %v225_v7 = vld [vmem:[%s205_s25] sm:$0xff]  ;;  %v228_v8 = vld [vmem:[%s205_s25 + $0x18] sm:$0xff] }
  0x11   : > { %475 = vmatpush3.bf16.msra.mxu0 %v295_v4  ;;  %241 = vperm.xlu1 %500, %v227_v6   ;;  %v504_v9 = vld [vmem:[%s200_s21 + $0x8] sm:$0xff]   ;;  %v505_v11 = vld [vmem:[%s200_s21] sm:$0xff]  }
  0x12   : > { %476 = vmatprep.subr.bf16.mxu0 %v502_v3  ;;  %231 = vperm.xlu0 %499, %v225_v7   ;;  %v226_v10 = vld [vmem:[%s205_s25 + $0x8] sm:$0xff] }
  0x15   : > { %477 = vmatpush3.bf16.msra.mxu0 %v502_v3  ;;  %246 = vperm.xlu1 %500, %v228_v8  }
  0x16   : > { %478 = vmatprep.subr.bf16.mxu0 %v503_v5  ;;  %236 = vperm.xlu0 %499, %v226_v10  }
  0x19   : > { %479 = vmatpush3.bf16.msra.mxu0 %v503_v5 }
  0x1a   : > { %480 = vmatprep.subr.bf16.mxu0 %v504_v9 }
  0x1d   : > { %481 = vmatpush3.bf16.msra.mxu0 %v504_v9 }
  0x1e   : > { %482 = vmatprep.subr.bf16.mxu0 %v505_v11 }
  0x21   : > { %483 = vmatpush3.bf16.msra.mxu0 %v505_v11 }
  0x24   : > { %485 = vmatmul.mubr.msk.bf16.vlgmr.msra.gmra.mxu0 %vm286_vm1, %v507_v12 }
  0x8c   : > { %v242_v13 = vpop.permute.xlu1 %241 }
  0x8d   : > { %v232_v14 = vpop.permute.xlu0 %231 }
  0x90   : > { %v247_v20 = vpop.permute.xlu1 %246 }
  0x91   : > { %v237_v25 = vpop.permute.xlu0 %236 }
  0xe4   : > { %v486_v15 = vpop.f32.mrf.mxu0 }
  0xe5   : > { %v340_v16 = vadd.f32 %v486_v15, %v242_v13 }
  0xe6   : > { %v331_v17 = vpop.f32.mrf.mxu0 }
  0xe7   : > { %vm348_vm2 = vcmp.ge.f32.partialorder %v340_v16, 0.0  ;;  %v352_v18 = vmul.f32 0.2, %v340_v16  ;;  %v332_v19 = vadd.f32 %v331_v17, %v232_v14 }
  0xe8   : > { %v487_v21 = vpop.f32.mrf.mxu0 }
  0xe9   : > { %v356_v22 = vsel %vm348_vm2, %v340_v16, %v352_v18  ;;  %vm346_vm3 = vcmp.ge.f32.partialorder %v332_v19, 0.0  ;;  %v350_v23 = vmul.f32 0.2, %v332_v19  ;;  %v343_v24 = vadd.f32 %v487_v21, %v247_v20 }
  0xea   : > { %360 = vst [vmem:[%s210_s28 + $0x10] sm:$0xff] %v356_v22  ;;  %v334_v26 = vpop.f32.mrf.mxu0 }
  0xeb   : > { %v354_v27 = vsel %vm346_vm3, %v332_v19, %v350_v23  ;;  %vm349_vm4 = vcmp.ge.f32.partialorder %v343_v24, 0.0  ;;  %v353_v28 = vmul.f32 0.2, %v343_v24  ;;  %v335_v29 = vadd.f32 %v334_v26, %v237_v25 }
  0xec   : > { %358 = vst [vmem:[%s210_s28] sm:$0xff] %v354_v27 }
  0xed   : > { %v357_v30 = vsel %vm349_vm4, %v343_v24, %v353_v28  ;;  %vm347_vm5 = vcmp.ge.f32.partialorder %v335_v29, 0.0  ;;  %v351_v31 = vmul.f32 0.2, %v335_v29 }
  0xee   : > { %361 = vst [vmem:[%s210_s28 + $0x18] sm:$0xff] %v357_v30 }
  0xef   : > { %v355_v32 = vsel %vm347_vm5, %v335_v29, %v351_v31 }
  0xf0   : > { %359 = vst [vmem:[%s210_s28 + $0x8] sm:$0xff] %v355_v32 }
  0xf1 PF: > { %s13_s12 = sadd.s32 1, %s514_s12  }
  0xf2   : > { %p10_p4 = scmp.ge.s32.totalorder %s13_s12, 8  }
  0xf4   :  { %12 = sbr.rel (!%p10_p4) target bundleno = 1 (0x1), region = 68 }

// kernel: cfnet_forward.131
= control target key start
LH: loop header
LB: loop body
LE: loop exit
PB: predicated region body
PF: predicated region fallthrough
CT: control target
= control target key end

     0   :  { %s715_s15 = smov 0   ;;  %s771_s0 = inlined_call_operand.vmem [shape: bf16[6,3,72], index: 0, kind: input, shape index: {}]   ;;  %s772_s1 = inlined_call_operand.vmem [shape: bf16[6,72,512], index: 1, kind: input, shape index: {}]   ;;  %s773_s2 = inlined_call_operand.vmem [shape: f32[6,3,1], index: 2, kind: input, shape index: {}]   ;;  %s774_s3 = inlined_call_operand.vmem [shape: f32[6,3,512], index: 3, kind: input, shape index: {}]   ;;  %s775_s4 = inlined_call_operand.vmem [shape: f32[6,3,512], index: 4, kind: output, shape index: {}]  }
   0x1 LB: > { %s596_s16 = sadd.s32 4294967295, %s687_s15   ;;  %p600_p0 = scmp.ge.s32.totalorder %s687_s15, 1  ;;  %s687_s15 = sphi %s715_s15, %s14_s15  }
   0x2   : > { %p190_p1 = scmp.lt.s32.totalorder %s687_s15, 7 }
   0x4   : > { %p191_p2 = pnand %p600_p0, %p190_p1 }
   0x5   : > { %p229_p3 = scmp.lt.s32.totalorder (!%p191_p2), %s596_s16, 5 }
   0x6   : > { %194 = sbr.rel (%p191_p2) target bundleno = 246 (0xf6), region = 36 }
   0xb   : > { %v689_v0 = vmov 0   ;;  %s777_s16 = smov (!%p229_p3, %s596_s16), 5  ;;  %vm372_vm0 = vcmask 1043456   ;;  %vm368_vm1 = vcmask 588800  }
   0xc   : > { %417 = vmatprep.mubr.bf16.mxu0 %v689_v0  ;;  %458 = vmatprep.mubr.bf16.mxu1 %v689_v0  ;;  %s640_s17 = smul.u32 144, %s777_s16  ;;  %s603_s21 = sshll.u32 %s777_s16, 2 }
   0xd   : > { %650 = vset.pattern.permute.xlu0 %v689_v0  ;;  %s241_s24 = scalar_lea.vmem %s773_s2, %s603_s21  ;;  %s601_s25 = sshll.u32 %s777_s16, 1 }
   0xe   : > { %s729_s20 = scalar_lea.vmem %s772_s1, %s640_s17  ;;  %v272_v19 = vld [vmem:[%s241_s24] sm:$0x7]  ;;  %s232_s28 = scalar_lea.vmem %s771_s0, %s601_s25 }
   0xf   : > { %v270_v1 = vld [vmem:[%s729_s20 + $0x80] sm:$0xff]  ;;  %v271_v2 = vld [vmem:[%s729_s20 + $0x88] sm:$0xff]  ;;  %275 = vperm.xlu0 %650, %v272_v19   ;;  %s638_s29 = sshll.u32 %s777_s16, 4 }
  0x10   : > { %v625_v3 = vcombine.high %v270_v1, %v270_v1  ;;  %v627_v4 = vcombine.high %v271_v2, %v271_v2  ;;  %v624_v5 = vcombine.low %v270_v1, %v270_v1  ;;  %v626_v6 = vcombine.low %v271_v2, %v271_v2  ;;  %v655_v7 = vld [vmem:[%s729_s20 + $0x64] ss:$16 sps:$4 sm:$0xff]   ;;  %v657_v8 = vld [vmem:[%s729_s20 + $0x6c] ss:$16 sps:$4 sm:$0xff]   ;;  %v659_v11 = vld [vmem:[%s729_s20 + $0x60] ss:$16 sps:$4 sm:$0xff]   ;;  %s246_s6 = scalar_lea.vmem %s774_s3, %s638_s29  ;;  %s251_s9 = scalar_lea.vmem %s775_s4, %s638_s29 }
  0x11   : > { %v660_v12 = vld [vmem:[%s729_s20 + $0x68] ss:$16 sps:$4 sm:$0xff]   ;;  %v661_v13 = vld [vmem:[%s729_s20 + $0x44] ss:$16 sps:$4 sm:$0xff]   ;;  %v663_v14 = vld [vmem:[%s729_s20 + $0x4c] ss:$16 sps:$4 sm:$0xff]  }
  0x12   : > { %628 = vmatprep.subr.msk.bf16.mxu0 %vm372_vm0, %v625_v3  ;;  %630 = vmatprep.subr.msk.bf16.mxu1 %vm372_vm0, %v627_v4  ;;  %v374_v9 = vsel %vm372_vm0, %v624_v5, 0  ;;  %v380_v10 = vsel %vm372_vm0, %v626_v6, 0  ;;  %v665_v15 = vld [vmem:[%s729_s20 + $0x40] ss:$16 sps:$4 sm:$0xff]   ;;  %v666_v16 = vld [vmem:[%s729_s20 + $0x48] ss:$16 sps:$4 sm:$0xff]  }
  0x13   : > { %392 = vmatpush1.bf16.msra.mxu0 %v374_v9  ;;  %433 = vmatpush1.bf16.msra.mxu1 %v380_v10  ;;  %v667_v17 = vld [vmem:[%s729_s20 + $0x24] ss:$16 sps:$4 sm:$0xff]   ;;  %v669_v18 = vld [vmem:[%s729_s20 + $0x2c] ss:$16 sps:$4 sm:$0xff]   ;;  %v671_v20 = vld [vmem:[%s729_s20 + $0x20] ss:$16 sps:$4 sm:$0xff]  }
  0x14   : > { %393 = vmatprep.subr.bf16.mxu0 %v655_v7  ;;  %434 = vmatprep.subr.bf16.mxu1 %v657_v8  ;;  %v672_v21 = vld [vmem:[%s729_s20 + $0x28] ss:$16 sps:$4 sm:$0xff]   ;;  %v673_v22 = vld [vmem:[%s729_s20 + $0x4] ss:$16 sps:$4 sm:$0xff]   ;;  %v675_v23 = vld [vmem:[%s729_s20 + $0xc] ss:$16 sps:$4 sm:$0xff]  }
  0x15   : > { %v677_v24 = vld [vmem:[%s729_s20] ss:$16 sps:$4 sm:$0xff]   ;;  %v678_v25 = vld [vmem:[%s729_s20 + $0x8] ss:$16 sps:$4 sm:$0xff]  }
  0x16   : > { %v253_v26 = vld [vmem:[%s232_s28] sm:$0x3]  ;;  %v468_v29 = vld [vmem:[%s246_s6 + $0x8] sm:$0x77] }
  0x17   : > { %394 = vmatpush1.bf16.msra.mxu0 %v659_v11  ;;  %435 = vmatpush1.bf16.msra.mxu1 %v660_v12  ;;  %v467_v28 = vld [vmem:[%s246_s6] sm:$0x77]  ;;  %v472_v35 = vcombine.high %v468_v29, %v468_v29 }
  0x18   : > { %395 = vmatprep.subr.bf16.mxu0 %v661_v13  ;;  %436 = vmatprep.subr.bf16.mxu1 %v663_v14  ;;  %v471_v34 = vcombine.high %v467_v28, %v467_v28 }
  0x1b   : > { %396 = vmatpush1.bf16.msra.mxu0 %v665_v15  ;;  %437 = vmatpush1.bf16.msra.mxu1 %v666_v16 }
  0x1c   : > { %397 = vmatprep.subr.bf16.mxu0 %v667_v17  ;;  %438 = vmatprep.subr.bf16.mxu1 %v669_v18 }
  0x1f   : > { %398 = vmatpush1.bf16.msra.mxu0 %v671_v20  ;;  %439 = vmatpush1.bf16.msra.mxu1 %v672_v21 }
  0x20   : > { %399 = vmatprep.subr.bf16.mxu0 %v673_v22  ;;  %440 = vmatprep.subr.bf16.mxu1 %v675_v23 }
  0x23   : > { %400 = vmatpush1.bf16.msra.mxu0 %v677_v24  ;;  %441 = vmatpush1.bf16.msra.mxu1 %v678_v25 }
  0x26   : > { %629 = vmatmul.mubr.msk.bf16.vlgmr.msra.gmra.mxu0 %vm368_vm1, %v253_v26  ;;  %631 = vmatmul.mubr.msk.bf16.vlgmr.msra.gmra.mxu1 %vm368_vm1, %v253_v26 }
  0x8a   : > { %v276_v27 = vpop.permute.xlu0 %275 }
  0xe6   : > { %v419_v30 = vpop.f32.mrf.mxu0  ;;  %v460_v31 = vpop.f32.mrf.mxu1 }
  0xe7   : > { %v420_v32 = vadd.f32 %v419_v30, %v276_v27  ;;  %v461_v33 = vadd.f32 %v460_v31, %v276_v27 }
  0xe8   : > { %v421_v36 = vpop.f32.mrf.mxu0  ;;  %v462_v37 = vpop.f32.mrf.mxu1 }
  0xe9   : > { %v475_v38 = vadd.f32 %v467_v28, %v420_v32  ;;  %v477_v39 = vadd.f32 %v468_v29, %v461_v33  ;;  %v422_v40 = vadd.f32 %v421_v36, %v276_v27  ;;  %v463_v41 = vadd.f32 %v462_v37, %v276_v27 }
  0xea   : > { %v423_v42 = vpop.f32.mrf.mxu0  ;;  %v464_v43 = vpop.f32.mrf.mxu1 }
  0xeb   : > { %v632_v44 = vclamps-f32 %v475_v38, 1.0  ;;  %v634_v45 = vclamps-f32 %v477_v39, 1.0  ;;  %v476_v46 = vadd.f32 %v471_v34, %v422_v40  ;;  %v478_v47 = vadd.f32 %v472_v35, %v463_v41 }
  0xec   : > { %v424_v48 = vpop.f32.mrf.mxu0  ;;  %v465_v49 = vpop.f32.mrf.mxu1 }
  0xed   : > { %v487_v50 = vadd.f32 1.0, %v632_v44  ;;  %v489_v51 = vadd.f32 1.0, %v634_v45  ;;  %v633_v52 = vclamps-f32 %v476_v46, 1.0  ;;  %v635_v53 = vclamps-f32 %v478_v47, 1.0 }
  0xef   : > { %v488_v54 = vadd.f32 1.0, %v633_v52  ;;  %v490_v55 = vadd.f32 1.0, %v635_v53  ;;  %v491_v56 = vmul.f32 127.5, %v487_v50  ;;  %v493_v57 = vmul.f32 127.5, %v489_v51 }
  0xf1   : > { %v492_v58 = vmul.f32 127.5, %v488_v54  ;;  %v494_v59 = vmul.f32 127.5, %v490_v55 }
  0xf3   : > { %v499_v60 = vcombine.low %v491_v56, %v492_v58  ;;  %v500_v61 = vcombine.low %v493_v57, %v494_v59 }
  0xf5   : > { %503 = vst [vmem:[%s251_s9] sm:$0x77] %v499_v60  ;;  %504 = vst [vmem:[%s251_s9 + $0x8] sm:$0x77] %v500_v61 }
  0xf6 PF: > { %s14_s15 = sadd.s32 1, %s687_s15  }
  0xf7   : > { %p11_p4 = scmp.ge.s32.totalorder %s14_s15, 8  }
  0xf9   :  { %13 = sbr.rel (!%p11_p4) target bundleno = 1 (0x1), region = 75 }

</bundles_post_ra>
